<compile_context>
chip_gen: v6e
topology: v6e:2x2x1
jax: 0.10.0
libtpu: 0.0.40
codegen_flags: <defaults>
</compile_context>

<pallas_src>
import jax
import jax.numpy as jnp
from jax import lax
from jax.experimental import pallas as pl
from jax.experimental.pallas import tpu as pltpu


# ----------------------------- fused Pallas kernel --------------------------

def _birnn_fused_kernel(ids_ref, emb_ref,
                        w1xf_ref, w1xb_ref, w1h_ref, b1_ref,
                        w2a_ref, w2b_ref, w2h_ref, b2_ref,
                        fcw_ref, fcb_ref, out_ref,
                        gx1_sc, gx2_sc):
    """Fused embedding + 2-layer bidirectional LSTM + Linear.

    ids_ref:  (T*Bp, 2) int32; col 0: token id at time s, col 1: token id at time T-1-s
              (row index = s*Bp + b, time-major, batch padded to Bp)
    emb_ref:  (Vp, D)   vocab-padded embedding table (VMEM resident)
    w1x*_ref: (D, 8H)   layer-1 input weights, gate cols [i_f i_b f_f f_b g_f g_b o_f o_b],
              w1xf has only fwd-direction columns (bwd zeroed), w1xb the complement
    w*h_ref:  (2H, 8H)  block-diagonal packed recurrent weights
    w2a/w2b:  (2H, 8H)  layer-2 input-projection accumulation weights (see pack_params)
    b*_ref:   (1, 8H)   packed biases (b_ih + b_hh)
    fcw_ref:  (2H, O), fcb_ref: (1, O)
    out_ref:  (Bp, O)   logits (padded batch rows sliced off in the wrapper)
    gx1_sc:   (T*Bp, 8H) layer-1 merged input-projection scratch
    gx2_sc:   (T*Bp, 8H) layer-2 merged input-projection scratch (accumulated)
    """
    Bp = out_ref.shape[0]
    H2 = w1h_ref.shape[0]            # 2H packed state width, [h_fwd | h_bwd]
    G = w1h_ref.shape[1]             # 8H packed gate width
    TB = gx1_sc.shape[0]
    T = TB // Bp
    Vp = emb_ref.shape[0]

    # ---- in-kernel embedding lookup: one-hot MXU gather (exact, no HBM x_flat) ----
    ids = ids_ref[...]
    lanes = lax.broadcasted_iota(jnp.int32, (TB, Vp), 1)
    onehot_f = (lanes == ids[:, 0:1]).astype(jnp.float32)    # forward-time ordering
    onehot_r = (lanes == ids[:, 1:2]).astype(jnp.float32)    # reversed-time ordering
    x_f = jnp.dot(onehot_f, emb_ref[...], preferred_element_type=jnp.float32)
    x_r = jnp.dot(onehot_r, emb_ref[...], preferred_element_type=jnp.float32)

    # ---- layer-1 hoisted, direction-MERGED input projection (no per-step select) ----
    gx1_sc[...] = (jnp.dot(x_f, w1xf_ref[...], preferred_element_type=jnp.float32)
                   + jnp.dot(x_r, w1xb_ref[...], preferred_element_type=jnp.float32)
                   + b1_ref[...])
    # layer-2 merged projection starts at its bias; layer-1's loop accumulates into it
    gx2_sc[...] = jnp.zeros((TB, G), jnp.float32) + b2_ref[...]

    def recurrence(gx_sc, wh, w2a=None, w2b=None):
        """One fused fwd+bwd LSTM pass. Step s handles fwd time s and bwd time T-1-s."""
        h = jnp.zeros((Bp, H2), jnp.float32)
        c = jnp.zeros((Bp, H2), jnp.float32)
        # TODO(synk): switch to lax.fori_loop(..., unroll=2-4) if H or T are scaled up.
        for s in range(T):                       # fully unrolled (T static, small)
            # single (Bp,2H)x(2H,8H) MXU op per step covers both directions
            gates = gx_sc[pl.ds(s * Bp, Bp), :] + jnp.dot(
                h, wh, preferred_element_type=jnp.float32)
            # EUP only where needed: i|f is 2*H2 = 128 lanes (vreg aligned at H=32)
            sig_if = jax.nn.sigmoid(gates[:, :2 * H2])
            g = jnp.tanh(gates[:, 2 * H2:3 * H2])
            o = jax.nn.sigmoid(gates[:, 3 * H2:])
            c = sig_if[:, H2:] * c + sig_if[:, :H2] * g
            h = o * jnp.tanh(c)
            if w2a is not None:
                # Accumulate layer-2's (already direction-merged) input projection.
                # Full-width (Bp, 8H) lane-dense accumulating stores, off the h-chain.
                r = T - 1 - s
                gx2_sc[pl.ds(s * Bp, Bp), :] += jnp.dot(
                    h, w2a, preferred_element_type=jnp.float32)
                gx2_sc[pl.ds(r * Bp, Bp), :] += jnp.dot(
                    h, w2b, preferred_element_type=jnp.float32)
        return h

    recurrence(gx1_sc, w1h_ref[...], w2a_ref[...], w2b_ref[...])   # layer 1
    h_final = recurrence(gx2_sc, w2h_ref[...])                     # layer 2

    # hidden = cat(hidden[-2], hidden[-1]) == [h2_fwd(T-1) | h2_bwd(0)] == h_final
    out_ref[...] = (jnp.dot(h_final, fcw_ref[...], preferred_element_type=jnp.float32)
                    + fcb_ref[...])


# ----------------------------- one-time weight packing -----------------------

def _interleave_cols(cf, cb, H):
    """Interleave per-gate H-wide column blocks: [i_f i_b f_f f_b g_f g_b o_f o_b]."""
    out = []
    for n in range(4):                                   # gate order i, f, g, o
        sl = slice(n * H, (n + 1) * H)
        out += [cf[:, sl], cb[:, sl]]
    return jnp.concatenate(out, axis=1)


def _interleave_bias(bf, bb, H):
    out = []
    for n in range(4):
        sl = slice(n * H, (n + 1) * H)
        out += [bf[sl], bb[sl]]
    return jnp.concatenate(out).reshape(1, 8 * H)


def _block_diag_wh(whf_T, whb_T, H):
    zH = jnp.zeros((H, H), jnp.float32)
    cols = []
    for n in range(4):
        sl = slice(n * H, (n + 1) * H)
        cols += [jnp.concatenate([whf_T[:, sl], zH], axis=0),
                 jnp.concatenate([zH, whb_T[:, sl]], axis=0)]
    return jnp.concatenate(cols, axis=1)                 # (2H, 8H) block-diagonal


def pack_params(params):
    """One-time packing into the fused-kernel layout. Cache the result across calls."""
    assert len(params["lstm"]) == 2, "fused kernel is specialized for num_layers=2"
    H = params["lstm"][0]["w_hh_f"].shape[1]
    l1, l2 = params["lstm"]

    # layer 1: split input weights by direction-owned gate columns (complement zeroed)
    wxf1, wxb1 = l1["w_ih_f"].T.astype(jnp.float32), l1["w_ih_b"].T.astype(jnp.float32)
    z1 = jnp.zeros_like(wxf1)
    w1xf = _interleave_cols(wxf1, z1, H)                 # fwd-direction columns only
    w1xb = _interleave_cols(z1, wxb1, H)                 # bwd-direction columns only
    w1h = _block_diag_wh(l1["w_hh_f"].T, l1["w_hh_b"].T, H)
    b1 = _interleave_bias(l1["b_ih_f"] + l1["b_hh_f"], l1["b_ih_b"] + l1["b_hh_b"], H)

    # layer 2 (input dim 2H): accumulation weights so gx2 lands already merged.
    # At layer-1 step s, packed h = [h1_fwd(s) | h1_bwd(T-1-s)]:
    #   merged_gx2[s]     += h @ W2A   (fwd rows -> fwd cols, bwd rows -> bwd cols)
    #   merged_gx2[T-1-s] += h @ W2B   (fwd rows -> bwd cols, bwd rows -> fwd cols)
    wxf2, wxb2 = l2["w_ih_f"].T.astype(jnp.float32), l2["w_ih_b"].T.astype(jnp.float32)
    zh = jnp.zeros((H, 4 * H), jnp.float32)
    w2a = jnp.concatenate([_interleave_cols(wxf2[:H], zh, H),
                           _interleave_cols(zh, wxb2[H:], H)], axis=0)
    w2b = jnp.concatenate([_interleave_cols(zh, wxb2[:H], H),
                           _interleave_cols(wxf2[H:], zh, H)], axis=0)
    w2h = _block_diag_wh(l2["w_hh_f"].T, l2["w_hh_b"].T, H)
    b2 = _interleave_bias(l2["b_ih_f"] + l2["b_hh_f"], l2["b_ih_b"] + l2["b_hh_b"], H)

    # vocab-padded embedding table (lane-aligned in-kernel one-hot gather)
    V, D = params["embedding"].shape
    Vp = ((V + 127) // 128) * 128
    emb = jnp.zeros((Vp, D), jnp.float32).at[:V].set(params["embedding"].astype(jnp.float32))

    fcw = params["fc_w"].T.astype(jnp.float32)           # (2H, O)
    fcb = params["fc_b"].reshape(1, -1).astype(jnp.float32)
    return dict(emb=emb, w1xf=w1xf, w1xb=w1xb, w1h=w1h, b1=b1,
                w2a=w2a, w2b=w2b, w2h=w2h, b2=b2, fcw=fcw, fcb=fcb)


# ----------------------------- wrapper ---------------------------------------

@jax.jit
def birnn_text_forward(packed, words):
    """words: (B, T) int32 token ids -> logits (B, output_dim). Single pallas_call."""
    B, T = words.shape
    G = packed["w1h"].shape[1]                            # 8H
    O = packed["fcw"].shape[1]
    Bp = ((B + 7) // 8) * 8                               # pad batch to the sublane tile

    # tiny int32 plumbing only; all f32 work (embedding included) happens in-kernel
    words_p = jnp.zeros((Bp, T), jnp.int32).at[:B, :].set(words.astype(jnp.int32))
    ids_f = words_p.T.reshape(T * Bp, 1)                  # row s*Bp+b = words[b, s]
    ids_r = words_p[:, ::-1].T.reshape(T * Bp, 1)         # row s*Bp+b = words[b, T-1-s]
    ids = jnp.concatenate([ids_f, ids_r], axis=1)

    vmem = pl.BlockSpec(memory_space=pltpu.MemorySpace.VMEM)
    out = pl.pallas_call(
        _birnn_fused_kernel,
        out_shape=jax.ShapeDtypeStruct((Bp, O), jnp.float32),
        in_specs=[vmem] * 12,
        out_specs=vmem,
        scratch_shapes=[pltpu.VMEM((T * Bp, G), jnp.float32),   # layer-1 merged gates
                        pltpu.VMEM((T * Bp, G), jnp.float32)],  # layer-2 merged gates
        compiler_params=pltpu.CompilerParams(vmem_limit_bytes=32 * 1024 * 1024),
    )(ids, packed["emb"], packed["w1xf"], packed["w1xb"], packed["w1h"], packed["b1"],
      packed["w2a"], packed["w2b"], packed["w2h"], packed["b2"],
      packed["fcw"], packed["fcb"])
    return out[:B]                                        # drop padded batch rows


# ----------------------------- pure-JAX reference ---------------------------

def _lstm_dir_ref(x_tbd, w_ih, w_hh, b_ih, b_hh):
    T, B, _ = x_tbd.shape
    H = w_hh.shape[1]

    def step(carry, x_t):
        h, c = carry
        gates = x_t @ w_ih.T + h @ w_hh.T + b_ih + b_hh
        i = jax.nn.sigmoid(gates[:, :H])
        f = jax.nn.sigmoid(gates[:, H:2 * H])
        g = jnp.tanh(gates[:, 2 * H:3 * H])
        o = jax.nn.sigmoid(gates[:, 3 * H:])
        c = f * c + i * g
        h = o * jnp.tanh(c)
        return (h, c), h

    (hT, _), out = lax.scan(step, (jnp.zeros((B, H), jnp.float32),
                                   jnp.zeros((B, H), jnp.float32)), x_tbd)
    return out, hT


def birnn_text_ref(params, words):
    emb = jnp.take(params["embedding"], words, axis=0)
    x = jnp.transpose(emb, (1, 0, 2)).astype(jnp.float32)
    h_f = h_b = None
    for lp in params["lstm"]:
        out_f, h_f = _lstm_dir_ref(x, lp["w_ih_f"], lp["w_hh_f"], lp["b_ih_f"], lp["b_hh_f"])
        out_b_rev, h_b = _lstm_dir_ref(x[::-1], lp["w_ih_b"], lp["w_hh_b"],
                                       lp["b_ih_b"], lp["b_hh_b"])
        x = jnp.concatenate([out_f, out_b_rev[::-1]], axis=-1)
    hidden = jnp.concatenate([h_f, h_b], axis=1)
    return hidden @ params["fc_w"].T + params["fc_b"]


# ----------------------------- params ---------------------------------------

def init_params(key, vocab_size, embedding_dim, output_dim, hidden_dim, num_layers):
    scale = 1.0 / float(hidden_dim) ** 0.5

    def u(k, shape):
        return jax.random.uniform(k, shape, jnp.float32, -scale, scale)

    keys = jax.random.split(key, 2 + num_layers)
    params = {"embedding": jax.random.normal(keys[0], (vocab_size, embedding_dim), jnp.float32)}

    lstm = []
    for l in range(num_layers):
        in_dim = embedding_dim if l == 0 else 2 * hidden_dim
        k = jax.random.split(keys[1 + l], 8)
        lstm.append(dict(
            w_ih_f=u(k[0], (4 * hidden_dim, in_dim)),
            w_hh_f=u(k[1], (4 * hidden_dim, hidden_dim)),
            b_ih_f=u(k[2], (4 * hidden_dim,)),
            b_hh_f=u(k[3], (4 * hidden_dim,)),
            w_ih_b=u(k[4], (4 * hidden_dim, in_dim)),
            w_hh_b=u(k[5], (4 * hidden_dim, hidden_dim)),
            b_ih_b=u(k[6], (4 * hidden_dim,)),
            b_hh_b=u(k[7], (4 * hidden_dim,)),
        ))
    params["lstm"] = lstm

    kf = jax.random.split(keys[1 + num_layers], 2)
    fscale = 1.0 / float(2 * hidden_dim) ** 0.5
    params["fc_w"] = jax.random.uniform(kf[0], (output_dim, 2 * hidden_dim), jnp.float32,
                                        -fscale, fscale)
    params["fc_b"] = jax.random.uniform(kf[1], (output_dim,), jnp.float32, -fscale, fscale)
    return params


# ----------------------------- main ------------------------------------------

if __name__ == "__main__":
    VOCAB, EMB, OUT, HID, LAYERS = 50, 32, 4, 32, 2
    B, T = 2, 8

    key = jax.random.PRNGKey(0)
    k_params, k_words = jax.random.split(key)
    params = init_params(k_params, VOCAB, EMB, OUT, HID, LAYERS)
    words = jax.random.randint(k_words, (B, T), 0, VOCAB, dtype=jnp.int32)

    packed = pack_params(params)      # one-time packing; reuse across forward calls
    pred = jax.block_until_ready(birnn_text_forward(packed, words))
    ref = jax.block_until_ready(birnn_text_ref(params, words))

    assert pred.shape == (B, OUT)
    assert jnp.allclose(pred, ref, atol=1e-4, rtol=1e-4), (pred, ref)

    print("KERNEL_OK")
</pallas_src>

<mosaic_0001>
module attributes {stable_mosaic.version = 11 : i64} {
  func.func @_birnn_fused_kernel(%arg0: memref<64x2xi32, #tpu.memory_space<vmem>>, %arg1: memref<128x32xf32, #tpu.memory_space<vmem>>, %arg2: memref<32x256xf32, #tpu.memory_space<vmem>>, %arg3: memref<32x256xf32, #tpu.memory_space<vmem>>, %arg4: memref<64x256xf32, #tpu.memory_space<vmem>>, %arg5: memref<1x256xf32, #tpu.memory_space<vmem>>, %arg6: memref<64x256xf32, #tpu.memory_space<vmem>>, %arg7: memref<64x256xf32, #tpu.memory_space<vmem>>, %arg8: memref<64x256xf32, #tpu.memory_space<vmem>>, %arg9: memref<1x256xf32, #tpu.memory_space<vmem>>, %arg10: memref<64x4xf32, #tpu.memory_space<vmem>>, %arg11: memref<1x4xf32, #tpu.memory_space<vmem>>, %arg12: memref<8x4xf32, #tpu.memory_space<vmem>>, %arg13: memref<64x256xf32, #tpu.memory_space<vmem>>, %arg14: memref<64x256xf32, #tpu.memory_space<vmem>>) attributes {dimension_semantics = [], scalar_prefetch = 0 : i64, scratch_operands = 2 : i64, tpu.core_type = #tpu.core_type<tc>} {
    %c0 = arith.constant 0 : index
    %c0_0 = arith.constant 0 : index
    %0 = vector.load %arg0[%c0, %c0_0] : memref<64x2xi32, #tpu.memory_space<vmem>>, vector<64x2xi32>
    %1 = tpu.iota {dimensions = array<i32: 1>} : vector<64x128xi32>
    %2 = vector.extract_strided_slice %0 {offsets = [0, 0], sizes = [64, 1], strides = [1, 1]} : vector<64x2xi32> to vector<64x1xi32>
    %3 = vector.broadcast %2 : vector<64x1xi32> to vector<64x128xi32>
    %4 = arith.cmpi eq, %1, %3 : vector<64x128xi32>
    %5 = arith.extui %4 : vector<64x128xi1> to vector<64x128xi32>
    %6 = arith.sitofp %5 : vector<64x128xi32> to vector<64x128xf32>
    %7 = vector.extract_strided_slice %0 {offsets = [0, 1], sizes = [64, 1], strides = [1, 1]} : vector<64x2xi32> to vector<64x1xi32>
    %8 = vector.broadcast %7 : vector<64x1xi32> to vector<64x128xi32>
    %9 = arith.cmpi eq, %1, %8 : vector<64x128xi32>
    %10 = arith.extui %9 : vector<64x128xi1> to vector<64x128xi32>
    %11 = arith.sitofp %10 : vector<64x128xi32> to vector<64x128xf32>
    %c0_1 = arith.constant 0 : index
    %c0_2 = arith.constant 0 : index
    %12 = vector.load %arg1[%c0_1, %c0_2] : memref<128x32xf32, #tpu.memory_space<vmem>>, vector<128x32xf32>
    %cst = arith.constant dense<0.000000e+00> : vector<64x32xf32>
    %13 = tpu.matmul %6, %12, %cst {dimension_numbers = #tpu.dot_dimension_numbers<[1], [0], [0], [1], [0, 0, 1, 1], [], []>} : vector<64x128xf32>, vector<128x32xf32>, vector<64x32xf32> -> vector<64x32xf32>
    %c0_3 = arith.constant 0 : index
    %c0_4 = arith.constant 0 : index
    %14 = vector.load %arg1[%c0_3, %c0_4] : memref<128x32xf32, #tpu.memory_space<vmem>>, vector<128x32xf32>
    %cst_5 = arith.constant dense<0.000000e+00> : vector<64x32xf32>
    %15 = tpu.matmul %11, %14, %cst_5 {dimension_numbers = #tpu.dot_dimension_numbers<[1], [0], [0], [1], [0, 0, 1, 1], [], []>} : vector<64x128xf32>, vector<128x32xf32>, vector<64x32xf32> -> vector<64x32xf32>
    %c0_6 = arith.constant 0 : index
    %c0_7 = arith.constant 0 : index
    %16 = vector.load %arg2[%c0_6, %c0_7] : memref<32x256xf32, #tpu.memory_space<vmem>>, vector<32x256xf32>
    %cst_8 = arith.constant dense<0.000000e+00> : vector<64x256xf32>
    %17 = tpu.matmul %13, %16, %cst_8 {dimension_numbers = #tpu.dot_dimension_numbers<[1], [0], [0], [1], [0, 0, 1, 1], [], []>} : vector<64x32xf32>, vector<32x256xf32>, vector<64x256xf32> -> vector<64x256xf32>
    %c0_9 = arith.constant 0 : index
    %c0_10 = arith.constant 0 : index
    %18 = vector.load %arg3[%c0_9, %c0_10] : memref<32x256xf32, #tpu.memory_space<vmem>>, vector<32x256xf32>
    %cst_11 = arith.constant dense<0.000000e+00> : vector<64x256xf32>
    %19 = tpu.matmul %15, %18, %cst_11 {dimension_numbers = #tpu.dot_dimension_numbers<[1], [0], [0], [1], [0, 0, 1, 1], [], []>} : vector<64x32xf32>, vector<32x256xf32>, vector<64x256xf32> -> vector<64x256xf32>
    %20 = arith.addf %17, %19 : vector<64x256xf32>
    %c0_12 = arith.constant 0 : index
    %c0_13 = arith.constant 0 : index
    %21 = vector.load %arg5[%c0_12, %c0_13] : memref<1x256xf32, #tpu.memory_space<vmem>>, vector<1x256xf32>
    %22 = vector.broadcast %21 : vector<1x256xf32> to vector<64x256xf32>
    %23 = arith.addf %20, %22 : vector<64x256xf32>
    %c0_14 = arith.constant 0 : index
    %c0_15 = arith.constant 0 : index
    %24 = vector.load %arg13[%c0_14, %c0_15] : memref<64x256xf32, #tpu.memory_space<vmem>>, vector<64x256xf32>
    tpu.vector_store %arg13[%c0_14, %c0_15], %23 {strides = array<i32>} : memref<64x256xf32, #tpu.memory_space<vmem>>, vector<64x256xf32>,
    %cst_16 = arith.constant 0.000000e+00 : f32
    %25 = vector.broadcast %cst_16 : f32 to vector<64x256xf32>
    %c0_17 = arith.constant 0 : index
    %c0_18 = arith.constant 0 : index
    %26 = vector.load %arg9[%c0_17, %c0_18] : memref<1x256xf32, #tpu.memory_space<vmem>>, vector<1x256xf32>
    %27 = vector.broadcast %26 : vector<1x256xf32> to vector<64x256xf32>
    %28 = arith.addf %25, %27 : vector<64x256xf32>
    %c0_19 = arith.constant 0 : index
    %c0_20 = arith.constant 0 : index
    %29 = vector.load %arg14[%c0_19, %c0_20] : memref<64x256xf32, #tpu.memory_space<vmem>>, vector<64x256xf32>
    tpu.vector_store %arg14[%c0_19, %c0_20], %28 {strides = array<i32>} : memref<64x256xf32, #tpu.memory_space<vmem>>, vector<64x256xf32>,
    %c0_21 = arith.constant 0 : index
    %c0_22 = arith.constant 0 : index
    %30 = vector.load %arg4[%c0_21, %c0_22] : memref<64x256xf32, #tpu.memory_space<vmem>>, vector<64x256xf32>
    %c0_23 = arith.constant 0 : index
    %c0_24 = arith.constant 0 : index
    %31 = vector.load %arg6[%c0_23, %c0_24] : memref<64x256xf32, #tpu.memory_space<vmem>>, vector<64x256xf32>
    %c0_25 = arith.constant 0 : index
    %c0_26 = arith.constant 0 : index
    %32 = vector.load %arg7[%c0_25, %c0_26] : memref<64x256xf32, #tpu.memory_space<vmem>>, vector<64x256xf32>
    %cst_27 = arith.constant 0.000000e+00 : f32
    %33 = vector.broadcast %cst_27 : f32 to vector<8x64xf32>
    %cst_28 = arith.constant 0.000000e+00 : f32
    %34 = vector.broadcast %cst_28 : f32 to vector<8x64xf32>
    %c0_29 = arith.constant 0 : index
    %c0_30 = arith.constant 0 : index
    %35 = vector.load %arg13[%c0_29, %c0_30] : memref<64x256xf32, #tpu.memory_space<vmem>>, vector<8x256xf32>
    %cst_31 = arith.constant dense<0.000000e+00> : vector<8x256xf32>
    %36 = tpu.matmul %33, %30, %cst_31 {dimension_numbers = #tpu.dot_dimension_numbers<[1], [0], [0], [1], [0, 0, 1, 1], [], []>} : vector<8x64xf32>, vector<64x256xf32>, vector<8x256xf32> -> vector<8x256xf32>
    %37 = arith.addf %35, %36 : vector<8x256xf32>
    %38 = vector.extract_strided_slice %37 {offsets = [0, 0], sizes = [8, 128], strides = [1, 1]} : vector<8x256xf32> to vector<8x128xf32>
    %39 = arith.negf %38 : vector<8x128xf32>
    %40 = math.exp %39 : vector<8x128xf32>
    %cst_32 = arith.constant 1.000000e+00 : f32
    %41 = vector.broadcast %cst_32 : f32 to vector<8x128xf32>
    %42 = arith.addf %41, %40 : vector<8x128xf32>
    %43 = arith.divf %41, %42 : vector<8x128xf32>
    %44 = vector.extract_strided_slice %37 {offsets = [0, 128], sizes = [8, 64], strides = [1, 1]} : vector<8x256xf32> to vector<8x64xf32>
    %45 = math.tanh %44 : vector<8x64xf32>
    %46 = vector.extract_strided_slice %37 {offsets = [0, 192], sizes = [8, 64], strides = [1, 1]} : vector<8x256xf32> to vector<8x64xf32>
    %47 = arith.negf %46 : vector<8x64xf32>
    %48 = math.exp %47 : vector<8x64xf32>
    %cst_33 = arith.constant 1.000000e+00 : f32
    %49 = vector.broadcast %cst_33 : f32 to vector<8x64xf32>
    %50 = arith.addf %49, %48 : vector<8x64xf32>
    %51 = arith.divf %49, %50 : vector<8x64xf32>
    %52 = vector.extract_strided_slice %43 {offsets = [0, 64], sizes = [8, 64], strides = [1, 1]} : vector<8x128xf32> to vector<8x64xf32>
    %53 = arith.mulf %52, %34 : vector<8x64xf32>
    %54 = vector.extract_strided_slice %43 {offsets = [0, 0], sizes = [8, 64], strides = [1, 1]} : vector<8x128xf32> to vector<8x64xf32>
    %55 = arith.mulf %54, %45 : vector<8x64xf32>
    %56 = arith.addf %53, %55 : vector<8x64xf32>
    %57 = math.tanh %56 : vector<8x64xf32>
    %58 = arith.mulf %51, %57 : vector<8x64xf32>
    %c0_34 = arith.constant 0 : index
    %c0_35 = arith.constant 0 : index
    %59 = vector.load %arg14[%c0_34, %c0_35] : memref<64x256xf32, #tpu.memory_space<vmem>>, vector<8x256xf32>
    %cst_36 = arith.constant dense<0.000000e+00> : vector<8x256xf32>
    %60 = tpu.matmul %58, %31, %cst_36 {dimension_numbers = #tpu.dot_dimension_numbers<[1], [0], [0], [1], [0, 0, 1, 1], [], []>} : vector<8x64xf32>, vector<64x256xf32>, vector<8x256xf32> -> vector<8x256xf32>
    %61 = arith.addf %59, %60 : vector<8x256xf32>
    %c0_37 = arith.constant 0 : index
    %c0_38 = arith.constant 0 : index
    %62 = vector.load %arg14[%c0_37, %c0_38] : memref<64x256xf32, #tpu.memory_space<vmem>>, vector<8x256xf32>
    tpu.vector_store %arg14[%c0_37, %c0_38], %61 {strides = array<i32>} : memref<64x256xf32, #tpu.memory_space<vmem>>, vector<8x256xf32>,
    %c56 = arith.constant 56 : index
    %c0_39 = arith.constant 0 : index
    %63 = vector.load %arg14[%c56, %c0_39] : memref<64x256xf32, #tpu.memory_space<vmem>>, vector<8x256xf32>
    %cst_40 = arith.constant dense<0.000000e+00> : vector<8x256xf32>
    %64 = tpu.matmul %58, %32, %cst_40 {dimension_numbers = #tpu.dot_dimension_numbers<[1], [0], [0], [1], [0, 0, 1, 1], [], []>} : vector<8x64xf32>, vector<64x256xf32>, vector<8x256xf32> -> vector<8x256xf32>
    %65 = arith.addf %63, %64 : vector<8x256xf32>
    %c56_41 = arith.constant 56 : index
    %c0_42 = arith.constant 0 : index
    %66 = vector.load %arg14[%c56_41, %c0_42] : memref<64x256xf32, #tpu.memory_space<vmem>>, vector<8x256xf32>
    tpu.vector_store %arg14[%c56_41, %c0_42], %65 {strides = array<i32>} : memref<64x256xf32, #tpu.memory_space<vmem>>, vector<8x256xf32>,
    %c8 = arith.constant 8 : index
    %c0_43 = arith.constant 0 : index
    %67 = vector.load %arg13[%c8, %c0_43] : memref<64x256xf32, #tpu.memory_space<vmem>>, vector<8x256xf32>
    %cst_44 = arith.constant dense<0.000000e+00> : vector<8x256xf32>
    %68 = tpu.matmul %58, %30, %cst_44 {dimension_numbers = #tpu.dot_dimension_numbers<[1], [0], [0], [1], [0, 0, 1, 1], [], []>} : vector<8x64xf32>, vector<64x256xf32>, vector<8x256xf32> -> vector<8x256xf32>
    %69 = arith.addf %67, %68 : vector<8x256xf32>
    %70 = vector.extract_strided_slice %69 {offsets = [0, 0], sizes = [8, 128], strides = [1, 1]} : vector<8x256xf32> to vector<8x128xf32>
    %71 = arith.negf %70 : vector<8x128xf32>
    %72 = math.exp %71 : vector<8x128xf32>
    %cst_45 = arith.constant 1.000000e+00 : f32
    %73 = vector.broadcast %cst_45 : f32 to vector<8x128xf32>
    %74 = arith.addf %73, %72 : vector<8x128xf32>
    %75 = arith.divf %73, %74 : vector<8x128xf32>
    %76 = vector.extract_strided_slice %69 {offsets = [0, 128], sizes = [8, 64], strides = [1, 1]} : vector<8x256xf32> to vector<8x64xf32>
    %77 = math.tanh %76 : vector<8x64xf32>
    %78 = vector.extract_strided_slice %69 {offsets = [0, 192], sizes = [8, 64], strides = [1, 1]} : vector<8x256xf32> to vector<8x64xf32>
    %79 = arith.negf %78 : vector<8x64xf32>
    %80 = math.exp %79 : vector<8x64xf32>
    %cst_46 = arith.constant 1.000000e+00 : f32
    %81 = vector.broadcast %cst_46 : f32 to vector<8x64xf32>
    %82 = arith.addf %81, %80 : vector<8x64xf32>
    %83 = arith.divf %81, %82 : vector<8x64xf32>
    %84 = vector.extract_strided_slice %75 {offsets = [0, 64], sizes = [8, 64], strides = [1, 1]} : vector<8x128xf32> to vector<8x64xf32>
    %85 = arith.mulf %84, %56 : vector<8x64xf32>
    %86 = vector.extract_strided_slice %75 {offsets = [0, 0], sizes = [8, 64], strides = [1, 1]} : vector<8x128xf32> to vector<8x64xf32>
    %87 = arith.mulf %86, %77 : vector<8x64xf32>
    %88 = arith.addf %85, %87 : vector<8x64xf32>
    %89 = math.tanh %88 : vector<8x64xf32>
    %90 = arith.mulf %83, %89 : vector<8x64xf32>
    %c8_47 = arith.constant 8 : index
    %c0_48 = arith.constant 0 : index
    %91 = vector.load %arg14[%c8_47, %c0_48] : memref<64x256xf32, #tpu.memory_space<vmem>>, vector<8x256xf32>
    %cst_49 = arith.constant dense<0.000000e+00> : vector<8x256xf32>
    %92 = tpu.matmul %90, %31, %cst_49 {dimension_numbers = #tpu.dot_dimension_numbers<[1], [0], [0], [1], [0, 0, 1, 1], [], []>} : vector<8x64xf32>, vector<64x256xf32>, vector<8x256xf32> -> vector<8x256xf32>
    %93 = arith.addf %91, %92 : vector<8x256xf32>
    %c8_50 = arith.constant 8 : index
    %c0_51 = arith.constant 0 : index
    %94 = vector.load %arg14[%c8_50, %c0_51] : memref<64x256xf32, #tpu.memory_space<vmem>>, vector<8x256xf32>
    tpu.vector_store %arg14[%c8_50, %c0_51], %93 {strides = array<i32>} : memref<64x256xf32, #tpu.memory_space<vmem>>, vector<8x256xf32>,
    %c48 = arith.constant 48 : index
    %c0_52 = arith.constant 0 : index
    %95 = vector.load %arg14[%c48, %c0_52] : memref<64x256xf32, #tpu.memory_space<vmem>>, vector<8x256xf32>
    %cst_53 = arith.constant dense<0.000000e+00> : vector<8x256xf32>
    %96 = tpu.matmul %90, %32, %cst_53 {dimension_numbers = #tpu.dot_dimension_numbers<[1], [0], [0], [1], [0, 0, 1, 1], [], []>} : vector<8x64xf32>, vector<64x256xf32>, vector<8x256xf32> -> vector<8x256xf32>
    %97 = arith.addf %95, %96 : vector<8x256xf32>
    %c48_54 = arith.constant 48 : index
    %c0_55 = arith.constant 0 : index
    %98 = vector.load %arg14[%c48_54, %c0_55] : memref<64x256xf32, #tpu.memory_space<vmem>>, vector<8x256xf32>
    tpu.vector_store %arg14[%c48_54, %c0_55], %97 {strides = array<i32>} : memref<64x256xf32, #tpu.memory_space<vmem>>, vector<8x256xf32>,
    %c16 = arith.constant 16 : index
    %c0_56 = arith.constant 0 : index
    %99 = vector.load %arg13[%c16, %c0_56] : memref<64x256xf32, #tpu.memory_space<vmem>>, vector<8x256xf32>
    %cst_57 = arith.constant dense<0.000000e+00> : vector<8x256xf32>
    %100 = tpu.matmul %90, %30, %cst_57 {dimension_numbers = #tpu.dot_dimension_numbers<[1], [0], [0], [1], [0, 0, 1, 1], [], []>} : vector<8x64xf32>, vector<64x256xf32>, vector<8x256xf32> -> vector<8x256xf32>
    %101 = arith.addf %99, %100 : vector<8x256xf32>
    %102 = vector.extract_strided_slice %101 {offsets = [0, 0], sizes = [8, 128], strides = [1, 1]} : vector<8x256xf32> to vector<8x128xf32>
    %103 = arith.negf %102 : vector<8x128xf32>
    %104 = math.exp %103 : vector<8x128xf32>
    %cst_58 = arith.constant 1.000000e+00 : f32
    %105 = vector.broadcast %cst_58 : f32 to vector<8x128xf32>
    %106 = arith.addf %105, %104 : vector<8x128xf32>
    %107 = arith.divf %105, %106 : vector<8x128xf32>
    %108 = vector.extract_strided_slice %101 {offsets = [0, 128], sizes = [8, 64], strides = [1, 1]} : vector<8x256xf32> to vector<8x64xf32>
    %109 = math.tanh %108 : vector<8x64xf32>
    %110 = vector.extract_strided_slice %101 {offsets = [0, 192], sizes = [8, 64], strides = [1, 1]} : vector<8x256xf32> to vector<8x64xf32>
    %111 = arith.negf %110 : vector<8x64xf32>
    %112 = math.exp %111 : vector<8x64xf32>
    %cst_59 = arith.constant 1.000000e+00 : f32
    %113 = vector.broadcast %cst_59 : f32 to vector<8x64xf32>
    %114 = arith.addf %113, %112 : vector<8x64xf32>
    %115 = arith.divf %113, %114 : vector<8x64xf32>
    %116 = vector.extract_strided_slice %107 {offsets = [0, 64], sizes = [8, 64], strides = [1, 1]} : vector<8x128xf32> to vector<8x64xf32>
    %117 = arith.mulf %116, %88 : vector<8x64xf32>
    %118 = vector.extract_strided_slice %107 {offsets = [0, 0], sizes = [8, 64], strides = [1, 1]} : vector<8x128xf32> to vector<8x64xf32>
    %119 = arith.mulf %118, %109 : vector<8x64xf32>
    %120 = arith.addf %117, %119 : vector<8x64xf32>
    %121 = math.tanh %120 : vector<8x64xf32>
    %122 = arith.mulf %115, %121 : vector<8x64xf32>
    %c16_60 = arith.constant 16 : index
    %c0_61 = arith.constant 0 : index
    %123 = vector.load %arg14[%c16_60, %c0_61] : memref<64x256xf32, #tpu.memory_space<vmem>>, vector<8x256xf32>
    %cst_62 = arith.constant dense<0.000000e+00> : vector<8x256xf32>
    %124 = tpu.matmul %122, %31, %cst_62 {dimension_numbers = #tpu.dot_dimension_numbers<[1], [0], [0], [1], [0, 0, 1, 1], [], []>} : vector<8x64xf32>, vector<64x256xf32>, vector<8x256xf32> -> vector<8x256xf32>
    %125 = arith.addf %123, %124 : vector<8x256xf32>
    %c16_63 = arith.constant 16 : index
    %c0_64 = arith.constant 0 : index
    %126 = vector.load %arg14[%c16_63, %c0_64] : memref<64x256xf32, #tpu.memory_space<vmem>>, vector<8x256xf32>
    tpu.vector_store %arg14[%c16_63, %c0_64], %125 {strides = array<i32>} : memref<64x256xf32, #tpu.memory_space<vmem>>, vector<8x256xf32>,
    %c40 = arith.constant 40 : index
    %c0_65 = arith.constant 0 : index
    %127 = vector.load %arg14[%c40, %c0_65] : memref<64x256xf32, #tpu.memory_space<vmem>>, vector<8x256xf32>
    %cst_66 = arith.constant dense<0.000000e+00> : vector<8x256xf32>
    %128 = tpu.matmul %122, %32, %cst_66 {dimension_numbers = #tpu.dot_dimension_numbers<[1], [0], [0], [1], [0, 0, 1, 1], [], []>} : vector<8x64xf32>, vector<64x256xf32>, vector<8x256xf32> -> vector<8x256xf32>
    %129 = arith.addf %127, %128 : vector<8x256xf32>
    %c40_67 = arith.constant 40 : index
    %c0_68 = arith.constant 0 : index
    %130 = vector.load %arg14[%c40_67, %c0_68] : memref<64x256xf32, #tpu.memory_space<vmem>>, vector<8x256xf32>
    tpu.vector_store %arg14[%c40_67, %c0_68], %129 {strides = array<i32>} : memref<64x256xf32, #tpu.memory_space<vmem>>, vector<8x256xf32>,
    %c24 = arith.constant 24 : index
    %c0_69 = arith.constant 0 : index
    %131 = vector.load %arg13[%c24, %c0_69] : memref<64x256xf32, #tpu.memory_space<vmem>>, vector<8x256xf32>
    %cst_70 = arith.constant dense<0.000000e+00> : vector<8x256xf32>
    %132 = tpu.matmul %122, %30, %cst_70 {dimension_numbers = #tpu.dot_dimension_numbers<[1], [0], [0], [1], [0, 0, 1, 1], [], []>} : vector<8x64xf32>, vector<64x256xf32>, vector<8x256xf32> -> vector<8x256xf32>
    %133 = arith.addf %131, %132 : vector<8x256xf32>
    %134 = vector.extract_strided_slice %133 {offsets = [0, 0], sizes = [8, 128], strides = [1, 1]} : vector<8x256xf32> to vector<8x128xf32>
    %135 = arith.negf %134 : vector<8x128xf32>
    %136 = math.exp %135 : vector<8x128xf32>
    %cst_71 = arith.constant 1.000000e+00 : f32
    %137 = vector.broadcast %cst_71 : f32 to vector<8x128xf32>
    %138 = arith.addf %137, %136 : vector<8x128xf32>
    %139 = arith.divf %137, %138 : vector<8x128xf32>
    %140 = vector.extract_strided_slice %133 {offsets = [0, 128], sizes = [8, 64], strides = [1, 1]} : vector<8x256xf32> to vector<8x64xf32>
    %141 = math.tanh %140 : vector<8x64xf32>
    %142 = vector.extract_strided_slice %133 {offsets = [0, 192], sizes = [8, 64], strides = [1, 1]} : vector<8x256xf32> to vector<8x64xf32>
    %143 = arith.negf %142 : vector<8x64xf32>
    %144 = math.exp %143 : vector<8x64xf32>
    %cst_72 = arith.constant 1.000000e+00 : f32
    %145 = vector.broadcast %cst_72 : f32 to vector<8x64xf32>
    %146 = arith.addf %145, %144 : vector<8x64xf32>
    %147 = arith.divf %145, %146 : vector<8x64xf32>
    %148 = vector.extract_strided_slice %139 {offsets = [0, 64], sizes = [8, 64], strides = [1, 1]} : vector<8x128xf32> to vector<8x64xf32>
    %149 = arith.mulf %148, %120 : vector<8x64xf32>
    %150 = vector.extract_strided_slice %139 {offsets = [0, 0], sizes = [8, 64], strides = [1, 1]} : vector<8x128xf32> to vector<8x64xf32>
    %151 = arith.mulf %150, %141 : vector<8x64xf32>
    %152 = arith.addf %149, %151 : vector<8x64xf32>
    %153 = math.tanh %152 : vector<8x64xf32>
    %154 = arith.mulf %147, %153 : vector<8x64xf32>
    %c24_73 = arith.constant 24 : index
    %c0_74 = arith.constant 0 : index
    %155 = vector.load %arg14[%c24_73, %c0_74] : memref<64x256xf32, #tpu.memory_space<vmem>>, vector<8x256xf32>
    %cst_75 = arith.constant dense<0.000000e+00> : vector<8x256xf32>
    %156 = tpu.matmul %154, %31, %cst_75 {dimension_numbers = #tpu.dot_dimension_numbers<[1], [0], [0], [1], [0, 0, 1, 1], [], []>} : vector<8x64xf32>, vector<64x256xf32>, vector<8x256xf32> -> vector<8x256xf32>
    %157 = arith.addf %155, %156 : vector<8x256xf32>
    %c24_76 = arith.constant 24 : index
    %c0_77 = arith.constant 0 : index
    %158 = vector.load %arg14[%c24_76, %c0_77] : memref<64x256xf32, #tpu.memory_space<vmem>>, vector<8x256xf32>
    tpu.vector_store %arg14[%c24_76, %c0_77], %157 {strides = array<i32>} : memref<64x256xf32, #tpu.memory_space<vmem>>, vector<8x256xf32>,
    %c32 = arith.constant 32 : index
    %c0_78 = arith.constant 0 : index
    %159 = vector.load %arg14[%c32, %c0_78] : memref<64x256xf32, #tpu.memory_space<vmem>>, vector<8x256xf32>
    %cst_79 = arith.constant dense<0.000000e+00> : vector<8x256xf32>
    %160 = tpu.matmul %154, %32, %cst_79 {dimension_numbers = #tpu.dot_dimension_numbers<[1], [0], [0], [1], [0, 0, 1, 1], [], []>} : vector<8x64xf32>, vector<64x256xf32>, vector<8x256xf32> -> vector<8x256xf32>
    %161 = arith.addf %159, %160 : vector<8x256xf32>
    %c32_80 = arith.constant 32 : index
    %c0_81 = arith.constant 0 : index
    %162 = vector.load %arg14[%c32_80, %c0_81] : memref<64x256xf32, #tpu.memory_space<vmem>>, vector<8x256xf32>
    tpu.vector_store %arg14[%c32_80, %c0_81], %161 {strides = array<i32>} : memref<64x256xf32, #tpu.memory_space<vmem>>, vector<8x256xf32>,
    %c32_82 = arith.constant 32 : index
    %c0_83 = arith.constant 0 : index
    %163 = vector.load %arg13[%c32_82, %c0_83] : memref<64x256xf32, #tpu.memory_space<vmem>>, vector<8x256xf32>
    %cst_84 = arith.constant dense<0.000000e+00> : vector<8x256xf32>
    %164 = tpu.matmul %154, %30, %cst_84 {dimension_numbers = #tpu.dot_dimension_numbers<[1], [0], [0], [1], [0, 0, 1, 1], [], []>} : vector<8x64xf32>, vector<64x256xf32>, vector<8x256xf32> -> vector<8x256xf32>
    %165 = arith.addf %163, %164 : vector<8x256xf32>
    %166 = vector.extract_strided_slice %165 {offsets = [0, 0], sizes = [8, 128], strides = [1, 1]} : vector<8x256xf32> to vector<8x128xf32>
    %167 = arith.negf %166 : vector<8x128xf32>
    %168 = math.exp %167 : vector<8x128xf32>
    %cst_85 = arith.constant 1.000000e+00 : f32
    %169 = vector.broadcast %cst_85 : f32 to vector<8x128xf32>
    %170 = arith.addf %169, %168 : vector<8x128xf32>
    %171 = arith.divf %169, %170 : vector<8x128xf32>
    %172 = vector.extract_strided_slice %165 {offsets = [0, 128], sizes = [8, 64], strides = [1, 1]} : vector<8x256xf32> to vector<8x64xf32>
    %173 = math.tanh %172 : vector<8x64xf32>
    %174 = vector.extract_strided_slice %165 {offsets = [0, 192], sizes = [8, 64], strides = [1, 1]} : vector<8x256xf32> to vector<8x64xf32>
    %175 = arith.negf %174 : vector<8x64xf32>
    %176 = math.exp %175 : vector<8x64xf32>
    %cst_86 = arith.constant 1.000000e+00 : f32
    %177 = vector.broadcast %cst_86 : f32 to vector<8x64xf32>
    %178 = arith.addf %177, %176 : vector<8x64xf32>
    %179 = arith.divf %177, %178 : vector<8x64xf32>
    %180 = vector.extract_strided_slice %171 {offsets = [0, 64], sizes = [8, 64], strides = [1, 1]} : vector<8x128xf32> to vector<8x64xf32>
    %181 = arith.mulf %180, %152 : vector<8x64xf32>
    %182 = vector.extract_strided_slice %171 {offsets = [0, 0], sizes = [8, 64], strides = [1, 1]} : vector<8x128xf32> to vector<8x64xf32>
    %183 = arith.mulf %182, %173 : vector<8x64xf32>
    %184 = arith.addf %181, %183 : vector<8x64xf32>
    %185 = math.tanh %184 : vector<8x64xf32>
    %186 = arith.mulf %179, %185 : vector<8x64xf32>
    %c32_87 = arith.constant 32 : index
    %c0_88 = arith.constant 0 : index
    %187 = vector.load %arg14[%c32_87, %c0_88] : memref<64x256xf32, #tpu.memory_space<vmem>>, vector<8x256xf32>
    %cst_89 = arith.constant dense<0.000000e+00> : vector<8x256xf32>
    %188 = tpu.matmul %186, %31, %cst_89 {dimension_numbers = #tpu.dot_dimension_numbers<[1], [0], [0], [1], [0, 0, 1, 1], [], []>} : vector<8x64xf32>, vector<64x256xf32>, vector<8x256xf32> -> vector<8x256xf32>
    %189 = arith.addf %187, %188 : vector<8x256xf32>
    %c32_90 = arith.constant 32 : index
    %c0_91 = arith.constant 0 : index
    %190 = vector.load %arg14[%c32_90, %c0_91] : memref<64x256xf32, #tpu.memory_space<vmem>>, vector<8x256xf32>
    tpu.vector_store %arg14[%c32_90, %c0_91], %189 {strides = array<i32>} : memref<64x256xf32, #tpu.memory_space<vmem>>, vector<8x256xf32>,
    %c24_92 = arith.constant 24 : index
    %c0_93 = arith.constant 0 : index
    %191 = vector.load %arg14[%c24_92, %c0_93] : memref<64x256xf32, #tpu.memory_space<vmem>>, vector<8x256xf32>
    %cst_94 = arith.constant dense<0.000000e+00> : vector<8x256xf32>
    %192 = tpu.matmul %186, %32, %cst_94 {dimension_numbers = #tpu.dot_dimension_numbers<[1], [0], [0], [1], [0, 0, 1, 1], [], []>} : vector<8x64xf32>, vector<64x256xf32>, vector<8x256xf32> -> vector<8x256xf32>
    %193 = arith.addf %191, %192 : vector<8x256xf32>
    %c24_95 = arith.constant 24 : index
    %c0_96 = arith.constant 0 : index
    %194 = vector.load %arg14[%c24_95, %c0_96] : memref<64x256xf32, #tpu.memory_space<vmem>>, vector<8x256xf32>
    tpu.vector_store %arg14[%c24_95, %c0_96], %193 {strides = array<i32>} : memref<64x256xf32, #tpu.memory_space<vmem>>, vector<8x256xf32>,
    %c40_97 = arith.constant 40 : index
    %c0_98 = arith.constant 0 : index
    %195 = vector.load %arg13[%c40_97, %c0_98] : memref<64x256xf32, #tpu.memory_space<vmem>>, vector<8x256xf32>
    %cst_99 = arith.constant dense<0.000000e+00> : vector<8x256xf32>
    %196 = tpu.matmul %186, %30, %cst_99 {dimension_numbers = #tpu.dot_dimension_numbers<[1], [0], [0], [1], [0, 0, 1, 1], [], []>} : vector<8x64xf32>, vector<64x256xf32>, vector<8x256xf32> -> vector<8x256xf32>
    %197 = arith.addf %195, %196 : vector<8x256xf32>
    %198 = vector.extract_strided_slice %197 {offsets = [0, 0], sizes = [8, 128], strides = [1, 1]} : vector<8x256xf32> to vector<8x128xf32>
    %199 = arith.negf %198 : vector<8x128xf32>
    %200 = math.exp %199 : vector<8x128xf32>
    %cst_100 = arith.constant 1.000000e+00 : f32
    %201 = vector.broadcast %cst_100 : f32 to vector<8x128xf32>
    %202 = arith.addf %201, %200 : vector<8x128xf32>
    %203 = arith.divf %201, %202 : vector<8x128xf32>
    %204 = vector.extract_strided_slice %197 {offsets = [0, 128], sizes = [8, 64], strides = [1, 1]} : vector<8x256xf32> to vector<8x64xf32>
    %205 = math.tanh %204 : vector<8x64xf32>
    %206 = vector.extract_strided_slice %197 {offsets = [0, 192], sizes = [8, 64], strides = [1, 1]} : vector<8x256xf32> to vector<8x64xf32>
    %207 = arith.negf %206 : vector<8x64xf32>
    %208 = math.exp %207 : vector<8x64xf32>
    %cst_101 = arith.constant 1.000000e+00 : f32
    %209 = vector.broadcast %cst_101 : f32 to vector<8x64xf32>
    %210 = arith.addf %209, %208 : vector<8x64xf32>
    %211 = arith.divf %209, %210 : vector<8x64xf32>
    %212 = vector.extract_strided_slice %203 {offsets = [0, 64], sizes = [8, 64], strides = [1, 1]} : vector<8x128xf32> to vector<8x64xf32>
    %213 = arith.mulf %212, %184 : vector<8x64xf32>
    %214 = vector.extract_strided_slice %203 {offsets = [0, 0], sizes = [8, 64], strides = [1, 1]} : vector<8x128xf32> to vector<8x64xf32>
    %215 = arith.mulf %214, %205 : vector<8x64xf32>
    %216 = arith.addf %213, %215 : vector<8x64xf32>
    %217 = math.tanh %216 : vector<8x64xf32>
    %218 = arith.mulf %211, %217 : vector<8x64xf32>
    %c40_102 = arith.constant 40 : index
    %c0_103 = arith.constant 0 : index
    %219 = vector.load %arg14[%c40_102, %c0_103] : memref<64x256xf32, #tpu.memory_space<vmem>>, vector<8x256xf32>
    %cst_104 = arith.constant dense<0.000000e+00> : vector<8x256xf32>
    %220 = tpu.matmul %218, %31, %cst_104 {dimension_numbers = #tpu.dot_dimension_numbers<[1], [0], [0], [1], [0, 0, 1, 1], [], []>} : vector<8x64xf32>, vector<64x256xf32>, vector<8x256xf32> -> vector<8x256xf32>
    %221 = arith.addf %219, %220 : vector<8x256xf32>
    %c40_105 = arith.constant 40 : index
    %c0_106 = arith.constant 0 : index
    %222 = vector.load %arg14[%c40_105, %c0_106] : memref<64x256xf32, #tpu.memory_space<vmem>>, vector<8x256xf32>
    tpu.vector_store %arg14[%c40_105, %c0_106], %221 {strides = array<i32>} : memref<64x256xf32, #tpu.memory_space<vmem>>, vector<8x256xf32>,
    %c16_107 = arith.constant 16 : index
    %c0_108 = arith.constant 0 : index
    %223 = vector.load %arg14[%c16_107, %c0_108] : memref<64x256xf32, #tpu.memory_space<vmem>>, vector<8x256xf32>
    %cst_109 = arith.constant dense<0.000000e+00> : vector<8x256xf32>
    %224 = tpu.matmul %218, %32, %cst_109 {dimension_numbers = #tpu.dot_dimension_numbers<[1], [0], [0], [1], [0, 0, 1, 1], [], []>} : vector<8x64xf32>, vector<64x256xf32>, vector<8x256xf32> -> vector<8x256xf32>
    %225 = arith.addf %223, %224 : vector<8x256xf32>
    %c16_110 = arith.constant 16 : index
    %c0_111 = arith.constant 0 : index
    %226 = vector.load %arg14[%c16_110, %c0_111] : memref<64x256xf32, #tpu.memory_space<vmem>>, vector<8x256xf32>
    tpu.vector_store %arg14[%c16_110, %c0_111], %225 {strides = array<i32>} : memref<64x256xf32, #tpu.memory_space<vmem>>, vector<8x256xf32>,
    %c48_112 = arith.constant 48 : index
    %c0_113 = arith.constant 0 : index
    %227 = vector.load %arg13[%c48_112, %c0_113] : memref<64x256xf32, #tpu.memory_space<vmem>>, vector<8x256xf32>
    %cst_114 = arith.constant dense<0.000000e+00> : vector<8x256xf32>
    %228 = tpu.matmul %218, %30, %cst_114 {dimension_numbers = #tpu.dot_dimension_numbers<[1], [0], [0], [1], [0, 0, 1, 1], [], []>} : vector<8x64xf32>, vector<64x256xf32>, vector<8x256xf32> -> vector<8x256xf32>
    %229 = arith.addf %227, %228 : vector<8x256xf32>
    %230 = vector.extract_strided_slice %229 {offsets = [0, 0], sizes = [8, 128], strides = [1, 1]} : vector<8x256xf32> to vector<8x128xf32>
    %231 = arith.negf %230 : vector<8x128xf32>
    %232 = math.exp %231 : vector<8x128xf32>
    %cst_115 = arith.constant 1.000000e+00 : f32
    %233 = vector.broadcast %cst_115 : f32 to vector<8x128xf32>
    %234 = arith.addf %233, %232 : vector<8x128xf32>
    %235 = arith.divf %233, %234 : vector<8x128xf32>
    %236 = vector.extract_strided_slice %229 {offsets = [0, 128], sizes = [8, 64], strides = [1, 1]} : vector<8x256xf32> to vector<8x64xf32>
    %237 = math.tanh %236 : vector<8x64xf32>
    %238 = vector.extract_strided_slice %229 {offsets = [0, 192], sizes = [8, 64], strides = [1, 1]} : vector<8x256xf32> to vector<8x64xf32>
    %239 = arith.negf %238 : vector<8x64xf32>
    %240 = math.exp %239 : vector<8x64xf32>
    %cst_116 = arith.constant 1.000000e+00 : f32
    %241 = vector.broadcast %cst_116 : f32 to vector<8x64xf32>
    %242 = arith.addf %241, %240 : vector<8x64xf32>
    %243 = arith.divf %241, %242 : vector<8x64xf32>
    %244 = vector.extract_strided_slice %235 {offsets = [0, 64], sizes = [8, 64], strides = [1, 1]} : vector<8x128xf32> to vector<8x64xf32>
    %245 = arith.mulf %244, %216 : vector<8x64xf32>
    %246 = vector.extract_strided_slice %235 {offsets = [0, 0], sizes = [8, 64], strides = [1, 1]} : vector<8x128xf32> to vector<8x64xf32>
    %247 = arith.mulf %246, %237 : vector<8x64xf32>
    %248 = arith.addf %245, %247 : vector<8x64xf32>
    %249 = math.tanh %248 : vector<8x64xf32>
    %250 = arith.mulf %243, %249 : vector<8x64xf32>
    %c48_117 = arith.constant 48 : index
    %c0_118 = arith.constant 0 : index
    %251 = vector.load %arg14[%c48_117, %c0_118] : memref<64x256xf32, #tpu.memory_space<vmem>>, vector<8x256xf32>
    %cst_119 = arith.constant dense<0.000000e+00> : vector<8x256xf32>
    %252 = tpu.matmul %250, %31, %cst_119 {dimension_numbers = #tpu.dot_dimension_numbers<[1], [0], [0], [1], [0, 0, 1, 1], [], []>} : vector<8x64xf32>, vector<64x256xf32>, vector<8x256xf32> -> vector<8x256xf32>
    %253 = arith.addf %251, %252 : vector<8x256xf32>
    %c48_120 = arith.constant 48 : index
    %c0_121 = arith.constant 0 : index
    %254 = vector.load %arg14[%c48_120, %c0_121] : memref<64x256xf32, #tpu.memory_space<vmem>>, vector<8x256xf32>
    tpu.vector_store %arg14[%c48_120, %c0_121], %253 {strides = array<i32>} : memref<64x256xf32, #tpu.memory_space<vmem>>, vector<8x256xf32>,
    %c8_122 = arith.constant 8 : index
    %c0_123 = arith.constant 0 : index
    %255 = vector.load %arg14[%c8_122, %c0_123] : memref<64x256xf32, #tpu.memory_space<vmem>>, vector<8x256xf32>
    %cst_124 = arith.constant dense<0.000000e+00> : vector<8x256xf32>
    %256 = tpu.matmul %250, %32, %cst_124 {dimension_numbers = #tpu.dot_dimension_numbers<[1], [0], [0], [1], [0, 0, 1, 1], [], []>} : vector<8x64xf32>, vector<64x256xf32>, vector<8x256xf32> -> vector<8x256xf32>
    %257 = arith.addf %255, %256 : vector<8x256xf32>
    %c8_125 = arith.constant 8 : index
    %c0_126 = arith.constant 0 : index
    %258 = vector.load %arg14[%c8_125, %c0_126] : memref<64x256xf32, #tpu.memory_space<vmem>>, vector<8x256xf32>
    tpu.vector_store %arg14[%c8_125, %c0_126], %257 {strides = array<i32>} : memref<64x256xf32, #tpu.memory_space<vmem>>, vector<8x256xf32>,
    %c56_127 = arith.constant 56 : index
    %c0_128 = arith.constant 0 : index
    %259 = vector.load %arg13[%c56_127, %c0_128] : memref<64x256xf32, #tpu.memory_space<vmem>>, vector<8x256xf32>
    %cst_129 = arith.constant dense<0.000000e+00> : vector<8x256xf32>
    %260 = tpu.matmul %250, %30, %cst_129 {dimension_numbers = #tpu.dot_dimension_numbers<[1], [0], [0], [1], [0, 0, 1, 1], [], []>} : vector<8x64xf32>, vector<64x256xf32>, vector<8x256xf32> -> vector<8x256xf32>
    %261 = arith.addf %259, %260 : vector<8x256xf32>
    %262 = vector.extract_strided_slice %261 {offsets = [0, 0], sizes = [8, 128], strides = [1, 1]} : vector<8x256xf32> to vector<8x128xf32>
    %263 = arith.negf %262 : vector<8x128xf32>
    %264 = math.exp %263 : vector<8x128xf32>
    %cst_130 = arith.constant 1.000000e+00 : f32
    %265 = vector.broadcast %cst_130 : f32 to vector<8x128xf32>
    %266 = arith.addf %265, %264 : vector<8x128xf32>
    %267 = arith.divf %265, %266 : vector<8x128xf32>
    %268 = vector.extract_strided_slice %261 {offsets = [0, 128], sizes = [8, 64], strides = [1, 1]} : vector<8x256xf32> to vector<8x64xf32>
    %269 = math.tanh %268 : vector<8x64xf32>
    %270 = vector.extract_strided_slice %261 {offsets = [0, 192], sizes = [8, 64], strides = [1, 1]} : vector<8x256xf32> to vector<8x64xf32>
    %271 = arith.negf %270 : vector<8x64xf32>
    %272 = math.exp %271 : vector<8x64xf32>
    %cst_131 = arith.constant 1.000000e+00 : f32
    %273 = vector.broadcast %cst_131 : f32 to vector<8x64xf32>
    %274 = arith.addf %273, %272 : vector<8x64xf32>
    %275 = arith.divf %273, %274 : vector<8x64xf32>
    %276 = vector.extract_strided_slice %267 {offsets = [0, 64], sizes = [8, 64], strides = [1, 1]} : vector<8x128xf32> to vector<8x64xf32>
    %277 = arith.mulf %276, %248 : vector<8x64xf32>
    %278 = vector.extract_strided_slice %267 {offsets = [0, 0], sizes = [8, 64], strides = [1, 1]} : vector<8x128xf32> to vector<8x64xf32>
    %279 = arith.mulf %278, %269 : vector<8x64xf32>
    %280 = arith.addf %277, %279 : vector<8x64xf32>
    %281 = math.tanh %280 : vector<8x64xf32>
    %282 = arith.mulf %275, %281 : vector<8x64xf32>
    %c56_132 = arith.constant 56 : index
    %c0_133 = arith.constant 0 : index
    %283 = vector.load %arg14[%c56_132, %c0_133] : memref<64x256xf32, #tpu.memory_space<vmem>>, vector<8x256xf32>
    %cst_134 = arith.constant dense<0.000000e+00> : vector<8x256xf32>
    %284 = tpu.matmul %282, %31, %cst_134 {dimension_numbers = #tpu.dot_dimension_numbers<[1], [0], [0], [1], [0, 0, 1, 1], [], []>} : vector<8x64xf32>, vector<64x256xf32>, vector<8x256xf32> -> vector<8x256xf32>
    %285 = arith.addf %283, %284 : vector<8x256xf32>
    %c56_135 = arith.constant 56 : index
    %c0_136 = arith.constant 0 : index
    %286 = vector.load %arg14[%c56_135, %c0_136] : memref<64x256xf32, #tpu.memory_space<vmem>>, vector<8x256xf32>
    tpu.vector_store %arg14[%c56_135, %c0_136], %285 {strides = array<i32>} : memref<64x256xf32, #tpu.memory_space<vmem>>, vector<8x256xf32>,
    %c0_137 = arith.constant 0 : index
    %c0_138 = arith.constant 0 : index
    %287 = vector.load %arg14[%c0_137, %c0_138] : memref<64x256xf32, #tpu.memory_space<vmem>>, vector<8x256xf32>
    %cst_139 = arith.constant dense<0.000000e+00> : vector<8x256xf32>
    %288 = tpu.matmul %282, %32, %cst_139 {dimension_numbers = #tpu.dot_dimension_numbers<[1], [0], [0], [1], [0, 0, 1, 1], [], []>} : vector<8x64xf32>, vector<64x256xf32>, vector<8x256xf32> -> vector<8x256xf32>
    %289 = arith.addf %287, %288 : vector<8x256xf32>
    %c0_140 = arith.constant 0 : index
    %c0_141 = arith.constant 0 : index
    %290 = vector.load %arg14[%c0_140, %c0_141] : memref<64x256xf32, #tpu.memory_space<vmem>>, vector<8x256xf32>
    tpu.vector_store %arg14[%c0_140, %c0_141], %289 {strides = array<i32>} : memref<64x256xf32, #tpu.memory_space<vmem>>, vector<8x256xf32>,
    %c0_142 = arith.constant 0 : index
    %c0_143 = arith.constant 0 : index
    %291 = vector.load %arg8[%c0_142, %c0_143] : memref<64x256xf32, #tpu.memory_space<vmem>>, vector<64x256xf32>
    %cst_144 = arith.constant 0.000000e+00 : f32
    %292 = vector.broadcast %cst_144 : f32 to vector<8x64xf32>
    %cst_145 = arith.constant 0.000000e+00 : f32
    %293 = vector.broadcast %cst_145 : f32 to vector<8x64xf32>
    %c0_146 = arith.constant 0 : index
    %c0_147 = arith.constant 0 : index
    %294 = vector.load %arg14[%c0_146, %c0_147] : memref<64x256xf32, #tpu.memory_space<vmem>>, vector<8x256xf32>
    %cst_148 = arith.constant dense<0.000000e+00> : vector<8x256xf32>
    %295 = tpu.matmul %292, %291, %cst_148 {dimension_numbers = #tpu.dot_dimension_numbers<[1], [0], [0], [1], [0, 0, 1, 1], [], []>} : vector<8x64xf32>, vector<64x256xf32>, vector<8x256xf32> -> vector<8x256xf32>
    %296 = arith.addf %294, %295 : vector<8x256xf32>
    %297 = vector.extract_strided_slice %296 {offsets = [0, 0], sizes = [8, 128], strides = [1, 1]} : vector<8x256xf32> to vector<8x128xf32>
    %298 = arith.negf %297 : vector<8x128xf32>
    %299 = math.exp %298 : vector<8x128xf32>
    %cst_149 = arith.constant 1.000000e+00 : f32
    %300 = vector.broadcast %cst_149 : f32 to vector<8x128xf32>
    %301 = arith.addf %300, %299 : vector<8x128xf32>
    %302 = arith.divf %300, %301 : vector<8x128xf32>
    %303 = vector.extract_strided_slice %296 {offsets = [0, 128], sizes = [8, 64], strides = [1, 1]} : vector<8x256xf32> to vector<8x64xf32>
    %304 = math.tanh %303 : vector<8x64xf32>
    %305 = vector.extract_strided_slice %296 {offsets = [0, 192], sizes = [8, 64], strides = [1, 1]} : vector<8x256xf32> to vector<8x64xf32>
    %306 = arith.negf %305 : vector<8x64xf32>
    %307 = math.exp %306 : vector<8x64xf32>
    %cst_150 = arith.constant 1.000000e+00 : f32
    %308 = vector.broadcast %cst_150 : f32 to vector<8x64xf32>
    %309 = arith.addf %308, %307 : vector<8x64xf32>
    %310 = arith.divf %308, %309 : vector<8x64xf32>
    %311 = vector.extract_strided_slice %302 {offsets = [0, 64], sizes = [8, 64], strides = [1, 1]} : vector<8x128xf32> to vector<8x64xf32>
    %312 = arith.mulf %311, %293 : vector<8x64xf32>
    %313 = vector.extract_strided_slice %302 {offsets = [0, 0], sizes = [8, 64], strides = [1, 1]} : vector<8x128xf32> to vector<8x64xf32>
    %314 = arith.mulf %313, %304 : vector<8x64xf32>
    %315 = arith.addf %312, %314 : vector<8x64xf32>
    %316 = math.tanh %315 : vector<8x64xf32>
    %317 = arith.mulf %310, %316 : vector<8x64xf32>
    %c8_151 = arith.constant 8 : index
    %c0_152 = arith.constant 0 : index
    %318 = vector.load %arg14[%c8_151, %c0_152] : memref<64x256xf32, #tpu.memory_space<vmem>>, vector<8x256xf32>
    %cst_153 = arith.constant dense<0.000000e+00> : vector<8x256xf32>
    %319 = tpu.matmul %317, %291, %cst_153 {dimension_numbers = #tpu.dot_dimension_numbers<[1], [0], [0], [1], [0, 0, 1, 1], [], []>} : vector<8x64xf32>, vector<64x256xf32>, vector<8x256xf32> -> vector<8x256xf32>
    %320 = arith.addf %318, %319 : vector<8x256xf32>
    %321 = vector.extract_strided_slice %320 {offsets = [0, 0], sizes = [8, 128], strides = [1, 1]} : vector<8x256xf32> to vector<8x128xf32>
    %322 = arith.negf %321 : vector<8x128xf32>
    %323 = math.exp %322 : vector<8x128xf32>
    %cst_154 = arith.constant 1.000000e+00 : f32
    %324 = vector.broadcast %cst_154 : f32 to vector<8x128xf32>
    %325 = arith.addf %324, %323 : vector<8x128xf32>
    %326 = arith.divf %324, %325 : vector<8x128xf32>
    %327 = vector.extract_strided_slice %320 {offsets = [0, 128], sizes = [8, 64], strides = [1, 1]} : vector<8x256xf32> to vector<8x64xf32>
    %328 = math.tanh %327 : vector<8x64xf32>
    %329 = vector.extract_strided_slice %320 {offsets = [0, 192], sizes = [8, 64], strides = [1, 1]} : vector<8x256xf32> to vector<8x64xf32>
    %330 = arith.negf %329 : vector<8x64xf32>
    %331 = math.exp %330 : vector<8x64xf32>
    %cst_155 = arith.constant 1.000000e+00 : f32
    %332 = vector.broadcast %cst_155 : f32 to vector<8x64xf32>
    %333 = arith.addf %332, %331 : vector<8x64xf32>
    %334 = arith.divf %332, %333 : vector<8x64xf32>
    %335 = vector.extract_strided_slice %326 {offsets = [0, 64], sizes = [8, 64], strides = [1, 1]} : vector<8x128xf32> to vector<8x64xf32>
    %336 = arith.mulf %335, %315 : vector<8x64xf32>
    %337 = vector.extract_strided_slice %326 {offsets = [0, 0], sizes = [8, 64], strides = [1, 1]} : vector<8x128xf32> to vector<8x64xf32>
    %338 = arith.mulf %337, %328 : vector<8x64xf32>
    %339 = arith.addf %336, %338 : vector<8x64xf32>
    %340 = math.tanh %339 : vector<8x64xf32>
    %341 = arith.mulf %334, %340 : vector<8x64xf32>
    %c16_156 = arith.constant 16 : index
    %c0_157 = arith.constant 0 : index
    %342 = vector.load %arg14[%c16_156, %c0_157] : memref<64x256xf32, #tpu.memory_space<vmem>>, vector<8x256xf32>
    %cst_158 = arith.constant dense<0.000000e+00> : vector<8x256xf32>
    %343 = tpu.matmul %341, %291, %cst_158 {dimension_numbers = #tpu.dot_dimension_numbers<[1], [0], [0], [1], [0, 0, 1, 1], [], []>} : vector<8x64xf32>, vector<64x256xf32>, vector<8x256xf32> -> vector<8x256xf32>
    %344 = arith.addf %342, %343 : vector<8x256xf32>
    %345 = vector.extract_strided_slice %344 {offsets = [0, 0], sizes = [8, 128], strides = [1, 1]} : vector<8x256xf32> to vector<8x128xf32>
    %346 = arith.negf %345 : vector<8x128xf32>
    %347 = math.exp %346 : vector<8x128xf32>
    %cst_159 = arith.constant 1.000000e+00 : f32
    %348 = vector.broadcast %cst_159 : f32 to vector<8x128xf32>
    %349 = arith.addf %348, %347 : vector<8x128xf32>
    %350 = arith.divf %348, %349 : vector<8x128xf32>
    %351 = vector.extract_strided_slice %344 {offsets = [0, 128], sizes = [8, 64], strides = [1, 1]} : vector<8x256xf32> to vector<8x64xf32>
    %352 = math.tanh %351 : vector<8x64xf32>
    %353 = vector.extract_strided_slice %344 {offsets = [0, 192], sizes = [8, 64], strides = [1, 1]} : vector<8x256xf32> to vector<8x64xf32>
    %354 = arith.negf %353 : vector<8x64xf32>
    %355 = math.exp %354 : vector<8x64xf32>
    %cst_160 = arith.constant 1.000000e+00 : f32
    %356 = vector.broadcast %cst_160 : f32 to vector<8x64xf32>
    %357 = arith.addf %356, %355 : vector<8x64xf32>
    %358 = arith.divf %356, %357 : vector<8x64xf32>
    %359 = vector.extract_strided_slice %350 {offsets = [0, 64], sizes = [8, 64], strides = [1, 1]} : vector<8x128xf32> to vector<8x64xf32>
    %360 = arith.mulf %359, %339 : vector<8x64xf32>
    %361 = vector.extract_strided_slice %350 {offsets = [0, 0], sizes = [8, 64], strides = [1, 1]} : vector<8x128xf32> to vector<8x64xf32>
    %362 = arith.mulf %361, %352 : vector<8x64xf32>
    %363 = arith.addf %360, %362 : vector<8x64xf32>
    %364 = math.tanh %363 : vector<8x64xf32>
    %365 = arith.mulf %358, %364 : vector<8x64xf32>
    %c24_161 = arith.constant 24 : index
    %c0_162 = arith.constant 0 : index
    %366 = vector.load %arg14[%c24_161, %c0_162] : memref<64x256xf32, #tpu.memory_space<vmem>>, vector<8x256xf32>
    %cst_163 = arith.constant dense<0.000000e+00> : vector<8x256xf32>
    %367 = tpu.matmul %365, %291, %cst_163 {dimension_numbers = #tpu.dot_dimension_numbers<[1], [0], [0], [1], [0, 0, 1, 1], [], []>} : vector<8x64xf32>, vector<64x256xf32>, vector<8x256xf32> -> vector<8x256xf32>
    %368 = arith.addf %366, %367 : vector<8x256xf32>
    %369 = vector.extract_strided_slice %368 {offsets = [0, 0], sizes = [8, 128], strides = [1, 1]} : vector<8x256xf32> to vector<8x128xf32>
    %370 = arith.negf %369 : vector<8x128xf32>
    %371 = math.exp %370 : vector<8x128xf32>
    %cst_164 = arith.constant 1.000000e+00 : f32
    %372 = vector.broadcast %cst_164 : f32 to vector<8x128xf32>
    %373 = arith.addf %372, %371 : vector<8x128xf32>
    %374 = arith.divf %372, %373 : vector<8x128xf32>
    %375 = vector.extract_strided_slice %368 {offsets = [0, 128], sizes = [8, 64], strides = [1, 1]} : vector<8x256xf32> to vector<8x64xf32>
    %376 = math.tanh %375 : vector<8x64xf32>
    %377 = vector.extract_strided_slice %368 {offsets = [0, 192], sizes = [8, 64], strides = [1, 1]} : vector<8x256xf32> to vector<8x64xf32>
    %378 = arith.negf %377 : vector<8x64xf32>
    %379 = math.exp %378 : vector<8x64xf32>
    %cst_165 = arith.constant 1.000000e+00 : f32
    %380 = vector.broadcast %cst_165 : f32 to vector<8x64xf32>
    %381 = arith.addf %380, %379 : vector<8x64xf32>
    %382 = arith.divf %380, %381 : vector<8x64xf32>
    %383 = vector.extract_strided_slice %374 {offsets = [0, 64], sizes = [8, 64], strides = [1, 1]} : vector<8x128xf32> to vector<8x64xf32>
    %384 = arith.mulf %383, %363 : vector<8x64xf32>
    %385 = vector.extract_strided_slice %374 {offsets = [0, 0], sizes = [8, 64], strides = [1, 1]} : vector<8x128xf32> to vector<8x64xf32>
    %386 = arith.mulf %385, %376 : vector<8x64xf32>
    %387 = arith.addf %384, %386 : vector<8x64xf32>
    %388 = math.tanh %387 : vector<8x64xf32>
    %389 = arith.mulf %382, %388 : vector<8x64xf32>
    %c32_166 = arith.constant 32 : index
    %c0_167 = arith.constant 0 : index
    %390 = vector.load %arg14[%c32_166, %c0_167] : memref<64x256xf32, #tpu.memory_space<vmem>>, vector<8x256xf32>
    %cst_168 = arith.constant dense<0.000000e+00> : vector<8x256xf32>
    %391 = tpu.matmul %389, %291, %cst_168 {dimension_numbers = #tpu.dot_dimension_numbers<[1], [0], [0], [1], [0, 0, 1, 1], [], []>} : vector<8x64xf32>, vector<64x256xf32>, vector<8x256xf32> -> vector<8x256xf32>
    %392 = arith.addf %390, %391 : vector<8x256xf32>
    %393 = vector.extract_strided_slice %392 {offsets = [0, 0], sizes = [8, 128], strides = [1, 1]} : vector<8x256xf32> to vector<8x128xf32>
    %394 = arith.negf %393 : vector<8x128xf32>
    %395 = math.exp %394 : vector<8x128xf32>
    %cst_169 = arith.constant 1.000000e+00 : f32
    %396 = vector.broadcast %cst_169 : f32 to vector<8x128xf32>
    %397 = arith.addf %396, %395 : vector<8x128xf32>
    %398 = arith.divf %396, %397 : vector<8x128xf32>
    %399 = vector.extract_strided_slice %392 {offsets = [0, 128], sizes = [8, 64], strides = [1, 1]} : vector<8x256xf32> to vector<8x64xf32>
    %400 = math.tanh %399 : vector<8x64xf32>
    %401 = vector.extract_strided_slice %392 {offsets = [0, 192], sizes = [8, 64], strides = [1, 1]} : vector<8x256xf32> to vector<8x64xf32>
    %402 = arith.negf %401 : vector<8x64xf32>
    %403 = math.exp %402 : vector<8x64xf32>
    %cst_170 = arith.constant 1.000000e+00 : f32
    %404 = vector.broadcast %cst_170 : f32 to vector<8x64xf32>
    %405 = arith.addf %404, %403 : vector<8x64xf32>
    %406 = arith.divf %404, %405 : vector<8x64xf32>
    %407 = vector.extract_strided_slice %398 {offsets = [0, 64], sizes = [8, 64], strides = [1, 1]} : vector<8x128xf32> to vector<8x64xf32>
    %408 = arith.mulf %407, %387 : vector<8x64xf32>
    %409 = vector.extract_strided_slice %398 {offsets = [0, 0], sizes = [8, 64], strides = [1, 1]} : vector<8x128xf32> to vector<8x64xf32>
    %410 = arith.mulf %409, %400 : vector<8x64xf32>
    %411 = arith.addf %408, %410 : vector<8x64xf32>
    %412 = math.tanh %411 : vector<8x64xf32>
    %413 = arith.mulf %406, %412 : vector<8x64xf32>
    %c40_171 = arith.constant 40 : index
    %c0_172 = arith.constant 0 : index
    %414 = vector.load %arg14[%c40_171, %c0_172] : memref<64x256xf32, #tpu.memory_space<vmem>>, vector<8x256xf32>
    %cst_173 = arith.constant dense<0.000000e+00> : vector<8x256xf32>
    %415 = tpu.matmul %413, %291, %cst_173 {dimension_numbers = #tpu.dot_dimension_numbers<[1], [0], [0], [1], [0, 0, 1, 1], [], []>} : vector<8x64xf32>, vector<64x256xf32>, vector<8x256xf32> -> vector<8x256xf32>
    %416 = arith.addf %414, %415 : vector<8x256xf32>
    %417 = vector.extract_strided_slice %416 {offsets = [0, 0], sizes = [8, 128], strides = [1, 1]} : vector<8x256xf32> to vector<8x128xf32>
    %418 = arith.negf %417 : vector<8x128xf32>
    %419 = math.exp %418 : vector<8x128xf32>
    %cst_174 = arith.constant 1.000000e+00 : f32
    %420 = vector.broadcast %cst_174 : f32 to vector<8x128xf32>
    %421 = arith.addf %420, %419 : vector<8x128xf32>
    %422 = arith.divf %420, %421 : vector<8x128xf32>
    %423 = vector.extract_strided_slice %416 {offsets = [0, 128], sizes = [8, 64], strides = [1, 1]} : vector<8x256xf32> to vector<8x64xf32>
    %424 = math.tanh %423 : vector<8x64xf32>
    %425 = vector.extract_strided_slice %416 {offsets = [0, 192], sizes = [8, 64], strides = [1, 1]} : vector<8x256xf32> to vector<8x64xf32>
    %426 = arith.negf %425 : vector<8x64xf32>
    %427 = math.exp %426 : vector<8x64xf32>
    %cst_175 = arith.constant 1.000000e+00 : f32
    %428 = vector.broadcast %cst_175 : f32 to vector<8x64xf32>
    %429 = arith.addf %428, %427 : vector<8x64xf32>
    %430 = arith.divf %428, %429 : vector<8x64xf32>
    %431 = vector.extract_strided_slice %422 {offsets = [0, 64], sizes = [8, 64], strides = [1, 1]} : vector<8x128xf32> to vector<8x64xf32>
    %432 = arith.mulf %431, %411 : vector<8x64xf32>
    %433 = vector.extract_strided_slice %422 {offsets = [0, 0], sizes = [8, 64], strides = [1, 1]} : vector<8x128xf32> to vector<8x64xf32>
    %434 = arith.mulf %433, %424 : vector<8x64xf32>
    %435 = arith.addf %432, %434 : vector<8x64xf32>
    %436 = math.tanh %435 : vector<8x64xf32>
    %437 = arith.mulf %430, %436 : vector<8x64xf32>
    %c48_176 = arith.constant 48 : index
    %c0_177 = arith.constant 0 : index
    %438 = vector.load %arg14[%c48_176, %c0_177] : memref<64x256xf32, #tpu.memory_space<vmem>>, vector<8x256xf32>
    %cst_178 = arith.constant dense<0.000000e+00> : vector<8x256xf32>
    %439 = tpu.matmul %437, %291, %cst_178 {dimension_numbers = #tpu.dot_dimension_numbers<[1], [0], [0], [1], [0, 0, 1, 1], [], []>} : vector<8x64xf32>, vector<64x256xf32>, vector<8x256xf32> -> vector<8x256xf32>
    %440 = arith.addf %438, %439 : vector<8x256xf32>
    %441 = vector.extract_strided_slice %440 {offsets = [0, 0], sizes = [8, 128], strides = [1, 1]} : vector<8x256xf32> to vector<8x128xf32>
    %442 = arith.negf %441 : vector<8x128xf32>
    %443 = math.exp %442 : vector<8x128xf32>
    %cst_179 = arith.constant 1.000000e+00 : f32
    %444 = vector.broadcast %cst_179 : f32 to vector<8x128xf32>
    %445 = arith.addf %444, %443 : vector<8x128xf32>
    %446 = arith.divf %444, %445 : vector<8x128xf32>
    %447 = vector.extract_strided_slice %440 {offsets = [0, 128], sizes = [8, 64], strides = [1, 1]} : vector<8x256xf32> to vector<8x64xf32>
    %448 = math.tanh %447 : vector<8x64xf32>
    %449 = vector.extract_strided_slice %440 {offsets = [0, 192], sizes = [8, 64], strides = [1, 1]} : vector<8x256xf32> to vector<8x64xf32>
    %450 = arith.negf %449 : vector<8x64xf32>
    %451 = math.exp %450 : vector<8x64xf32>
    %cst_180 = arith.constant 1.000000e+00 : f32
    %452 = vector.broadcast %cst_180 : f32 to vector<8x64xf32>
    %453 = arith.addf %452, %451 : vector<8x64xf32>
    %454 = arith.divf %452, %453 : vector<8x64xf32>
    %455 = vector.extract_strided_slice %446 {offsets = [0, 64], sizes = [8, 64], strides = [1, 1]} : vector<8x128xf32> to vector<8x64xf32>
    %456 = arith.mulf %455, %435 : vector<8x64xf32>
    %457 = vector.extract_strided_slice %446 {offsets = [0, 0], sizes = [8, 64], strides = [1, 1]} : vector<8x128xf32> to vector<8x64xf32>
    %458 = arith.mulf %457, %448 : vector<8x64xf32>
    %459 = arith.addf %456, %458 : vector<8x64xf32>
    %460 = math.tanh %459 : vector<8x64xf32>
    %461 = arith.mulf %454, %460 : vector<8x64xf32>
    %c56_181 = arith.constant 56 : index
    %c0_182 = arith.constant 0 : index
    %462 = vector.load %arg14[%c56_181, %c0_182] : memref<64x256xf32, #tpu.memory_space<vmem>>, vector<8x256xf32>
    %cst_183 = arith.constant dense<0.000000e+00> : vector<8x256xf32>
    %463 = tpu.matmul %461, %291, %cst_183 {dimension_numbers = #tpu.dot_dimension_numbers<[1], [0], [0], [1], [0, 0, 1, 1], [], []>} : vector<8x64xf32>, vector<64x256xf32>, vector<8x256xf32> -> vector<8x256xf32>
    %464 = arith.addf %462, %463 : vector<8x256xf32>
    %465 = vector.extract_strided_slice %464 {offsets = [0, 0], sizes = [8, 128], strides = [1, 1]} : vector<8x256xf32> to vector<8x128xf32>
    %466 = arith.negf %465 : vector<8x128xf32>
    %467 = math.exp %466 : vector<8x128xf32>
    %cst_184 = arith.constant 1.000000e+00 : f32
    %468 = vector.broadcast %cst_184 : f32 to vector<8x128xf32>
    %469 = arith.addf %468, %467 : vector<8x128xf32>
    %470 = arith.divf %468, %469 : vector<8x128xf32>
    %471 = vector.extract_strided_slice %464 {offsets = [0, 128], sizes = [8, 64], strides = [1, 1]} : vector<8x256xf32> to vector<8x64xf32>
    %472 = math.tanh %471 : vector<8x64xf32>
    %473 = vector.extract_strided_slice %464 {offsets = [0, 192], sizes = [8, 64], strides = [1, 1]} : vector<8x256xf32> to vector<8x64xf32>
    %474 = arith.negf %473 : vector<8x64xf32>
    %475 = math.exp %474 : vector<8x64xf32>
    %cst_185 = arith.constant 1.000000e+00 : f32
    %476 = vector.broadcast %cst_185 : f32 to vector<8x64xf32>
    %477 = arith.addf %476, %475 : vector<8x64xf32>
    %478 = arith.divf %476, %477 : vector<8x64xf32>
    %479 = vector.extract_strided_slice %470 {offsets = [0, 64], sizes = [8, 64], strides = [1, 1]} : vector<8x128xf32> to vector<8x64xf32>
    %480 = arith.mulf %479, %459 : vector<8x64xf32>
    %481 = vector.extract_strided_slice %470 {offsets = [0, 0], sizes = [8, 64], strides = [1, 1]} : vector<8x128xf32> to vector<8x64xf32>
    %482 = arith.mulf %481, %472 : vector<8x64xf32>
    %483 = arith.addf %480, %482 : vector<8x64xf32>
    %484 = math.tanh %483 : vector<8x64xf32>
    %485 = arith.mulf %478, %484 : vector<8x64xf32>
    %c0_186 = arith.constant 0 : index
    %c0_187 = arith.constant 0 : index
    %486 = vector.load %arg10[%c0_186, %c0_187] : memref<64x4xf32, #tpu.memory_space<vmem>>, vector<64x4xf32>
    %cst_188 = arith.constant dense<0.000000e+00> : vector<8x4xf32>
    %487 = tpu.matmul %485, %486, %cst_188 {dimension_numbers = #tpu.dot_dimension_numbers<[1], [0], [0], [1], [0, 0, 1, 1], [], []>} : vector<8x64xf32>, vector<64x4xf32>, vector<8x4xf32> -> vector<8x4xf32>
    %c0_189 = arith.constant 0 : index
    %c0_190 = arith.constant 0 : index
    %488 = vector.load %arg11[%c0_189, %c0_190] : memref<1x4xf32, #tpu.memory_space<vmem>>, vector<1x4xf32>
    %489 = vector.broadcast %488 : vector<1x4xf32> to vector<8x4xf32>
    %490 = arith.addf %487, %489 : vector<8x4xf32>
    %c0_191 = arith.constant 0 : index
    %c0_192 = arith.constant 0 : index
    %491 = vector.load %arg12[%c0_191, %c0_192] : memref<8x4xf32, #tpu.memory_space<vmem>>, vector<8x4xf32>
    tpu.vector_store %arg12[%c0_191, %c0_192], %490 {strides = array<i32>} : memref<8x4xf32, #tpu.memory_space<vmem>>, vector<8x4xf32>,
    return
  }
}

</mosaic_0001>

<bundles_post_ra>
// kernel: birnn_text_forward.1
= control target key start
LH: loop header
LB: loop body
LE: loop exit
PB: predicated region body
PF: predicated region fallthrough
CT: control target
= control target key end

     0   :  { %17 = vsyncpa [#allocation5], 0  ;;  %s6046_s0 = inlined_call_operand.vmem [shape: s32[64,2], index: 0, kind: input, shape index: {}]   ;;  %s6047_s1 = inlined_call_operand.vmem [shape: f32[128,32], index: 1, kind: input, shape index: {}]   ;;  %s6048_s2 = inlined_call_operand.hbm [shape: f32[32,256], index: 2, kind: input, shape index: {}]   ;;  %s6049_s3 = inlined_call_operand.hbm [shape: f32[32,256], index: 3, kind: input, shape index: {}]   ;;  %s6050_s4 = inlined_call_operand.vmem [shape: f32[64,256], index: 4, kind: input, shape index: {}]   ;;  %s6051_s5 = inlined_call_operand.hbm [shape: f32[1,256], index: 5, kind: input, shape index: {}]   ;;  %s6052_s6 = inlined_call_operand.vmem [shape: f32[64,256], index: 6, kind: input, shape index: {}]   ;;  %s6053_s7 = inlined_call_operand.vmem [shape: f32[64,256], index: 7, kind: input, shape index: {}]   ;;  %s6054_s8 = inlined_call_operand.hbm [shape: f32[64,256], index: 8, kind: input, shape index: {}]   ;;  %s6055_s9 = inlined_call_operand.hbm [shape: f32[1,256], index: 9, kind: input, shape index: {}]   ;;  %s6056_s10 = inlined_call_operand.vmem [shape: f32[64,4], index: 10, kind: input, shape index: {}]   ;;  %s6057_s11 = inlined_call_operand.vmem [shape: f32[1,4], index: 11, kind: input, shape index: {}]   ;;  %s6058_s12 = inlined_call_operand.vmem [shape: f32[8,4], index: 12, kind: output, shape index: {}]  }
   0x1   :  { %18 = vsyncpa [#allocation7], 0 }
   0x2   :  { %19 = vsyncpa [#allocation10], 0  ;;  %s4476_s21 = smov [#allocation6]   ;;  %s4477_s23 = smov [#allocation9]  }
   0x3   :  { %s41_s22 = sshll.u32 %s4476_s21, 4  ;;  %s69_s24 = sshll.u32 %s4477_s23, 4  ;;  %s42_s22 = int_to_ptr.vmem [resolvable:$true] %s41_s22  ;;  %s70_s24 = int_to_ptr.vmem [resolvable:$true] %s69_s24 }
   0x4   :  { %s4378_s25 = scalar_lea.vmem %s42_s22, 1024  ;;  %p4383_p1 = scmp.lt.s32.totalorder %s42_s22, %s42_s22 }
   0x5   :  { %p4379_p0 = scmp.ne.s32.totalorder %s42_s22, %s4378_s25  ;;  %p4384_p2 = scmp.lt.s32.totalorder %s4378_s25, %s4378_s25 }
   0x7   :  { %p4385_p3 = por %p4384_p2, %p4383_p1 }
   0x9   :  { %p4386_p4 = pnand %p4385_p3, %p4379_p0 }
   0xb   :  { %4389 = shalt.err (!%p4386_p4)
}
   0xc   :  { %s4478_s26 = smov 256   ;;  %s4479_s27 = smov 16  }
   0xd   :  { %47 = dma.hbm_to_vmem [thread:$0]  %s6049_s3, 1024, %s42_s22, [#allocation7], %s4478_s26, %s4478_s26, %s4479_s27  }
   0xe   :  { %s4398_s30 = scalar_lea.vmem %s70_s24, 2048  ;;  %p4403_p6 = scmp.lt.s32.totalorder %s70_s24, %s70_s24 }
   0xf   :  { %p4399_p5 = scmp.ne.s32.totalorder %s70_s24, %s4398_s30  ;;  %p4404_p7 = scmp.lt.s32.totalorder %s4398_s30, %s4398_s30 }
  0x11   :  { %p4405_p8 = por %p4404_p7, %p4403_p6 }
  0x13   :  { %p4406_p9 = pnand %p4405_p8, %p4399_p5 }
  0x15   :  { %4409 = shalt.err (!%p4406_p9)
}
  0x16   :  { %75 = dma.hbm_to_vmem [thread:$0]  %s6054_s8, 2048, %s70_s24, [#allocation10], %s4478_s26, %s4478_s26, %s4479_s27  }
  0x17   :  { %s4480_s15 = smov [#allocation4]   ;;  %s4481_s17 = smov [#allocation8]  }
  0x18   :  { %s29_s16 = sshll.u32 %s4480_s15, 4  ;;  %s56_s18 = sshll.u32 %s4481_s17, 4  ;;  %s30_s16 = int_to_ptr.vmem [resolvable:$true] %s29_s16  ;;  %s57_s18 = int_to_ptr.vmem [resolvable:$true] %s56_s18 }
  0x19   :  { %s4418_s19 = scalar_lea.vmem %s30_s16, 1024  ;;  %p4423_p11 = scmp.lt.s32.totalorder %s30_s16, %s30_s16 }
  0x1a   :  { %p4419_p10 = scmp.ne.s32.totalorder %s30_s16, %s4418_s19  ;;  %p4424_p12 = scmp.lt.s32.totalorder %s4418_s19, %s4418_s19 }
  0x1c   :  { %p4425_p13 = por %p4424_p12, %p4423_p11 }
  0x1e   :  { %p4426_p0 = pnand %p4425_p13, %p4419_p10 }
  0x20   :  { %4429 = shalt.err (!%p4426_p0)
}
  0x21   :  { %35 = dma.hbm_to_vmem [thread:$0]  %s6048_s2, 1024, %s30_s16, [#allocation5], %s4478_s26, %s4478_s26, %s4479_s27  }
  0x22   :  { %s4438_s21 = scalar_lea.vmem %s57_s18, 32  ;;  %p4443_p2 = scmp.lt.s32.totalorder %s57_s18, %s57_s18 }
  0x23   :  { %p4439_p1 = scmp.ne.s32.totalorder %s57_s18, %s4438_s21  ;;  %p4444_p3 = scmp.lt.s32.totalorder %s4438_s21, %s4438_s21 }
  0x25   :  { %p4445_p4 = por %p4444_p3, %p4443_p2 }
  0x27   :  { %p4446_p5 = pnand %p4445_p4, %p4439_p1 }
  0x29   :  { %4449 = shalt.err (!%p4446_p5)
}
  0x2a   :  { %59 = dma.hbm_to_vmem [thread:$0]  %s6051_s5, 32, %s57_s18, [#allocation7]  }
  0x2b   :  { %s4482_s23 = smov [#allocation11]  }
  0x2c   :  { %s82_s24 = sshll.u32 %s4482_s23, 4  ;;  %s83_s24 = int_to_ptr.vmem [resolvable:$true] %s82_s24 }
  0x2d   :  { %s4458_s25 = scalar_lea.vmem %s83_s24, 32  ;;  %p4463_p7 = scmp.lt.s32.totalorder %s83_s24, %s83_s24 }
  0x2e   :  { %p4459_p6 = scmp.ne.s32.totalorder %s83_s24, %s4458_s25  ;;  %p4464_p8 = scmp.lt.s32.totalorder %s4458_s25, %s4458_s25 }
  0x30   :  { %p4465_p9 = por %p4464_p8, %p4463_p7 }
  0x32   :  { %p4466_p10 = pnand %p4465_p9, %p4459_p6 }
  0x34   :  { %4469 = shalt.err (!%p4466_p10)
}
  0x35   :  { %85 = dma.hbm_to_vmem [thread:$0]  %s6055_s9, 32, %s83_s24, [#allocation10]  }
  0x36   :  { %4470 = dma.done.wait [#allocation5], 1024  }
  0x37   :  { %4471 = vsyncadd [#allocation5], 4294966272 }
  0x38   :  { %4472 = dma.done.wait [#allocation7], 1056  }
  0x39   :  { %4473 = vsyncadd [#allocation7], 4294966240 }
  0x3a   :  { %4474 = dma.done.wait [#allocation10], 2080  }
  0x3b   :  { %4475 = vsyncadd [#allocation10], 4294965216  ;;  %v4483_v0 = vmov 1   ;;  %v107_v1 = vld [vmem:[%s6046_s0 + $0x10] sm:$0xff]  ;;  %v105_v2 = vld [vmem:[%s6046_s0] sm:$0xff]  ;;  %v4484_v15 = vmov 0   ;;  %v113_v27 = vlaneseq }
  0x3c   :  { %4126 = vset.pattern.permute.xlu1 %v4483_v0  ;;  %4125 = vset.pattern.permute.xlu0 %v4483_v0  ;;  %v108_v3 = vld [vmem:[%s6046_s0 + $0x18] sm:$0xff]  ;;  %v106_v4 = vld [vmem:[%s6046_s0 + $0x8] sm:$0xff]  ;;  %v225_v6 = vld [vmem:[%s6047_s1 + $0x70] sm:$0xff]  ;;  %v4485_v31 = vmov 1.0   ;;  %v6061_v53 = vmov 0.0   ;;  %s4487_s13 = smov 64  }
  0x3d   :  { %170 = vperm.xlu1 %4126, %v107_v1   ;;  %164 = vperm.xlu0 %4125, %v105_v2   ;;  %v226_v5 = vld [vmem:[%s6047_s1 + $0x78] sm:$0xff]  ;;  %v224_v7 = vld [vmem:[%s6047_s1 + $0x68] sm:$0xff]  ;;  %v109_v9 = vld [vmem:[%s6046_s0 + $0x20] sm:$0xff]  ;;  %v4645_v28 = vand.u32 127, %v113_v27 }
  0x3e   :  { %4041 = vmatprep.subr.mxu1 %v226_v5  ;;  %3997 = vmatprep.subr.mxu0 %v226_v5  ;;  %v110_v8 = vld [vmem:[%s6046_s0 + $0x28] sm:$0xff]  ;;  %v223_v10 = vld [vmem:[%s6047_s1 + $0x60] sm:$0xff]  ;;  %v112_v11 = vld [vmem:[%s6046_s0 + $0x38] sm:$0xff] }
  0x3f   :  { %4042 = vmatpush3.msra.mxu1 %v226_v5  ;;  %3998 = vmatpush3.msra.mxu0 %v226_v5  ;;  %v111_v12 = vld [vmem:[%s6046_s0 + $0x30] sm:$0xff]  ;;  %v222_v13 = vld [vmem:[%s6047_s1 + $0x58] sm:$0xff]  ;;  %v220_v16 = vld [vmem:[%s6047_s1 + $0x48] sm:$0xff] }
  0x40   :  { %4043 = vmatprep.subr.mxu1 %v225_v6  ;;  %3999 = vmatprep.subr.mxu0 %v225_v6  ;;  %v221_v14 = vld [vmem:[%s6047_s1 + $0x50] sm:$0xff]  ;;  %v219_v17 = vld [vmem:[%s6047_s1 + $0x40] sm:$0xff]  ;;  %v218_v18 = vld [vmem:[%s6047_s1 + $0x38] sm:$0xff] }
  0x41   :  { %173 = vperm.xlu1 %4126, %v108_v3   ;;  %167 = vperm.xlu0 %4125, %v106_v4   ;;  %v217_v19 = vld [vmem:[%s6047_s1 + $0x30] sm:$0xff]  ;;  %v216_v20 = vld [vmem:[%s6047_s1 + $0x28] sm:$0xff]  ;;  %v215_v21 = vld [vmem:[%s6047_s1 + $0x20] sm:$0xff] }
  0x42   :  { %4044 = vmatpush3.msra.mxu1 %v225_v6  ;;  %4000 = vmatpush3.msra.mxu0 %v225_v6  ;;  %v214_v22 = vld [vmem:[%s6047_s1 + $0x18] sm:$0xff]  ;;  %v213_v23 = vld [vmem:[%s6047_s1 + $0x10] sm:$0xff]  ;;  %v212_v24 = vld [vmem:[%s6047_s1 + $0x8] sm:$0xff] }
  0x43   :  { %4045 = vmatprep.subr.mxu1 %v224_v7  ;;  %4001 = vmatprep.subr.mxu0 %v224_v7  ;;  %v211_v25 = vld [vmem:[%s6047_s1] sm:$0xff]  ;;  %v452_v26 = vld [vmem:[#allocation6 + $0x38] sm:$0xff]  ;;  %v451_v34 = vld [vmem:[#allocation6 + $0x30] sm:$0xff] }
  0x44   :  { %4046 = vmatpush3.msra.mxu1 %v224_v7  ;;  %4002 = vmatpush3.msra.mxu0 %v224_v7  ;;  %v450_v35 = vld [vmem:[#allocation6 + $0x28] sm:$0xff]  ;;  %v449_v38 = vld [vmem:[#allocation6 + $0x20] sm:$0xff]  ;;  %v448_v39 = vld [vmem:[#allocation6 + $0x18] sm:$0xff] }
  0x45   :  { %179 = vperm.xlu1 %4126, %v110_v8   ;;  %176 = vperm.xlu0 %4125, %v109_v9   ;;  %v447_v40 = vld [vmem:[#allocation6 + $0x10] sm:$0xff]  ;;  %v446_v41 = vld [vmem:[#allocation6 + $0x8] sm:$0xff]  ;;  %v445_v44 = vld [vmem:[#allocation6] sm:$0xff] }
  0x46   :  { %4047 = vmatprep.subr.mxu1 %v223_v10  ;;  %4003 = vmatprep.subr.mxu0 %v223_v10  ;;  %v4683_v54 = vld [vmem:[%s6050_s4 + $0x78] sm:$0xff]  ;;  %v4690_v57 = vld [vmem:[%s6050_s4 + $0x70] sm:$0xff]  ;;  %v4695_v59 = vld [vmem:[%s6050_s4 + $0x68] sm:$0xff] }
  0x47   :  { %4048 = vmatpush3.msra.mxu1 %v223_v10  ;;  %4004 = vmatpush3.msra.mxu0 %v223_v10  ;;  %v444_v55 = vld [vmem:[#allocation4 + $0x38] sm:$0xff]  ;;  %v4701_v60 = vld [vmem:[%s6050_s4 + $0x60] sm:$0xff]  ;;  %v4714_v63 = vld [vmem:[%s6050_s4 + $0x50] sm:$0xff] }
  0x48   :  { %4049 = vmatprep.subr.mxu1 %v222_v13  ;;  %4005 = vmatprep.subr.mxu0 %v222_v13  ;;  %v4708_v62 = vld [vmem:[%s6050_s4 + $0x58] sm:$0xff]  ;;  %v4740_v5 = vld [vmem:[%s6050_s4 + $0x30] sm:$0xff]  ;;  %v4746_v7 = vld [vmem:[%s6050_s4 + $0x28] sm:$0xff] }
  0x49   :  { %185 = vperm.xlu1 %4126, %v112_v11   ;;  %182 = vperm.xlu0 %4125, %v111_v12   ;;  %v443_v10 = vld [vmem:[#allocation4 + $0x30] sm:$0xff] }
  0x4a   :  { %4050 = vmatpush3.msra.mxu1 %v222_v13  ;;  %4006 = vmatpush3.msra.mxu0 %v222_v13  ;;  %v441_v13 = vld [vmem:[#allocation4 + $0x20] sm:$0xff] }
  0x4b   :  { %4051 = vmatprep.subr.mxu1 %v221_v14  ;;  %4007 = vmatprep.subr.mxu0 %v221_v14 }
  0x4c   :  { %4052 = vmatpush3.msra.mxu1 %v221_v14  ;;  %4008 = vmatpush3.msra.mxu0 %v221_v14  ;;  %v4764_v14 = vld [vmem:[%s6050_s4 + $0x18] sm:$0xff] }
  0x4d   :  { %4128 = vset.pattern.permute.xlu1 %v4484_v15  ;;  %4127 = vset.pattern.permute.xlu0 %v4484_v15  ;;  %v440_v15 = vld [vmem:[#allocation4 + $0x18] sm:$0xff] }
  0x4e   :  { %119 = vperm.xlu1 %4128, %v106_v4   ;;  %116 = vperm.xlu0 %4127, %v105_v2   ;;  %v4727_v2 = vld [vmem:[%s6050_s4 + $0x40] sm:$0xff]  ;;  %v4734_v4 = vld [vmem:[%s6050_s4 + $0x38] sm:$0xff] }
  0x4f   :  { %4053 = vmatprep.subr.mxu1 %v220_v16  ;;  %4009 = vmatprep.subr.mxu0 %v220_v16 }
  0x50   :  { %4054 = vmatpush3.msra.mxu1 %v220_v16  ;;  %4010 = vmatpush3.msra.mxu0 %v220_v16  ;;  %v4771_v16 = vld [vmem:[%s6050_s4 + $0x10] sm:$0xff] }
  0x51   :  { %4055 = vmatprep.subr.mxu1 %v219_v17  ;;  %4011 = vmatprep.subr.mxu0 %v219_v17 }
  0x52   :  { %122 = vperm.xlu1 %4128, %v107_v1   ;;  %125 = vperm.xlu0 %4127, %v108_v3   ;;  %v4720_v1 = vld [vmem:[%s6050_s4 + $0x48] sm:$0xff] }
  0x53   :  { %4056 = vmatpush3.msra.mxu1 %v219_v17  ;;  %4012 = vmatpush3.msra.mxu0 %v219_v17  ;;  %v439_v17 = vld [vmem:[#allocation4 + $0x10] sm:$0xff] }
  0x54   :  { %4057 = vmatprep.subr.mxu1 %v218_v18  ;;  %4013 = vmatprep.subr.mxu0 %v218_v18 }
  0x55   :  { %4058 = vmatpush3.msra.mxu1 %v218_v18  ;;  %4014 = vmatpush3.msra.mxu0 %v218_v18 }
  0x56   :  { %128 = vperm.xlu1 %4128, %v109_v9   ;;  %131 = vperm.xlu0 %4127, %v110_v8   ;;  %v4753_v8 = vld [vmem:[%s6050_s4 + $0x20] sm:$0xff] }
  0x57   :  { %4059 = vmatprep.subr.mxu1 %v217_v19  ;;  %4015 = vmatprep.subr.mxu0 %v217_v19 }
  0x58   :  { %4060 = vmatpush3.msra.mxu1 %v217_v19  ;;  %4016 = vmatpush3.msra.mxu0 %v217_v19  ;;  %v438_v19 = vld [vmem:[#allocation4 + $0x8] sm:$0xff] }
  0x59   :  { %4061 = vmatprep.subr.mxu1 %v216_v20  ;;  %4017 = vmatprep.subr.mxu0 %v216_v20 }
  0x5a   :  { %134 = vperm.xlu1 %4128, %v111_v12   ;;  %137 = vperm.xlu0 %4127, %v112_v11   ;;  %v442_v12 = vld [vmem:[#allocation4 + $0x28] sm:$0xff] }
  0x5b   :  { %4062 = vmatpush3.msra.mxu1 %v216_v20  ;;  %4018 = vmatpush3.msra.mxu0 %v216_v20  ;;  %v437_v20 = vld [vmem:[#allocation4] sm:$0xff] }
  0x5c   :  { %4063 = vmatprep.subr.mxu1 %v215_v21  ;;  %4019 = vmatprep.subr.mxu0 %v215_v21 }
  0x5d   :  { %4064 = vmatpush3.msra.mxu1 %v215_v21  ;;  %4020 = vmatpush3.msra.mxu0 %v215_v21  ;;  %v4781_v21 = vld [vmem:[%s6050_s4 + $0x8] sm:$0xff] }
  0x5e   :  { %4065 = vmatprep.subr.mxu1 %v214_v22  ;;  %4021 = vmatprep.subr.mxu0 %v214_v22 }
  0x5f   :  { %4066 = vmatpush3.msra.mxu1 %v214_v22  ;;  %4022 = vmatpush3.msra.mxu0 %v214_v22  ;;  %v4787_v22 = vld [vmem:[%s6050_s4] sm:$0xff] }
  0x60   :  { %4067 = vmatprep.subr.mxu1 %v213_v23  ;;  %4023 = vmatprep.subr.mxu0 %v213_v23 }
  0x61   :  { %4068 = vmatpush3.msra.mxu1 %v213_v23  ;;  %4024 = vmatpush3.msra.mxu0 %v213_v23 }
  0x62   :  { %4069 = vmatprep.subr.mxu1 %v212_v24  ;;  %4025 = vmatprep.subr.mxu0 %v212_v24 }
  0x63   :  { %4070 = vmatpush3.msra.mxu1 %v212_v24  ;;  %4026 = vmatpush3.msra.mxu0 %v212_v24 }
  0x64   :  { %4071 = vmatprep.subr.mxu1 %v211_v25  ;;  %4027 = vmatprep.subr.mxu0 %v211_v25 }
  0x65   :  { %4072 = vmatpush3.msra.mxu1 %v211_v25  ;;  %4028 = vmatpush3.msra.mxu0 %v211_v25 }
  0x66   :  { %502 = vmatprep.subr.mxu0 %v452_v26  ;;  %4104 = vmatprep.subr.mxu1 %v452_v26 }
  0x67   :  { %4129 = vset.pattern.permute.xlu0 %v4483_v0 }
  0xb8   :  { %v171_v29 = vpop.permute.xlu1 %170  ;;  %v165_v30 = vpop.permute.xlu0 %164 }
  0xb9   :  { %vm187_vm0 = vcmp.eq.s32.totalorder %v4645_v28, %v165_v30  ;;  %vm189_vm1 = vcmp.eq.s32.totalorder %v4645_v28, %v171_v29 }
  0xba   :  { %4073 = vmatprep.mubr.msk.f32.mxu1 %vm187_vm0, %v4485_v31  ;;  %vm453_vm0 = vcmask 261120  }
  0xbc   :  { %v174_v32 = vpop.permute.xlu1 %173  ;;  %v168_v33 = vpop.permute.xlu0 %167 }
  0xbd   :  { %vm188_vm2 = vcmp.eq.s32.totalorder %v4645_v28, %v168_v33  ;;  %vm190_vm3 = vcmp.eq.s32.totalorder %v4645_v28, %v174_v32 }
  0xbe   :  { %4074 = vmatmul.mubr.msk.f32.vlgmr.msra.gmra.mxu1 %vm188_vm2, %v4485_v31  ;;  %vm4488_vm2 = vmmov 0  }
  0xbf   :  { %4076 = vmatprep.mubr.msk.f32.mxu1 %vm189_vm1, %v4485_v31  ;;  %4108 = vmatpush1.msra.mxu1 %v451_v34  ;;  %vm852_vm1 = vcmask 523264  }
  0xc0   :  { %v180_v36 = vpop.permute.xlu1 %179  ;;  %v177_v37 = vpop.permute.xlu0 %176  ;;  %4105 = vmatprep.subr.mxu1 %v450_v35 }
  0xc1   :  { %vm191_vm4 = vcmp.eq.s32.totalorder %v4645_v28, %v177_v37  ;;  %4109 = vmatpush1.msra.mxu1 %v449_v38  ;;  %vm192_vm5 = vcmp.eq.s32.totalorder %v4645_v28, %v180_v36 }
  0xc2   :  { %4077 = vmatmul.mubr.msk.f32.gmra.mxu1 %vm190_vm3, %v4485_v31  ;;  %4106 = vmatprep.subr.mxu1 %v448_v39  ;;  %vm3819_vm3 = vcmask 31744  }
  0xc3   :  { %4079 = vmatprep.mubr.msk.f32.mxu1 %vm191_vm4, %v4485_v31  ;;  %4110 = vmatpush1.msra.mxu1 %v447_v40 }
  0xc4   :  { %v186_v42 = vpop.permute.xlu1 %185  ;;  %v183_v43 = vpop.permute.xlu0 %182  ;;  %4107 = vmatprep.subr.mxu1 %v446_v41 }
  0xc5   :  { %vm193_vm6 = vcmp.eq.s32.totalorder %v4645_v28, %v183_v43  ;;  %4111 = vmatpush1.msra.mxu1 %v445_v44  ;;  %vm194_vm7 = vcmp.eq.s32.totalorder %v4645_v28, %v186_v42 }
  0xc6   :  { %4080 = vmatmul.mubr.msk.f32.gmra.mxu1 %vm192_vm5, %v4485_v31  ;;  %639 = vmatprep.subr.mxu1 %v444_v55 }
  0xc7   :  { %4082 = vmatprep.mubr.msk.f32.mxu1 %vm193_vm6, %v4485_v31 }
  0xc9   :  { %v120_v45 = vpop.permute.xlu1 %119  ;;  %v117_v46 = vpop.permute.xlu0 %116 }
  0xca   :  { %vm140_vm8 = vcmp.eq.s32.totalorder %v4645_v28, %v120_v45  ;;  %4083 = vmatmul.mubr.msk.f32.gmra.mxu1 %vm194_vm7, %v4485_v31  ;;  %vm139_vm9 = vcmp.eq.s32.totalorder %v4645_v28, %v117_v46  ;;  %v728_v45 = vld [vmem:[#allocation8] sm:$0x3] }
  0xcb   :  { %4029 = vmatprep.mubr.msk.f32.mxu0 %vm139_vm9, %v4485_v31  ;;  %578 = vmatprep.mubr.f32.mxu1 %v6061_v53 }
  0xcc   :  { %4030 = vmatmul.mubr.msk.f32.vlgmr.msra.gmra.mxu0 %vm140_vm8, %v4485_v31 }
  0xcd   :  { %v123_v47 = vpop.permute.xlu1 %122  ;;  %v126_v48 = vpop.permute.xlu0 %125  ;;  %503 = vmatpush1.msra.mxu0 %v451_v34 }
  0xce   :  { %vm141_vm10 = vcmp.eq.s32.totalorder %v4645_v28, %v123_v47  ;;  %vm142_vm11 = vcmp.eq.s32.totalorder %v4645_v28, %v126_v48  ;;  %504 = vmatprep.subr.mxu0 %v450_v35 }
  0xcf   :  { %4032 = vmatprep.mubr.msk.f32.mxu0 %vm141_vm10, %v4485_v31  ;;  %505 = vmatpush1.msra.mxu0 %v449_v38 }
  0xd0   :  { %4033 = vmatmul.mubr.msk.f32.gmra.mxu0 %vm142_vm11, %v4485_v31  ;;  %506 = vmatprep.subr.mxu0 %v448_v39  ;;  %v4812_v39 = vshrl.u32 %v113_v27, 7 }
  0xd1   :  { %v129_v49 = vpop.permute.xlu1 %128  ;;  %v132_v50 = vpop.permute.xlu0 %131  ;;  %507 = vmatpush1.msra.mxu0 %v447_v40 }
  0xd2   :  { %vm143_vm12 = vcmp.eq.s32.totalorder %v4645_v28, %v129_v49  ;;  %vm144_vm13 = vcmp.eq.s32.totalorder %v4645_v28, %v132_v50  ;;  %508 = vmatprep.subr.mxu0 %v446_v41  ;;  %6067 = vst [vmem:[#allocation15_spill] sm:$0xff] %v4812_v39  ;;  %v6060_v43 = vsub.s32 0, %v4812_v39 }
  0xd3   :  { %4035 = vmatprep.mubr.msk.f32.mxu0 %vm143_vm12, %v4485_v31  ;;  %509 = vmatpush1.msra.mxu0 %v445_v44 }
  0xd4   :  { %4036 = vmatmul.mubr.msk.f32.gmra.mxu0 %vm144_vm13, %v4485_v31  ;;  %872 = vmatprep.subr.mxu0 %v4683_v54  ;;  %v733_v49 = vrot.slane %v728_v45, %v6060_v43  ;;  %v5028_v43 = vld [vmem:[%s6053_s7 + $0x10] sm:$0xff] }
  0xd5   :  { %v135_v51 = vpop.permute.xlu1 %134  ;;  %v138_v52 = vpop.permute.xlu0 %137 }
  0xd6   :  { %vm145_vm14 = vcmp.eq.s32.totalorder %v4645_v28, %v135_v51  ;;  %vm146_vm15 = vcmp.eq.s32.totalorder %v4645_v28, %v138_v52 }
  0xd7   :  { %4038 = vmatprep.mubr.msk.f32.mxu0 %vm145_vm14, %v4485_v31 }
  0xd8   :  { %4039 = vmatmul.mubr.msk.f32.gmra.mxu0 %vm146_vm15, %v4485_v31 }
  0xd9   :  { %542 = vmatprep.mubr.f32.mxu0 %v6061_v53 }
 0x17e   :  { %v4075_v56 = vpop.f32.mrf.mxu1 }
 0x180   :  { %v398_v58 = vpop.f32.mrf.mxu1 }
 0x181   :  { %3860 = vmatmul.mubr.msk.f32.vlgmr.msra.gmra.mxu0 %vm453_vm0, %v398_v58  ;;  %v6059_v58 = vsub.s32 1, %v4812_v39 }
 0x182   :  { %873 = vmatpush1.msra.mxu0 %v4690_v57  ;;  %v4078_v61 = vpop.f32.mrf.mxu1  ;;  %548 = vmatprep.mubr.f32.mxu0 %v6061_v53 }
 0x183   :  { %874 = vmatprep.subr.mxu0 %v4695_v59 }
 0x184   :  { %v408_v0 = vpop.f32.mrf.mxu1  ;;  %875 = vmatpush1.msra.mxu0 %v4701_v60 }
 0x185   :  { %3861 = vmatmul.mubr.msk.f32.gmra.mxu0 %vm453_vm0, %v4075_v56  ;;  %876 = vmatprep.subr.mxu0 %v4708_v62 }
 0x186   :  { %v4081_v3 = vpop.f32.mrf.mxu1  ;;  %877 = vmatpush1.msra.mxu0 %v4714_v63  ;;  %554 = vmatprep.mubr.f32.mxu0 %v6061_v53 }
 0x187   :  { %878 = vmatprep.subr.mxu0 %v4720_v1 }
 0x188   :  { %v418_v6 = vpop.f32.mrf.mxu1  ;;  %879 = vmatpush1.msra.mxu0 %v4727_v2 }
 0x189   :  { %3862 = vmatmul.mubr.msk.f32.gmra.mxu0 %vm453_vm0, %v408_v0  ;;  %880 = vmatprep.subr.mxu0 %v4734_v4 }
 0x18a   :  { %v4084_v9 = vpop.f32.mrf.mxu1  ;;  %560 = vmatprep.mubr.f32.mxu0 %v6061_v53  ;;  %881 = vmatpush1.msra.mxu0 %v4740_v5 }
 0x18b   :  { %882 = vmatprep.subr.mxu0 %v4746_v7 }
 0x18c   :  { %v428_v11 = vpop.f32.mrf.mxu1  ;;  %883 = vmatpush1.msra.mxu0 %v4753_v8  ;;  %v4031_v18 = vpop.f32.mrf.mxu0 }
 0x18d   :  { %3863 = vmatmul.mubr.msk.f32.gmra.mxu0 %vm453_vm0, %v4078_v61  ;;  %3866 = vmatmul.mubr.msk.f32.vlgmr.msra.gmra.mxu1 %vm453_vm0, %v428_v11  ;;  %v737_v11 = vrot.slane %v728_v45, %v6059_v58  ;;  %v5021_v58 = vld [vmem:[%s6053_s7 + $0x18] sm:$0xff] }
 0x18e   :  { %640 = vmatpush1.msra.mxu1 %v443_v10  ;;  %566 = vmatprep.mubr.f32.mxu0 %v6061_v53  ;;  %v293_v23 = vpop.f32.mrf.mxu0 }
 0x18f   :  { %641 = vmatprep.subr.mxu1 %v442_v12  ;;  %584 = vmatprep.mubr.f32.mxu1 %v6061_v53 }
 0x190   :  { %642 = vmatpush1.msra.mxu1 %v441_v13  ;;  %884 = vmatprep.subr.mxu0 %v4764_v14  ;;  %v4034_v24 = vpop.f32.mrf.mxu0 }
 0x191   :  { %643 = vmatprep.subr.mxu1 %v440_v15  ;;  %3864 = vmatmul.mubr.msk.f32.gmra.mxu0 %vm453_vm0, %v418_v6 }
 0x192   :  { %3867 = vmatmul.mubr.msk.f32.gmra.mxu1 %vm453_vm0, %v4084_v9  ;;  %885 = vmatpush1.msra.mxu0 %v4771_v16  ;;  %v303_v25 = vpop.f32.mrf.mxu0 }
 0x193   :  { %644 = vmatpush1.msra.mxu1 %v439_v17  ;;  %572 = vmatprep.mubr.f32.mxu0 %v6061_v53 }
 0x194   :  { %645 = vmatprep.subr.mxu1 %v438_v19  ;;  %679 = vmatprep.mubr.f32.mxu1 %v6061_v53  ;;  %v4037_v26 = vpop.f32.mrf.mxu0 }
 0x195   :  { %646 = vmatpush1.msra.mxu1 %v437_v20  ;;  %3865 = vmatmul.mubr.msk.f32.gmra.mxu0 %vm453_vm0, %v4081_v3 }
 0x196   :  { %3868 = vmatmul.mubr.msk.f32.vlgmr.msra.gmra.mxu1 %vm453_vm0, %v293_v23  ;;  %886 = vmatprep.subr.mxu0 %v4781_v21  ;;  %v313_v28 = vpop.f32.mrf.mxu0 }
 0x197   :  { %887 = vmatpush1.msra.mxu0 %v4787_v22  ;;  %685 = vmatprep.mubr.f32.mxu1 %v6061_v53 }
 0x198   :  { %920 = vmatprep.mubr.f32.mxu0 %v6061_v53  ;;  %v4040_v29 = vpop.f32.mrf.mxu0 }
 0x199   :  { %921 = vmatmul.mubr.f32.vlgmr.msra.gmra.mxu0 %v6061_v53 }
 0x19a   :  { %3869 = vmatmul.mubr.msk.f32.gmra.mxu1 %vm453_vm0, %v4031_v18  ;;  %1099 = vmatprep.mubr.f32.mxu0 %v6061_v53  ;;  %v323_v30 = vpop.f32.mrf.mxu0 }
 0x19b   :  { %691 = vmatprep.mubr.f32.mxu1 %v6061_v53 }
 0x19e   :  { %3870 = vmatmul.mubr.msk.f32.gmra.mxu1 %vm453_vm0, %v303_v25 }
 0x19f   :  { %697 = vmatprep.mubr.f32.mxu1 %v6061_v53 }
 0x1a2   :  { %3871 = vmatmul.mubr.msk.f32.gmra.mxu1 %vm453_vm0, %v4034_v24 }
 0x1a3   :  { %703 = vmatprep.mubr.f32.mxu1 %v6061_v53 }
 0x1a6   :  { %3872 = vmatmul.mubr.msk.f32.gmra.mxu1 %vm453_vm0, %v313_v28 }
 0x1a7   :  { %709 = vmatprep.mubr.f32.mxu1 %v6061_v53 }
 0x1aa   :  { %3873 = vmatmul.mubr.msk.f32.gmra.mxu1 %vm453_vm0, %v4037_v26 }
 0x1ab   :  { %715 = vmatprep.mubr.f32.mxu1 %v6061_v53 }
 0x1ae   :  { %3874 = vmatmul.mubr.msk.f32.gmra.mxu1 %vm453_vm0, %v323_v30 }
 0x1af   :  { %721 = vmatprep.mubr.f32.mxu1 %v6061_v53 }
 0x1b2   :  { %3875 = vmatmul.mubr.msk.f32.gmra.mxu1 %vm453_vm0, %v4040_v29 }
 0x1b3   :  { %1022 = vmatprep.mubr.f32.mxu1 %v6061_v53  ;;  %v5035_v53 = vld [vmem:[%s6053_s7 + $0x8] sm:$0xff] }
 0x241   :  { %v544_v31 = vpop.f32.mrf.mxu0 }
 0x243   :  { %v546_v32 = vpop.f32.mrf.mxu0 }
 0x245   :  { %v550_v33 = vpop.f32.mrf.mxu0 }
 0x247   :  { %v552_v34 = vpop.f32.mrf.mxu0 }
 0x249   :  { %v556_v35 = vpop.f32.mrf.mxu0 }
 0x24b   :  { %v558_v36 = vpop.f32.mrf.mxu0 }
 0x24d   :  { %v562_v37 = vpop.f32.mrf.mxu0  ;;  %v580_v38 = vpop.f32.mrf.mxu1 }
 0x24f   :  { %v564_v40 = vpop.f32.mrf.mxu0  ;;  %v582_v41 = vpop.f32.mrf.mxu1 }
 0x251   :  { %v568_v42 = vpop.f32.mrf.mxu0 }
 0x252   :  { %v586_v44 = vpop.f32.mrf.mxu1 }
 0x253   :  { %v570_v46 = vpop.f32.mrf.mxu0 }
 0x254   :  { %v588_v47 = vpop.f32.mrf.mxu1 }
 0x255   :  { %v574_v48 = vpop.f32.mrf.mxu0 }
 0x256   :  { %v681_v50 = vpop.f32.mrf.mxu1 }
 0x257   :  { %v682_v51 = vadd.f32 %v681_v50, %v544_v31  ;;  %v576_v52 = vpop.f32.mrf.mxu0 }
 0x258   :  { %v683_v55 = vpop.f32.mrf.mxu1 }
 0x259   :  { %v740_v56 = vadd.f32 %v733_v49, %v682_v51  ;;  %v922_v27 = vpop.f32.mrf.mxu0  ;;  %v684_v23 = vadd.f32 %v683_v55, %v546_v32 }
 0x25a   :  { %v687_v61 = vpop.f32.mrf.mxu1 }
 0x25b   :  { %v688_v0 = vadd.f32 %v687_v61, %v550_v33  ;;  %v927_v3 = vadd.f32 %v922_v27, %v740_v56  ;;  %v741_v31 = vadd.f32 %v737_v11, %v684_v23 }
 0x25c   :  { %v689_v6 = vpop.f32.mrf.mxu1 }
 0x25d   :  { %v3876_v9 = vmul.f32 -1.442695, %v927_v3  ;;  %v690_v10 = vadd.f32 %v689_v6, %v552_v34  ;;  %v4820_v12 = vadd.f32 %v733_v49, %v688_v0  ;;  %v924_v34 = vpop.f32.mrf.mxu0 }
 0x25e   :  { %v693_v13 = vpop.f32.mrf.mxu1  ;;  %v4834_v56 = vadd.f32 %v924_v34, %v741_v31  ;;  %v4891_v31 = vld [vmem:[%s6053_s7 + $0x78] sm:$0xff]  ;;  %v4902_v34 = vld [vmem:[%s6052_s6 + $0x48] sm:$0xff] }
 0x25f   :  { %4130 = vpow2.f32 %v3876_v9  ;;  %v694_v15 = vadd.f32 %v693_v13, %v556_v35  ;;  %v4822_v17 = vadd.f32 %v737_v11, %v690_v10  ;;  %1051 = vmatprep.subr.mxu0 %v4891_v31 }
 0x260   :  { %v695_v18 = vpop.f32.mrf.mxu1  ;;  %4132 = vtanh.f32 %v4834_v56 }
 0x261   :  { %v696_v19 = vadd.f32 %v695_v18, %v558_v36  ;;  %v4824_v20 = vadd.f32 %v733_v49, %v694_v15 }
 0x262   :  { %v699_v24 = vpop.f32.mrf.mxu1 }
 0x263   :  { %6068 = vst [vmem:[#allocation16_spill] sm:$0xff] %v4824_v20  ;;  %v700_v25 = vadd.f32 %v699_v24, %v562_v37  ;;  %v4826_v26 = vadd.f32 %v737_v11, %v696_v19 }
 0x264   :  { %v701_v28 = vpop.f32.mrf.mxu1 }
 0x265   :  { %6069 = vst [vmem:[#allocation17_spill] sm:$0xff] %v4826_v26  ;;  %v702_v29 = vadd.f32 %v701_v28, %v564_v40  ;;  %v4828_v30 = vadd.f32 %v733_v49, %v700_v25 }
 0x266   :  { %v705_v33 = vpop.f32.mrf.mxu1 }
 0x267   :  { %6070 = vst [vmem:[#allocation18_spill] sm:$0xff] %v4828_v30  ;;  %v706_v45 = vadd.f32 %v705_v33, %v568_v42  ;;  %v4830_v35 = vadd.f32 %v737_v11, %v702_v29  ;;  %v4886_v29 = vld [vmem:[%s6052_s6 + $0x50] sm:$0xff] }
 0x268   :  { %v707_v50 = vpop.f32.mrf.mxu1  ;;  %v4896_v33 = vld [vmem:[%s6053_s7 + $0x70] sm:$0xff] }
 0x269   :  { %6071 = vst [vmem:[#allocation19_spill] sm:$0xff] %v4830_v35  ;;  %v708_v51 = vadd.f32 %v707_v50, %v570_v46  ;;  %v4832_v36 = vadd.f32 %v733_v49, %v706_v45  ;;  %v4908_v45 = vld [vmem:[%s6053_s7 + $0x68] sm:$0xff]  ;;  %v4913_v50 = vld [vmem:[%s6053_s7 + $0x60] sm:$0xff]  ;;  %1052 = vmatpush1.msra.mxu0 %v4896_v33 }
 0x26a   :  { %v711_v32 = vpop.f32.mrf.mxu1  ;;  %1053 = vmatprep.subr.mxu0 %v4908_v45 }
 0x26b   :  { %6072 = vst [vmem:[#allocation20_spill] sm:$0xff] %v4832_v36  ;;  %v712_v37 = vadd.f32 %v711_v32, %v574_v48  ;;  %v4836_v55 = vadd.f32 %v737_v11, %v708_v51  ;;  %v4919_v51 = vld [vmem:[%s6052_s6 + $0x40] sm:$0xff]  ;;  %v4925_v32 = vld [vmem:[%s6053_s7 + $0x58] sm:$0xff]  ;;  %1054 = vmatpush1.msra.mxu0 %v4913_v50 }
 0x26c   :  { %v4131_v27 = vpop.eup %4130  ;;  %v713_v40 = vpop.f32.mrf.mxu1  ;;  %1055 = vmatprep.subr.mxu0 %v4925_v32 }
 0x26d   :  { %6073 = vst [vmem:[#allocation21_spill] sm:$0xff] %v4836_v55  ;;  %v932_v61 = vadd.f32 1.0, %v4131_v27  ;;  %v714_v0 = vadd.f32 %v713_v40, %v576_v52  ;;  %v4838_v3 = vadd.f32 %v733_v49, %v712_v37  ;;  %v4133_v25 = vpop.eup %4132  ;;  %v4931_v37 = vld [vmem:[%s6052_s6 + $0x38] sm:$0xff]  ;;  %v4937_v27 = vld [vmem:[%s6053_s7 + $0x50] sm:$0xff] }
 0x26e   :  { %v717_v42 = vpop.f32.mrf.mxu1  ;;  %v4943_v40 = vld [vmem:[%s6052_s6 + $0x30] sm:$0xff]  ;;  %1056 = vmatpush1.msra.mxu0 %v4937_v27 }
 0x26f   :  { %6074 = vst [vmem:[#allocation22_spill] sm:$0xff] %v4838_v3  ;;  %4134 = vrcp.f32 %v932_v61  ;;  %v718_v6 = vadd.f32 %v717_v42, %v580_v38  ;;  %v4841_v46 = vadd.f32 %v737_v11, %v714_v0  ;;  %v4949_v61 = vld [vmem:[%s6053_s7 + $0x48] sm:$0xff]  ;;  %v4961_v42 = vld [vmem:[%s6053_s7 + $0x40] sm:$0xff] }
 0x270   :  { %v719_v9 = vpop.f32.mrf.mxu1  ;;  %v4955_v0 = vld [vmem:[%s6052_s6 + $0x28] sm:$0xff]  ;;  %1057 = vmatprep.subr.mxu0 %v4949_v61 }
 0x271   :  { %6075 = vst [vmem:[#allocation23_spill] sm:$0xff] %v4841_v46  ;;  %v720_v10 = vadd.f32 %v719_v9, %v582_v41  ;;  %v4843_v13 = vadd.f32 %v733_v49, %v718_v6  ;;  %v4858_v41 = vld [vmem:[%s6052_s6 + $0x78] sm:$0xff]  ;;  %v4967_v6 = vld [vmem:[%s6052_s6 + $0x20] sm:$0xff]  ;;  %1058 = vmatpush1.msra.mxu0 %v4961_v42 }
 0x272   :  { %v723_v48 = vpop.f32.mrf.mxu1  ;;  %6080 = vst [vmem:[#allocation28_spill] sm:$0xff] %v4858_v41  ;;  %974 = vmatprep.subr.mxu1 %v4858_v41  ;;  %v4973_v9 = vld [vmem:[%s6053_s7 + $0x38] sm:$0xff] }
 0x273   :  { %6076 = vst [vmem:[#allocation24_spill] sm:$0xff] %v4843_v13  ;;  %v724_v15 = vadd.f32 %v723_v48, %v586_v44  ;;  %v4845_v18 = vadd.f32 %v737_v11, %v720_v10  ;;  %v4863_v44 = vld [vmem:[%s6052_s6 + $0x70] sm:$0xff]  ;;  %v4980_v10 = vld [vmem:[%s6052_s6 + $0x18] sm:$0xff]  ;;  %1059 = vmatprep.subr.mxu0 %v4973_v9 }
 0x274   :  { %v725_v19 = vpop.f32.mrf.mxu1  ;;  %975 = vmatpush1.msra.mxu1 %v4863_v44  ;;  %v4985_v48 = vld [vmem:[%s6053_s7 + $0x30] sm:$0xff] }
 0x275   :  { %6077 = vst [vmem:[#allocation25_spill] sm:$0xff] %v4845_v18  ;;  %v726_v23 = vadd.f32 %v725_v19, %v588_v47  ;;  %v4847_v52 = vadd.f32 %v733_v49, %v724_v15  ;;  %v4868_v47 = vld [vmem:[%s6052_s6 + $0x68] sm:$0xff]  ;;  %v4874_v49 = vld [vmem:[%s6052_s6 + $0x60] sm:$0xff]  ;;  %v4992_v15 = vld [vmem:[%s6052_s6 + $0x10] sm:$0xff]  ;;  %1060 = vmatpush1.msra.mxu0 %v4985_v48 }
 0x276   :  { %976 = vmatprep.subr.mxu1 %v4868_v47  ;;  %v4997_v19 = vld [vmem:[%s6053_s7 + $0x28] sm:$0xff] }
 0x277   :  { %6078 = vst [vmem:[#allocation26_spill] sm:$0xff] %v4847_v52  ;;  %v4849_v24 = vadd.f32 %v737_v11, %v726_v23  ;;  %v4880_v11 = vld [vmem:[%s6052_s6 + $0x58] sm:$0xff]  ;;  %977 = vmatpush1.msra.mxu1 %v4874_v49  ;;  %v5004_v23 = vld [vmem:[%s6052_s6 + $0x8] sm:$0xff]  ;;  %1061 = vmatprep.subr.mxu0 %v4997_v19  ;;  %v3877_v52 = vmul.f32 -1.442695, %v4834_v56  ;;  %v6081_v56 = vmov 0.0  }
 0x278   :  { %978 = vmatprep.subr.mxu1 %v4880_v11 }
 0x279   :  { %6079 = vst [vmem:[#allocation27_spill] sm:$0xff] %v4849_v24  ;;  %979 = vmatpush1.msra.mxu1 %v4886_v29  ;;  %v5042_v24 = vld [vmem:[%s6053_s7] sm:$0xff]  ;;  %4136 = vpow2.f32 %v3877_v52 }
 0x27a   :  { %980 = vmatprep.subr.mxu1 %v4902_v34 }
 0x27b   :  { %981 = vmatpush1.msra.mxu1 %v4919_v51 }
 0x27c   :  { %v4851_v28 = vpop.eup %4134  ;;  %982 = vmatprep.subr.mxu1 %v4931_v37 }
 0x27d   :  { %v943_v38 = vmul.f32 %v4851_v28, %v4133_v25  ;;  %983 = vmatpush1.msra.mxu1 %v4943_v40  ;;  %v5009_v25 = vld [vmem:[%s6053_s7 + $0x20] sm:$0xff]  ;;  %v942_v46 = vmul.f32 0.0, %v4851_v28 }
 0x27e   :  { %984 = vmatprep.subr.mxu1 %v4955_v0  ;;  %1062 = vmatpush1.msra.mxu0 %v5009_v25 }
 0x27f   :  { %945 = vrot.lane.b32.xlu1 %v943_v38, %s4487_s13  ;;  %985 = vmatpush1.msra.mxu1 %v4967_v6  ;;  %v5016_v38 = vld [vmem:[%s6052_s6] sm:$0xff] }
 0x280   :  { %986 = vmatprep.subr.mxu1 %v4980_v10  ;;  %1063 = vmatprep.subr.mxu0 %v5021_v58 }
 0x281   :  { %987 = vmatpush1.msra.mxu1 %v4992_v15  ;;  %1064 = vmatpush1.msra.mxu0 %v5028_v43 }
 0x282   :  { %988 = vmatprep.subr.mxu1 %v5004_v23  ;;  %1065 = vmatprep.subr.mxu0 %v5035_v53 }
 0x283   :  { %989 = vmatpush1.msra.mxu1 %v5016_v38  ;;  %1066 = vmatpush1.msra.mxu0 %v5042_v24 }
 0x284   :  { %1128 = vmatprep.subr.mxu1 %v4683_v54  ;;  %1230 = vmatprep.subr.mxu0 %v4858_v41 }
 0x286   :  { %v4137_v18 = vpop.eup %4136 }
 0x287   :  { %v939_v13 = vadd.f32 1.0, %v4137_v18 }
 0x289   :  { %4138 = vrcp.f32 %v939_v13 }
 0x296   :  { %v4139_v55 = vpop.eup %4138 }
 0x2f1   :  { %v946_v3 = vpop.permute.xlu1 %945 }
 0x2f2   :  { %v5051_v39 = vadd.f32 %v946_v3, %v942_v46 }
 0x2f4   :  { %4140 = vtanh.f32 %v5051_v39 }
 0x301   :  { %v4141_v36 = vpop.eup %4140 }
 0x302   :  { %v950_v35 = vmul.f32 %v4141_v36, %v4139_v55 }
 0x304   :  { %954 = vrot.lane.b32.xlu0 %v950_v35, %s4487_s13 }
 0x376   :  { %v955_v30 = vpop.permute.xlu0 %954 }
 0x377   :  { %3878 = vmatmul.mubr.msk.f32.vlgmr.msra.gmra.mxu1 %vm852_vm1, %v955_v30  ;;  %3879 = vmatmul.mubr.msk.f32.vlgmr.msra.gmra.mxu0 %vm852_vm1, %v955_v30 }
 0x378   :  { %1129 = vmatpush1.msra.mxu1 %v4690_v57  ;;  %1176 = vmatprep.mubr.f32.mxu1 %v6081_v56 }
 0x379   :  { %1130 = vmatprep.subr.mxu1 %v4695_v59  ;;  %1231 = vmatpush1.msra.mxu0 %v4863_v44 }
 0x37a   :  { %1131 = vmatpush1.msra.mxu1 %v4701_v60  ;;  %1232 = vmatprep.subr.mxu0 %v4868_v47 }
 0x37b   :  { %1132 = vmatprep.subr.mxu1 %v4708_v62  ;;  %1233 = vmatpush1.msra.mxu0 %v4874_v49 }
 0x37c   :  { %1133 = vmatpush1.msra.mxu1 %v4714_v63  ;;  %1234 = vmatprep.subr.mxu0 %v4880_v11 }
 0x37d   :  { %1134 = vmatprep.subr.mxu1 %v4720_v1  ;;  %1235 = vmatpush1.msra.mxu0 %v4886_v29 }
 0x37e   :  { %1135 = vmatpush1.msra.mxu1 %v4727_v2  ;;  %1236 = vmatprep.subr.mxu0 %v4902_v34 }
 0x37f   :  { %1136 = vmatprep.subr.mxu1 %v4734_v4  ;;  %1237 = vmatpush1.msra.mxu0 %v4919_v51 }
 0x380   :  { %1137 = vmatpush1.msra.mxu1 %v4740_v5  ;;  %1238 = vmatprep.subr.mxu0 %v4931_v37 }
 0x381   :  { %1138 = vmatprep.subr.mxu1 %v4746_v7  ;;  %1239 = vmatpush1.msra.mxu0 %v4943_v40 }
 0x382   :  { %1139 = vmatpush1.msra.mxu1 %v4753_v8  ;;  %1240 = vmatprep.subr.mxu0 %v4955_v0 }
 0x383   :  { %1140 = vmatprep.subr.mxu1 %v4764_v14  ;;  %1241 = vmatpush1.msra.mxu0 %v4967_v6 }
 0x384   :  { %1141 = vmatpush1.msra.mxu1 %v4771_v16  ;;  %1242 = vmatprep.subr.mxu0 %v4980_v10 }
 0x385   :  { %1142 = vmatprep.subr.mxu1 %v4781_v21  ;;  %1243 = vmatpush1.msra.mxu0 %v4992_v15 }
 0x386   :  { %1143 = vmatpush1.msra.mxu1 %v4787_v22  ;;  %1244 = vmatprep.subr.mxu0 %v5004_v23 }
 0x387   :  { %3880 = vmatmul.mubr.msk.f32.vlgmr.msra.gmra.mxu1 %vm852_vm1, %v955_v30  ;;  %1307 = vmatprep.subr.mxu1 %v4891_v31 }
 0x388   :  { %1308 = vmatpush1.msra.mxu1 %v4896_v33  ;;  %1245 = vmatpush1.msra.mxu0 %v5016_v38 }
 0x389   :  { %1309 = vmatprep.subr.mxu1 %v4908_v45  ;;  %1278 = vmatprep.mubr.f32.mxu0 %v6081_v56 }
 0x38a   :  { %1310 = vmatpush1.msra.mxu1 %v4913_v50  ;;  %1355 = vmatprep.mubr.f32.mxu1 %v6081_v56 }
 0x38b   :  { %1311 = vmatprep.subr.mxu1 %v4925_v32  ;;  %1384 = vmatprep.subr.mxu0 %v4683_v54 }
 0x38c   :  { %1312 = vmatpush1.msra.mxu1 %v4937_v27 }
 0x38d   :  { %1313 = vmatprep.subr.mxu1 %v4949_v61 }
 0x38e   :  { %1314 = vmatpush1.msra.mxu1 %v4961_v42 }
 0x38f   :  { %1315 = vmatprep.subr.mxu1 %v4973_v9 }
 0x390   :  { %1316 = vmatpush1.msra.mxu1 %v4985_v48 }
 0x391   :  { %1317 = vmatprep.subr.mxu1 %v4997_v19 }
 0x392   :  { %1318 = vmatpush1.msra.mxu1 %v5009_v25 }
 0x393   :  { %1319 = vmatprep.subr.mxu1 %v5021_v58 }
 0x394   :  { %1320 = vmatpush1.msra.mxu1 %v5028_v43 }
 0x395   :  { %1321 = vmatprep.subr.mxu1 %v5035_v53 }
 0x396   :  { %1322 = vmatpush1.msra.mxu1 %v5042_v24 }
 0x397   :  { %1486 = vmatprep.subr.mxu1 %v4858_v41 }
 0x437   :  { %v5109_v30 = vpop.f32.mrf.mxu1 }
 0x438   :  { %6082 = vst [vmem:[#allocation29_spill] sm:$0xff] %v5109_v30 }
 0x439   :  { %v5111_v35 = vpop.f32.mrf.mxu1 }
 0x43a   :  { %6083 = vst [vmem:[#allocation30_spill] sm:$0xff] %v5111_v35 }
 0x447   :  { %v1178_v36 = vpop.f32.mrf.mxu1 }
 0x448   :  { %v1183_v55 = vadd.f32 %v1178_v36, %v4820_v12 }
 0x449   :  { %v1180_v46 = vpop.f32.mrf.mxu1 }
 0x44a   :  { %v3881_v3 = vmul.f32 -1.442695, %v1183_v55  ;;  %v1184_v13 = vadd.f32 %v1180_v46, %v4822_v17 }
 0x44c   :  { %4142 = vpow2.f32 %v3881_v3  ;;  %v3882_v30 = vmul.f32 -1.442695, %v1184_v13 }
 0x44d   :  { %4144 = vtanh.f32 %v1184_v13  ;;  %v6089_v13 = vld [vmem:[#allocation16_spill] sm:$0xff] }
 0x459   :  { %v4143_v18 = vpop.eup %4142 }
 0x45a   :  { %v1188_v52 = vadd.f32 1.0, %v4143_v18  ;;  %v4145_v28 = vpop.eup %4144 }
 0x45c   :  { %4146 = vrcp.f32 %v1188_v52 }
 0x45d   :  { %4148 = vpow2.f32 %v3882_v30 }
 0x469   :  { %v4147_v26 = vpop.eup %4146 }
 0x46a   :  { %v1199_v20 = vmul.f32 %v4147_v26, %v4145_v28  ;;  %v4149_v35 = vpop.eup %4148  ;;  %v1198_v12 = vmul.f32 %v4147_v26, %v5051_v39  ;;  %v6084_v39 = vld [vmem:[#allocation28_spill] sm:$0xff] }
 0x46b   :  { %v1195_v41 = vadd.f32 1.0, %v4149_v35 }
 0x46c   :  { %1201 = vrot.lane.b32.xlu1 %v1199_v20, %s4487_s13  ;;  %v5175_v20 = vpop.f32.mrf.mxu0 }
 0x46d   :  { %4150 = vrcp.f32 %v1195_v41  ;;  %6085 = vst [vmem:[#allocation31_spill] sm:$0xff] %v5175_v20 }
 0x46e   :  { %v5177_v26 = vpop.f32.mrf.mxu0 }
 0x46f   :  { %6086 = vst [vmem:[#allocation32_spill] sm:$0xff] %v5177_v26 }
 0x47a   :  { %v4151_v17 = vpop.eup %4150 }
 0x4de   :  { %v1202_v36 = vpop.permute.xlu1 %1201 }
 0x4df   :  { %v5117_v55 = vadd.f32 %v1202_v36, %v1198_v12  ;;  %v6090_v36 = vld [vmem:[#allocation17_spill] sm:$0xff] }
 0x4e1   :  { %4152 = vtanh.f32 %v5117_v55 }
 0x4ee   :  { %v4153_v3 = vpop.eup %4152 }
 0x4ef   :  { %v1206_v46 = vmul.f32 %v4153_v3, %v4151_v17 }
 0x4f1   :  { %1210 = vrot.lane.b32.xlu0 %v1206_v46, %s4487_s13 }
 0x563   :  { %v1211_v18 = vpop.permute.xlu0 %1210 }
 0x564   :  { %3883 = vmatmul.mubr.msk.f32.vlgmr.msra.gmra.mxu0 %vm852_vm1, %v1211_v18  ;;  %3884 = vmatmul.mubr.msk.f32.vlgmr.msra.gmra.mxu1 %vm852_vm1, %v1211_v18 }
 0x565   :  { %1385 = vmatpush1.msra.mxu0 %v4690_v57  ;;  %1432 = vmatprep.mubr.f32.mxu0 %v6081_v56 }
 0x566   :  { %1386 = vmatprep.subr.mxu0 %v4695_v59  ;;  %1487 = vmatpush1.msra.mxu1 %v4863_v44 }
 0x567   :  { %1387 = vmatpush1.msra.mxu0 %v4701_v60  ;;  %1488 = vmatprep.subr.mxu1 %v4868_v47 }
 0x568   :  { %1388 = vmatprep.subr.mxu0 %v4708_v62  ;;  %1489 = vmatpush1.msra.mxu1 %v4874_v49 }
 0x569   :  { %1389 = vmatpush1.msra.mxu0 %v4714_v63  ;;  %1490 = vmatprep.subr.mxu1 %v4880_v11 }
 0x56a   :  { %1390 = vmatprep.subr.mxu0 %v4720_v1  ;;  %1491 = vmatpush1.msra.mxu1 %v4886_v29 }
 0x56b   :  { %1391 = vmatpush1.msra.mxu0 %v4727_v2  ;;  %1492 = vmatprep.subr.mxu1 %v4902_v34 }
 0x56c   :  { %1392 = vmatprep.subr.mxu0 %v4734_v4  ;;  %1493 = vmatpush1.msra.mxu1 %v4919_v51 }
 0x56d   :  { %1393 = vmatpush1.msra.mxu0 %v4740_v5  ;;  %1494 = vmatprep.subr.mxu1 %v4931_v37 }
 0x56e   :  { %1394 = vmatprep.subr.mxu0 %v4746_v7  ;;  %1495 = vmatpush1.msra.mxu1 %v4943_v40 }
 0x56f   :  { %1395 = vmatpush1.msra.mxu0 %v4753_v8  ;;  %1496 = vmatprep.subr.mxu1 %v4955_v0 }
 0x570   :  { %1396 = vmatprep.subr.mxu0 %v4764_v14  ;;  %1497 = vmatpush1.msra.mxu1 %v4967_v6 }
 0x571   :  { %1397 = vmatpush1.msra.mxu0 %v4771_v16  ;;  %1498 = vmatprep.subr.mxu1 %v4980_v10 }
 0x572   :  { %1398 = vmatprep.subr.mxu0 %v4781_v21  ;;  %1499 = vmatpush1.msra.mxu1 %v4992_v15 }
 0x573   :  { %1399 = vmatpush1.msra.mxu0 %v4787_v22  ;;  %1500 = vmatprep.subr.mxu1 %v5004_v23 }
 0x574   :  { %3885 = vmatmul.mubr.msk.f32.vlgmr.msra.gmra.mxu0 %vm852_vm1, %v1211_v18  ;;  %1563 = vmatprep.subr.mxu0 %v4891_v31 }
 0x575   :  { %1564 = vmatpush1.msra.mxu0 %v4896_v33  ;;  %1501 = vmatpush1.msra.mxu1 %v5016_v38 }
 0x576   :  { %1565 = vmatprep.subr.mxu0 %v4908_v45  ;;  %1534 = vmatprep.mubr.f32.mxu1 %v6081_v56 }
 0x577   :  { %1566 = vmatpush1.msra.mxu0 %v4913_v50  ;;  %1611 = vmatprep.mubr.f32.mxu0 %v6081_v56 }
 0x578   :  { %1567 = vmatprep.subr.mxu0 %v4925_v32  ;;  %1640 = vmatprep.subr.mxu1 %v4683_v54 }
 0x579   :  { %1568 = vmatpush1.msra.mxu0 %v4937_v27 }
 0x57a   :  { %1569 = vmatprep.subr.mxu0 %v4949_v61 }
 0x57b   :  { %1570 = vmatpush1.msra.mxu0 %v4961_v42 }
 0x57c   :  { %1571 = vmatprep.subr.mxu0 %v4973_v9 }
 0x57d   :  { %1572 = vmatpush1.msra.mxu0 %v4985_v48 }
 0x57e   :  { %1573 = vmatprep.subr.mxu0 %v4997_v19 }
 0x57f   :  { %1574 = vmatpush1.msra.mxu0 %v5009_v25 }
 0x580   :  { %1575 = vmatprep.subr.mxu0 %v5021_v58 }
 0x581   :  { %1576 = vmatpush1.msra.mxu0 %v5028_v43 }
 0x582   :  { %1577 = vmatprep.subr.mxu0 %v5035_v53 }
 0x583   :  { %1578 = vmatpush1.msra.mxu0 %v5042_v24 }
 0x584   :  { %1742 = vmatprep.subr.mxu0 %v6084_v39 }
 0x624   :  { %v5179_v41 = vpop.f32.mrf.mxu0 }
 0x625   :  { %6087 = vst [vmem:[#allocation33_spill] sm:$0xff] %v5179_v41 }
 0x626   :  { %v5181_v30 = vpop.f32.mrf.mxu0 }
 0x627   :  { %6088 = vst [vmem:[#allocation34_spill] sm:$0xff] %v5181_v30 }
 0x634   :  { %v1434_v35 = vpop.f32.mrf.mxu0 }
 0x635   :  { %v1439_v52 = vadd.f32 %v1434_v35, %v6089_v13 }
 0x636   :  { %v1436_v12 = vpop.f32.mrf.mxu0 }
 0x637   :  { %v3886_v28 = vmul.f32 -1.442695, %v1439_v52  ;;  %v1440_v17 = vadd.f32 %v1436_v12, %v6090_v36 }
 0x639   :  { %4154 = vpow2.f32 %v3886_v28  ;;  %v3887_v26 = vmul.f32 -1.442695, %v1440_v17 }
 0x63a   :  { %4156 = vtanh.f32 %v1440_v17 }
 0x646   :  { %v4155_v3 = vpop.eup %4154 }
 0x647   :  { %v1444_v46 = vadd.f32 1.0, %v4155_v3  ;;  %v4157_v18 = vpop.eup %4156 }
 0x649   :  { %4158 = vrcp.f32 %v1444_v46 }
 0x64a   :  { %4160 = vpow2.f32 %v3887_v26 }
 0x656   :  { %v4159_v20 = vpop.eup %4158 }
 0x657   :  { %v1455_v39 = vmul.f32 %v4159_v20, %v4157_v18  ;;  %v4161_v30 = vpop.eup %4160  ;;  %v1454_v35 = vmul.f32 %v4159_v20, %v5117_v55  ;;  %v6094_v20 = vld [vmem:[#allocation19_spill] sm:$0xff] }
 0x658   :  { %v1451_v41 = vadd.f32 1.0, %v4161_v30 }
 0x659   :  { %1457 = vrot.lane.b32.xlu1 %v1455_v39, %s4487_s13 }
 0x65a   :  { %4162 = vrcp.f32 %v1451_v41 }
 0x667   :  { %v4163_v28 = vpop.eup %4162 }
 0x6cb   :  { %v1458_v13 = vpop.permute.xlu1 %1457 }
 0x6cc   :  { %v5187_v52 = vadd.f32 %v1458_v13, %v1454_v35 }
 0x6ce   :  { %4164 = vtanh.f32 %v5187_v52 }
 0x6db   :  { %v4165_v12 = vpop.eup %4164 }
 0x6dc   :  { %v1462_v36 = vmul.f32 %v4165_v12, %v4163_v28 }
 0x6de   :  { %1466 = vrot.lane.b32.xlu0 %v1462_v36, %s4487_s13 }
 0x750   :  { %v1467_v3 = vpop.permute.xlu0 %1466 }
 0x751   :  { %3888 = vmatmul.mubr.msk.f32.vlgmr.msra.gmra.mxu1 %vm852_vm1, %v1467_v3  ;;  %3889 = vmatmul.mubr.msk.f32.vlgmr.msra.gmra.mxu0 %vm852_vm1, %v1467_v3 }
 0x752   :  { %1641 = vmatpush1.msra.mxu1 %v4690_v57  ;;  %1688 = vmatprep.mubr.f32.mxu1 %v6081_v56  ;;  %v5245_v57 = vpop.f32.mrf.mxu1 }
 0x753   :  { %1642 = vmatprep.subr.mxu1 %v4695_v59  ;;  %1743 = vmatpush1.msra.mxu0 %v4863_v44 }
 0x754   :  { %1643 = vmatpush1.msra.mxu1 %v4701_v60  ;;  %1744 = vmatprep.subr.mxu0 %v4868_v47  ;;  %v5247_v59 = vpop.f32.mrf.mxu1 }
 0x755   :  { %1644 = vmatprep.subr.mxu1 %v4708_v62  ;;  %1745 = vmatpush1.msra.mxu0 %v4874_v49  ;;  %6092 = vst [vmem:[#allocation16_spill] sm:$0xff] %v5247_v59 }
 0x756   :  { %1645 = vmatpush1.msra.mxu1 %v4714_v63  ;;  %1746 = vmatprep.subr.mxu0 %v4880_v11 }
 0x757   :  { %1646 = vmatprep.subr.mxu1 %v4720_v1  ;;  %1747 = vmatpush1.msra.mxu0 %v4886_v29  ;;  %v6093_v1 = vld [vmem:[#allocation18_spill] sm:$0xff] }
 0x758   :  { %1647 = vmatpush1.msra.mxu1 %v4727_v2  ;;  %1748 = vmatprep.subr.mxu0 %v4902_v34 }
 0x759   :  { %1648 = vmatprep.subr.mxu1 %v4734_v4  ;;  %1749 = vmatpush1.msra.mxu0 %v4919_v51 }
 0x75a   :  { %1649 = vmatpush1.msra.mxu1 %v4740_v5  ;;  %1750 = vmatprep.subr.mxu0 %v4931_v37 }
 0x75b   :  { %1650 = vmatprep.subr.mxu1 %v4746_v7  ;;  %1751 = vmatpush1.msra.mxu0 %v4943_v40 }
 0x75c   :  { %1651 = vmatpush1.msra.mxu1 %v4753_v8  ;;  %1752 = vmatprep.subr.mxu0 %v4955_v0 }
 0x75d   :  { %1652 = vmatprep.subr.mxu1 %v4764_v14  ;;  %1753 = vmatpush1.msra.mxu0 %v4967_v6 }
 0x75e   :  { %1653 = vmatpush1.msra.mxu1 %v4771_v16  ;;  %1754 = vmatprep.subr.mxu0 %v4980_v10 }
 0x75f   :  { %1654 = vmatprep.subr.mxu1 %v4781_v21  ;;  %1755 = vmatpush1.msra.mxu0 %v4992_v15 }
 0x760   :  { %1655 = vmatpush1.msra.mxu1 %v4787_v22  ;;  %1756 = vmatprep.subr.mxu0 %v5004_v23 }
 0x761   :  { %3890 = vmatmul.mubr.msk.f32.vlgmr.msra.gmra.mxu1 %vm852_vm1, %v1467_v3  ;;  %1819 = vmatprep.subr.mxu1 %v4891_v31 }
 0x762   :  { %1820 = vmatpush1.msra.mxu1 %v4896_v33  ;;  %1757 = vmatpush1.msra.mxu0 %v5016_v38 }
 0x763   :  { %1821 = vmatprep.subr.mxu1 %v4908_v45  ;;  %1790 = vmatprep.mubr.f32.mxu0 %v6081_v56 }
 0x764   :  { %1822 = vmatpush1.msra.mxu1 %v4913_v50  ;;  %1867 = vmatprep.mubr.f32.mxu1 %v6081_v56 }
 0x765   :  { %1823 = vmatprep.subr.mxu1 %v4925_v32  ;;  %1896 = vmatprep.subr.mxu0 %v4683_v54  ;;  %v6091_v54 = vld [vmem:[#allocation28_spill] sm:$0xff] }
 0x766   :  { %1824 = vmatpush1.msra.mxu1 %v4937_v27 }
 0x767   :  { %1825 = vmatprep.subr.mxu1 %v4949_v61 }
 0x768   :  { %1826 = vmatpush1.msra.mxu1 %v4961_v42 }
 0x769   :  { %1827 = vmatprep.subr.mxu1 %v4973_v9 }
 0x76a   :  { %1828 = vmatpush1.msra.mxu1 %v4985_v48 }
 0x76b   :  { %1829 = vmatprep.subr.mxu1 %v4997_v19 }
 0x76c   :  { %1830 = vmatpush1.msra.mxu1 %v5009_v25 }
 0x76d   :  { %1831 = vmatprep.subr.mxu1 %v5021_v58 }
 0x76e   :  { %1832 = vmatpush1.msra.mxu1 %v5028_v43 }
 0x76f   :  { %1833 = vmatprep.subr.mxu1 %v5035_v53 }
 0x770   :  { %1834 = vmatpush1.msra.mxu1 %v5042_v24 }
 0x771   :  { %1998 = vmatprep.subr.mxu1 %v6091_v54 }
 0x811   :  { %v5249_v60 = vpop.f32.mrf.mxu1 }
 0x813   :  { %v5251_v62 = vpop.f32.mrf.mxu1 }
 0x821   :  { %v1690_v63 = vpop.f32.mrf.mxu1 }
 0x822   :  { %v1695_v2 = vadd.f32 %v1690_v63, %v6093_v1 }
 0x823   :  { %v1692_v39 = vpop.f32.mrf.mxu1 }
 0x824   :  { %v3891_v55 = vmul.f32 -1.442695, %v1695_v2  ;;  %v1696_v26 = vadd.f32 %v1692_v39, %v6094_v20  ;;  %v5273_v39 = vld [vmem:[%s6050_s4 + $0x68] sm:$0xff]  ;;  %v5280_v20 = vld [vmem:[%s6050_s4 + $0x60] sm:$0xff] }
 0x826   :  { %4166 = vpow2.f32 %v3891_v55  ;;  %v3892_v35 = vmul.f32 -1.442695, %v1696_v26 }
 0x827   :  { %4168 = vtanh.f32 %v1696_v26  ;;  %v5287_v26 = vld [vmem:[%s6050_s4 + $0x58] sm:$0xff] }
 0x833   :  { %v4167_v41 = vpop.eup %4166 }
 0x834   :  { %v1700_v30 = vadd.f32 1.0, %v4167_v41  ;;  %v4169_v17 = vpop.eup %4168  ;;  %v5294_v41 = vld [vmem:[%s6050_s4 + $0x50] sm:$0xff] }
 0x836   :  { %4170 = vrcp.f32 %v1700_v30  ;;  %v5301_v30 = vld [vmem:[%s6050_s4 + $0x48] sm:$0xff] }
 0x837   :  { %4172 = vpow2.f32 %v3892_v35  ;;  %v6098_v35 = vld [vmem:[#allocation21_spill] sm:$0xff] }
 0x843   :  { %v4171_v46 = vpop.eup %4170 }
 0x844   :  { %v1711_v18 = vmul.f32 %v4171_v46, %v4169_v17  ;;  %v4173_v13 = vpop.eup %4172  ;;  %v1710_v12 = vmul.f32 %v4171_v46, %v5187_v52  ;;  %v5266_v52 = vld [vmem:[%s6050_s4 + $0x70] sm:$0xff]  ;;  %v5308_v17 = vld [vmem:[%s6050_s4 + $0x40] sm:$0xff] }
 0x845   :  { %v1707_v28 = vadd.f32 1.0, %v4173_v13 }
 0x846   :  { %1713 = vrot.lane.b32.xlu1 %v1711_v18, %s4487_s13 }
 0x847   :  { %4174 = vrcp.f32 %v1707_v28 }
 0x854   :  { %v4175_v63 = vpop.eup %4174 }
 0x8b8   :  { %v1714_v36 = vpop.permute.xlu1 %1713 }
 0x8b9   :  { %v5257_v3 = vadd.f32 %v1714_v36, %v1710_v12 }
 0x8bb   :  { %4176 = vtanh.f32 %v5257_v3 }
 0x8c8   :  { %v4177_v1 = vpop.eup %4176 }
 0x8c9   :  { %v1718_v2 = vmul.f32 %v4177_v1, %v4175_v63 }
 0x8cb   :  { %1722 = vrot.lane.b32.xlu0 %v1718_v2, %s4487_s13 }
 0x93d   :  { %v1723_v55 = vpop.permute.xlu0 %1722 }
 0x93e   :  { %3893 = vmatmul.mubr.msk.f32.vlgmr.msra.gmra.mxu0 %vm852_vm1, %v1723_v55  ;;  %3894 = vmatmul.mubr.msk.f32.vlgmr.msra.gmra.mxu1 %vm852_vm1, %v1723_v55 }
 0x93f   :  { %1897 = vmatpush1.msra.mxu0 %v5266_v52  ;;  %1944 = vmatprep.mubr.f32.mxu0 %v6081_v56 }
 0x940   :  { %1898 = vmatprep.subr.mxu0 %v5273_v39  ;;  %1999 = vmatpush1.msra.mxu1 %v4863_v44 }
 0x941   :  { %1899 = vmatpush1.msra.mxu0 %v5280_v20  ;;  %2000 = vmatprep.subr.mxu1 %v4868_v47 }
 0x942   :  { %1900 = vmatprep.subr.mxu0 %v5287_v26  ;;  %2001 = vmatpush1.msra.mxu1 %v4874_v49 }
 0x943   :  { %1901 = vmatpush1.msra.mxu0 %v5294_v41  ;;  %2002 = vmatprep.subr.mxu1 %v4880_v11 }
 0x944   :  { %1902 = vmatprep.subr.mxu0 %v5301_v30  ;;  %2003 = vmatpush1.msra.mxu1 %v4886_v29 }
 0x945   :  { %1903 = vmatpush1.msra.mxu0 %v5308_v17  ;;  %2004 = vmatprep.subr.mxu1 %v4902_v34 }
 0x946   :  { %1904 = vmatprep.subr.mxu0 %v4734_v4  ;;  %2005 = vmatpush1.msra.mxu1 %v4919_v51  ;;  %v5340_v4 = vld [vmem:[%s6050_s4 + $0x78] sm:$0xff] }
 0x947   :  { %1905 = vmatpush1.msra.mxu0 %v4740_v5  ;;  %2006 = vmatprep.subr.mxu1 %v4931_v37  ;;  %v5355_v5 = vpop.f32.mrf.mxu0 }
 0x948   :  { %1906 = vmatprep.subr.mxu0 %v4746_v7  ;;  %2007 = vmatpush1.msra.mxu1 %v4943_v40 }
 0x949   :  { %1907 = vmatpush1.msra.mxu0 %v4753_v8  ;;  %2008 = vmatprep.subr.mxu1 %v4955_v0  ;;  %v5357_v7 = vpop.f32.mrf.mxu0 }
 0x94a   :  { %1908 = vmatprep.subr.mxu0 %v4764_v14  ;;  %2009 = vmatpush1.msra.mxu1 %v4967_v6  ;;  %6095 = vst [vmem:[#allocation17_spill] sm:$0xff] %v5357_v7 }
 0x94b   :  { %1909 = vmatpush1.msra.mxu0 %v4771_v16  ;;  %2010 = vmatprep.subr.mxu1 %v4980_v10 }
 0x94c   :  { %1910 = vmatprep.subr.mxu0 %v4781_v21  ;;  %2011 = vmatpush1.msra.mxu1 %v4992_v15  ;;  %v6097_v21 = vld [vmem:[#allocation20_spill] sm:$0xff] }
 0x94d   :  { %1911 = vmatpush1.msra.mxu0 %v4787_v22  ;;  %2012 = vmatprep.subr.mxu1 %v5004_v23 }
 0x94e   :  { %3895 = vmatmul.mubr.msk.f32.vlgmr.msra.gmra.mxu0 %vm852_vm1, %v1723_v55  ;;  %2075 = vmatprep.subr.mxu0 %v4891_v31 }
 0x94f   :  { %2076 = vmatpush1.msra.mxu0 %v4896_v33  ;;  %2013 = vmatpush1.msra.mxu1 %v5016_v38 }
 0x950   :  { %2077 = vmatprep.subr.mxu0 %v4908_v45  ;;  %2046 = vmatprep.mubr.f32.mxu1 %v6081_v56 }
 0x951   :  { %2078 = vmatpush1.msra.mxu0 %v4913_v50  ;;  %2123 = vmatprep.mubr.f32.mxu0 %v6081_v56 }
 0x952   :  { %2079 = vmatprep.subr.mxu0 %v4925_v32  ;;  %2152 = vmatprep.subr.mxu1 %v5340_v4 }
 0x953   :  { %2080 = vmatpush1.msra.mxu0 %v4937_v27 }
 0x954   :  { %2081 = vmatprep.subr.mxu0 %v4949_v61 }
 0x955   :  { %2082 = vmatpush1.msra.mxu0 %v4961_v42 }
 0x956   :  { %2083 = vmatprep.subr.mxu0 %v4973_v9 }
 0x957   :  { %2084 = vmatpush1.msra.mxu0 %v4985_v48 }
 0x958   :  { %2085 = vmatprep.subr.mxu0 %v4997_v19 }
 0x959   :  { %2086 = vmatpush1.msra.mxu0 %v5009_v25 }
 0x95a   :  { %2087 = vmatprep.subr.mxu0 %v5021_v58 }
 0x95b   :  { %2088 = vmatpush1.msra.mxu0 %v5028_v43 }
 0x95c   :  { %2089 = vmatprep.subr.mxu0 %v5035_v53 }
 0x95d   :  { %2090 = vmatpush1.msra.mxu0 %v5042_v24 }
 0x95e   :  { %2254 = vmatprep.subr.mxu0 %v6091_v54 }
 0x9fe   :  { %v5359_v8 = vpop.f32.mrf.mxu0 }
 0xa00   :  { %v5361_v14 = vpop.f32.mrf.mxu0 }
 0xa01   :  { %6096 = vst [vmem:[#allocation28_spill] sm:$0xff] %v5361_v14 }
 0xa0e   :  { %v1946_v16 = vpop.f32.mrf.mxu0 }
 0xa0f   :  { %v1951_v22 = vadd.f32 %v1946_v16, %v6097_v21 }
 0xa10   :  { %v1948_v18 = vpop.f32.mrf.mxu0 }
 0xa11   :  { %v3896_v46 = vmul.f32 -1.442695, %v1951_v22  ;;  %v1952_v13 = vadd.f32 %v1948_v18, %v6098_v35 }
 0xa13   :  { %4178 = vpow2.f32 %v3896_v46  ;;  %v3897_v2 = vmul.f32 -1.442695, %v1952_v13 }
 0xa14   :  { %4180 = vtanh.f32 %v1952_v13  ;;  %v6105_v13 = vld [vmem:[#allocation23_spill] sm:$0xff] }
 0xa20   :  { %v4179_v28 = vpop.eup %4178 }
 0xa21   :  { %v1956_v12 = vadd.f32 1.0, %v4179_v28  ;;  %v4181_v36 = vpop.eup %4180 }
 0xa23   :  { %4182 = vrcp.f32 %v1956_v12 }
 0xa24   :  { %4184 = vpow2.f32 %v3897_v2 }
 0xa30   :  { %v4183_v63 = vpop.eup %4182 }
 0xa31   :  { %v1967_v1 = vmul.f32 %v4183_v63, %v4181_v36  ;;  %v4185_v55 = vpop.eup %4184  ;;  %v1966_v16 = vmul.f32 %v4183_v63, %v5257_v3 }
 0xa32   :  { %v1963_v59 = vadd.f32 1.0, %v4185_v55 }
 0xa33   :  { %1969 = vrot.lane.b32.xlu1 %v1967_v1, %s4487_s13 }
 0xa34   :  { %4186 = vrcp.f32 %v1963_v59 }
 0xa41   :  { %v4187_v46 = vpop.eup %4186 }
 0xaa5   :  { %v1970_v21 = vpop.permute.xlu1 %1969 }
 0xaa6   :  { %v5367_v22 = vadd.f32 %v1970_v21, %v1966_v16 }
 0xaa8   :  { %4188 = vtanh.f32 %v5367_v22 }
 0xab5   :  { %v4189_v18 = vpop.eup %4188 }
 0xab6   :  { %v1974_v35 = vmul.f32 %v4189_v18, %v4187_v46 }
 0xab8   :  { %1978 = vrot.lane.b32.xlu0 %v1974_v35, %s4487_s13 }
 0xb2a   :  { %v1979_v28 = vpop.permute.xlu0 %1978 }
 0xb2b   :  { %3898 = vmatmul.mubr.msk.f32.vlgmr.msra.gmra.mxu1 %vm852_vm1, %v1979_v28  ;;  %3899 = vmatmul.mubr.msk.f32.vlgmr.msra.gmra.mxu0 %vm852_vm1, %v1979_v28 }
 0xb2c   :  { %2153 = vmatpush1.msra.mxu1 %v5266_v52  ;;  %2200 = vmatprep.mubr.f32.mxu1 %v6081_v56 }
 0xb2d   :  { %2154 = vmatprep.subr.mxu1 %v5273_v39  ;;  %2255 = vmatpush1.msra.mxu0 %v4863_v44  ;;  %v5390_v44 = vld [vmem:[%s6050_s4 + $0x38] sm:$0xff] }
 0xb2e   :  { %2155 = vmatpush1.msra.mxu1 %v5280_v20  ;;  %2256 = vmatprep.subr.mxu0 %v4868_v47  ;;  %v5397_v47 = vld [vmem:[%s6050_s4 + $0x30] sm:$0xff] }
 0xb2f   :  { %2156 = vmatprep.subr.mxu1 %v5287_v26  ;;  %2257 = vmatpush1.msra.mxu0 %v4874_v49  ;;  %v5404_v49 = vld [vmem:[%s6050_s4 + $0x28] sm:$0xff] }
 0xb30   :  { %2157 = vmatpush1.msra.mxu1 %v5294_v41  ;;  %2258 = vmatprep.subr.mxu0 %v4880_v11  ;;  %v5411_v11 = vld [vmem:[%s6050_s4 + $0x20] sm:$0xff] }
 0xb31   :  { %2158 = vmatprep.subr.mxu1 %v5301_v30  ;;  %2259 = vmatpush1.msra.mxu0 %v4886_v29  ;;  %v5418_v29 = vld [vmem:[%s6050_s4 + $0x18] sm:$0xff] }
 0xb32   :  { %2159 = vmatpush1.msra.mxu1 %v5308_v17  ;;  %2260 = vmatprep.subr.mxu0 %v4902_v34  ;;  %v5425_v34 = vld [vmem:[%s6050_s4 + $0x10] sm:$0xff] }
 0xb33   :  { %2160 = vmatprep.subr.mxu1 %v5390_v44  ;;  %2261 = vmatpush1.msra.mxu0 %v4919_v51  ;;  %v5432_v51 = vld [vmem:[%s6050_s4 + $0x8] sm:$0xff] }
 0xb34   :  { %2161 = vmatpush1.msra.mxu1 %v5397_v47  ;;  %2262 = vmatprep.subr.mxu0 %v4931_v37  ;;  %v5439_v37 = vld [vmem:[%s6050_s4] sm:$0xff] }
 0xb35   :  { %2162 = vmatprep.subr.mxu1 %v5404_v49  ;;  %2263 = vmatpush1.msra.mxu0 %v4943_v40 }
 0xb36   :  { %2163 = vmatpush1.msra.mxu1 %v5411_v11  ;;  %2264 = vmatprep.subr.mxu0 %v4955_v0 }
 0xb37   :  { %2164 = vmatprep.subr.mxu1 %v5418_v29  ;;  %2265 = vmatpush1.msra.mxu0 %v4967_v6 }
 0xb38   :  { %2165 = vmatpush1.msra.mxu1 %v5425_v34  ;;  %2266 = vmatprep.subr.mxu0 %v4980_v10 }
 0xb39   :  { %2166 = vmatprep.subr.mxu1 %v5432_v51  ;;  %2267 = vmatpush1.msra.mxu0 %v4992_v15 }
 0xb3a   :  { %2167 = vmatpush1.msra.mxu1 %v5439_v37  ;;  %2268 = vmatprep.subr.mxu0 %v5004_v23 }
 0xb3b   :  { %3900 = vmatmul.mubr.msk.f32.vlgmr.msra.gmra.mxu1 %vm852_vm1, %v1979_v28  ;;  %2331 = vmatprep.subr.mxu1 %v4891_v31  ;;  %v5465_v31 = vld [vmem:[#allocation11] sm:$0x3] }
 0xb3c   :  { %2332 = vmatpush1.msra.mxu1 %v4896_v33  ;;  %2269 = vmatpush1.msra.mxu0 %v5016_v38  ;;  %v1869_v33 = vpop.f32.mrf.mxu1 }
 0xb3d   :  { %2333 = vmatprep.subr.mxu1 %v4908_v45  ;;  %2302 = vmatprep.mubr.f32.mxu0 %v6081_v56  ;;  %v6099_v45 = vld [vmem:[#allocation15_spill] sm:$0xff] }
 0xb3e   :  { %2334 = vmatpush1.msra.mxu1 %v4913_v50  ;;  %2379 = vmatprep.mubr.f32.mxu1 %v6081_v56  ;;  %v6100_v50 = vsub.s32 0, %v6099_v45 }
 0xb3f   :  { %2335 = vmatprep.subr.mxu1 %v4925_v32  ;;  %2408 = vmatprep.subr.mxu0 %v5340_v4 }
 0xb40   :  { %2336 = vmatpush1.msra.mxu1 %v4937_v27  ;;  %v5470_v32 = vrot.slane %v5465_v31, %v6100_v50  ;;  %v5472_v27 = vpop.f32.mrf.mxu1 }
 0xb41   :  { %2337 = vmatprep.subr.mxu1 %v4949_v61  ;;  %6101 = vst [vmem:[#allocation18_spill] sm:$0xff] %v5472_v27  ;;  %v6108_v27 = vld [vmem:[#allocation25_spill] sm:$0xff] }
 0xb42   :  { %2338 = vmatpush1.msra.mxu1 %v4961_v42 }
 0xb43   :  { %2339 = vmatprep.subr.mxu1 %v4973_v9 }
 0xb44   :  { %2340 = vmatpush1.msra.mxu1 %v4985_v48 }
 0xb45   :  { %2341 = vmatprep.subr.mxu1 %v4997_v19 }
 0xb46   :  { %2342 = vmatpush1.msra.mxu1 %v5009_v25  ;;  %v6104_v25 = vld [vmem:[#allocation22_spill] sm:$0xff] }
 0xb47   :  { %2343 = vmatprep.subr.mxu1 %v5021_v58  ;;  %v1797_v58 = vadd.f32 %v5359_v8, %v5470_v32 }
 0xb48   :  { %2344 = vmatpush1.msra.mxu1 %v5028_v43  ;;  %v1874_v43 = vadd.f32 %v1869_v33, %v5470_v32 }
 0xb49   :  { %2345 = vmatprep.subr.mxu1 %v5035_v53 }
 0xb4a   :  { %2346 = vmatpush1.msra.mxu1 %v5042_v24 }
 0xb4b   :  { %2510 = vmatprep.subr.mxu1 %v6091_v54 }
 0xbeb   :  { %v2048_v40 = vpop.f32.mrf.mxu1  ;;  %v2125_v61 = vpop.f32.mrf.mxu0 }
 0xbec   :  { %v5477_v42 = vadd.f32 %v2048_v40, %v1874_v43  ;;  %v5479_v9 = vadd.f32 %v2125_v61, %v1797_v58  ;;  %v5506_v43 = vld [vmem:[%s6052_s6 + $0x68] sm:$0xff]  ;;  %v5513_v40 = vld [vmem:[%s6052_s6 + $0x60] sm:$0xff]  ;;  %v5520_v61 = vld [vmem:[%s6052_s6 + $0x58] sm:$0xff] }
 0xbed   :  { %v5481_v48 = vpop.f32.mrf.mxu1 }
 0xbee   :  { %6102 = vst [vmem:[#allocation19_spill] sm:$0xff] %v5477_v42  ;;  %6103 = vst [vmem:[#allocation20_spill] sm:$0xff] %v5481_v48 }
 0xbfb   :  { %v2202_v19 = vpop.f32.mrf.mxu1 }
 0xbfc   :  { %v2207_v54 = vadd.f32 %v2202_v19, %v6104_v25  ;;  %v5527_v19 = vld [vmem:[%s6052_s6 + $0x50] sm:$0xff]  ;;  %v5534_v25 = vld [vmem:[%s6052_s6 + $0x48] sm:$0xff] }
 0xbfd   :  { %v2204_v3 = vpop.f32.mrf.mxu1 }
 0xbfe   :  { %v3901_v59 = vmul.f32 -1.442695, %v2207_v54  ;;  %v2208_v12 = vadd.f32 %v2204_v3, %v6105_v13  ;;  %v5541_v54 = vld [vmem:[%s6052_s6 + $0x40] sm:$0xff]  ;;  %v5555_v3 = vld [vmem:[%s6052_s6 + $0x30] sm:$0xff]  ;;  %v5612_v13 = vld [vmem:[%s6053_s7 + $0x48] sm:$0xff] }
 0xc00   :  { %4190 = vpow2.f32 %v3901_v59  ;;  %v3902_v55 = vmul.f32 -1.442695, %v2208_v12  ;;  %v5548_v59 = vld [vmem:[%s6052_s6 + $0x38] sm:$0xff] }
 0xc01   :  { %4192 = vtanh.f32 %v2208_v12  ;;  %v5618_v12 = vld [vmem:[%s6053_s7 + $0x40] sm:$0xff] }
 0xc0d   :  { %v4191_v36 = vpop.eup %4190 }
 0xc0e   :  { %v2212_v8 = vadd.f32 1.0, %v4191_v36  ;;  %v4193_v63 = vpop.eup %4192  ;;  %v5630_v36 = vld [vmem:[%s6053_s7 + $0x30] sm:$0xff] }
 0xc10   :  { %4194 = vrcp.f32 %v2212_v8  ;;  %v5636_v8 = vld [vmem:[%s6053_s7 + $0x28] sm:$0xff] }
 0xc11   :  { %4196 = vpow2.f32 %v3902_v55  ;;  %v4361_v55 = vld [vmem:[%s6052_s6 + $0x78] sm:$0xff] }
 0xc1d   :  { %v4195_v1 = vpop.eup %4194 }
 0xc1e   :  { %v2223_v2 = vmul.f32 %v4195_v1, %v4193_v63  ;;  %v4197_v16 = vpop.eup %4196  ;;  %v2222_v46 = vmul.f32 %v4195_v1, %v5367_v22  ;;  %v5499_v22 = vld [vmem:[%s6052_s6 + $0x70] sm:$0xff]  ;;  %v5642_v63 = vld [vmem:[%s6053_s7 + $0x20] sm:$0xff]  ;;  %v5648_v1 = vld [vmem:[%s6053_s7 + $0x18] sm:$0xff] }
 0xc1f   :  { %v2219_v21 = vadd.f32 1.0, %v4197_v16  ;;  %v5662_v16 = vpop.f32.mrf.mxu0 }
 0xc20   :  { %2225 = vrot.lane.b32.xlu1 %v2223_v2, %s4487_s13  ;;  %v5654_v2 = vld [vmem:[%s6053_s7 + $0x10] sm:$0xff]  ;;  %6106 = vst [vmem:[#allocation21_spill] sm:$0xff] %v5662_v16 }
 0xc21   :  { %4198 = vrcp.f32 %v2219_v21  ;;  %v1541_v21 = vadd.f32 %v5249_v60, %v5470_v32 }
 0xc2e   :  { %v4199_v28 = vpop.eup %4198 }
 0xc92   :  { %v2226_v18 = vpop.permute.xlu1 %2225 }
 0xc93   :  { %v5487_v35 = vadd.f32 %v2226_v18, %v2222_v46  ;;  %v1618_v46 = vadd.f32 %v5355_v5, %v5470_v32 }
 0xc95   :  { %4200 = vtanh.f32 %v5487_v35 }
 0xca2   :  { %v4201_v33 = vpop.eup %4200 }
 0xca3   :  { %v2230_v50 = vmul.f32 %v4201_v33, %v4199_v28 }
 0xca5   :  { %2234 = vrot.lane.b32.xlu0 %v2230_v50, %s4487_s13 }
 0xd17   :  { %v2235_v58 = vpop.permute.xlu0 %2234 }
 0xd18   :  { %3903 = vmatmul.mubr.msk.f32.vlgmr.msra.gmra.mxu0 %vm852_vm1, %v2235_v58  ;;  %3904 = vmatmul.mubr.msk.f32.vlgmr.msra.gmra.mxu1 %vm852_vm1, %v2235_v58 }
 0xd19   :  { %2409 = vmatpush1.msra.mxu0 %v5266_v52  ;;  %2456 = vmatprep.mubr.f32.mxu0 %v6081_v56 }
 0xd1a   :  { %2410 = vmatprep.subr.mxu0 %v5273_v39  ;;  %2511 = vmatpush1.msra.mxu1 %v5499_v22 }
 0xd1b   :  { %2411 = vmatpush1.msra.mxu0 %v5280_v20  ;;  %2512 = vmatprep.subr.mxu1 %v5506_v43 }
 0xd1c   :  { %2412 = vmatprep.subr.mxu0 %v5287_v26  ;;  %2513 = vmatpush1.msra.mxu1 %v5513_v40 }
 0xd1d   :  { %2413 = vmatpush1.msra.mxu0 %v5294_v41  ;;  %2514 = vmatprep.subr.mxu1 %v5520_v61 }
 0xd1e   :  { %2414 = vmatprep.subr.mxu0 %v5301_v30  ;;  %2515 = vmatpush1.msra.mxu1 %v5527_v19 }
 0xd1f   :  { %2415 = vmatpush1.msra.mxu0 %v5308_v17  ;;  %2516 = vmatprep.subr.mxu1 %v5534_v25 }
 0xd20   :  { %2416 = vmatprep.subr.mxu0 %v5390_v44  ;;  %2517 = vmatpush1.msra.mxu1 %v5541_v54 }
 0xd21   :  { %2417 = vmatpush1.msra.mxu0 %v5397_v47  ;;  %2518 = vmatprep.subr.mxu1 %v5548_v59 }
 0xd22   :  { %2418 = vmatprep.subr.mxu0 %v5404_v49  ;;  %2519 = vmatpush1.msra.mxu1 %v5555_v3 }
 0xd23   :  { %2419 = vmatpush1.msra.mxu0 %v5411_v11  ;;  %2520 = vmatprep.subr.mxu1 %v4955_v0  ;;  %v5572_v0 = vld [vmem:[%s6053_s7 + $0x78] sm:$0xff] }
 0xd24   :  { %2420 = vmatprep.subr.mxu0 %v5418_v29  ;;  %2521 = vmatpush1.msra.mxu1 %v4967_v6  ;;  %v5578_v6 = vld [vmem:[%s6053_s7 + $0x70] sm:$0xff] }
 0xd25   :  { %2421 = vmatpush1.msra.mxu0 %v5425_v34  ;;  %2522 = vmatprep.subr.mxu1 %v4980_v10  ;;  %v5585_v10 = vld [vmem:[%s6053_s7 + $0x68] sm:$0xff] }
 0xd26   :  { %2422 = vmatprep.subr.mxu0 %v5432_v51  ;;  %2523 = vmatpush1.msra.mxu1 %v4992_v15  ;;  %v5592_v15 = vld [vmem:[%s6053_s7 + $0x60] sm:$0xff] }
 0xd27   :  { %2423 = vmatpush1.msra.mxu0 %v5439_v37  ;;  %2524 = vmatprep.subr.mxu1 %v5004_v23  ;;  %v5599_v23 = vld [vmem:[%s6053_s7 + $0x58] sm:$0xff] }
 0xd28   :  { %3905 = vmatmul.mubr.msk.f32.vlgmr.msra.gmra.mxu0 %vm852_vm1, %v2235_v58  ;;  %2587 = vmatprep.subr.mxu0 %v5572_v0  ;;  %v6107_v58 = vld [vmem:[#allocation24_spill] sm:$0xff] }
 0xd29   :  { %2588 = vmatpush1.msra.mxu0 %v5578_v6  ;;  %2525 = vmatpush1.msra.mxu1 %v5016_v38  ;;  %v5606_v38 = vld [vmem:[%s6053_s7 + $0x50] sm:$0xff] }
 0xd2a   :  { %2589 = vmatprep.subr.mxu0 %v5585_v10  ;;  %2558 = vmatprep.mubr.f32.mxu1 %v6081_v56 }
 0xd2b   :  { %2590 = vmatpush1.msra.mxu0 %v5592_v15  ;;  %2635 = vmatprep.mubr.f32.mxu0 %v6081_v56 }
 0xd2c   :  { %2591 = vmatprep.subr.mxu0 %v5599_v23  ;;  %2664 = vmatprep.subr.mxu1 %v5340_v4  ;;  %v5624_v4 = vld [vmem:[%s6053_s7 + $0x38] sm:$0xff] }
 0xd2d   :  { %2592 = vmatpush1.msra.mxu0 %v5606_v38 }
 0xd2e   :  { %2593 = vmatprep.subr.mxu0 %v5612_v13 }
 0xd2f   :  { %2594 = vmatpush1.msra.mxu0 %v5618_v12 }
 0xd30   :  { %2595 = vmatprep.subr.mxu0 %v5624_v4 }
 0xd31   :  { %2596 = vmatpush1.msra.mxu0 %v5630_v36 }
 0xd32   :  { %2597 = vmatprep.subr.mxu0 %v5636_v8 }
 0xd33   :  { %2598 = vmatpush1.msra.mxu0 %v5642_v63 }
 0xd34   :  { %2599 = vmatprep.subr.mxu0 %v5648_v1 }
 0xd35   :  { %2600 = vmatpush1.msra.mxu0 %v5654_v2 }
 0xd36   :  { %2601 = vmatprep.subr.mxu0 %v5035_v53 }
 0xd37   :  { %2602 = vmatpush1.msra.mxu0 %v5042_v24 }
 0xd38   :  { %2766 = vmatprep.subr.mxu0 %v4361_v55 }
 0xdd8   :  { %v2304_v18 = vpop.f32.mrf.mxu0  ;;  %v2381_v28 = vpop.f32.mrf.mxu1 }
 0xdd9   :  { %v5668_v33 = vadd.f32 %v2304_v18, %v1618_v46  ;;  %v5670_v53 = vadd.f32 %v2381_v28, %v1541_v21 }
 0xdda   :  { %v5672_v24 = vpop.f32.mrf.mxu0 }
 0xde8   :  { %v2458_v50 = vpop.f32.mrf.mxu0 }
 0xde9   :  { %v2463_v7 = vadd.f32 %v2458_v50, %v6107_v58 }
 0xdea   :  { %v2460_v48 = vpop.f32.mrf.mxu0 }
 0xdeb   :  { %v3906_v55 = vmul.f32 -1.442695, %v2463_v7  ;;  %v2464_v42 = vadd.f32 %v2460_v48, %v6108_v27 }
 0xded   :  { %4202 = vpow2.f32 %v3906_v55  ;;  %v3907_v21 = vmul.f32 -1.442695, %v2464_v42 }
 0xdee   :  { %4204 = vtanh.f32 %v2464_v42 }
 0xdfa   :  { %v4203_v60 = vpop.eup %4202 }
 0xdfb   :  { %v2468_v16 = vadd.f32 1.0, %v4203_v60  ;;  %v4205_v5 = vpop.eup %4204  ;;  %v5777_v60 = vld [vmem:[#allocation9 + $0x60] sm:$0xff] }
 0xdfd   :  { %4206 = vrcp.f32 %v2468_v16 }
 0xdfe   :  { %4208 = vpow2.f32 %v3907_v21  ;;  %v5788_v21 = vld [vmem:[#allocation9 + $0x48] sm:$0xff] }
 0xe0a   :  { %v4207_v14 = vpop.eup %4206 }
 0xe0b   :  { %v2479_v46 = vmul.f32 %v4207_v14, %v4205_v5  ;;  %v4209_v18 = vpop.eup %4208  ;;  %v2478_v50 = vmul.f32 %v4207_v14, %v5487_v35  ;;  %v4369_v14 = vld [vmem:[%s6053_s7] sm:$0xff] }
 0xe0c   :  { %v2475_v28 = vadd.f32 1.0, %v4209_v18  ;;  %v5780_v5 = vld [vmem:[#allocation9 + $0x58] sm:$0xff]  ;;  %v5792_v18 = vld [vmem:[#allocation9 + $0x40] sm:$0xff] }
 0xe0d   :  { %2481 = vrot.lane.b32.xlu1 %v2479_v46, %s4487_s13  ;;  %v5784_v46 = vld [vmem:[#allocation9 + $0x50] sm:$0xff] }
 0xe0e   :  { %4210 = vrcp.f32 %v2475_v28  ;;  %v5796_v28 = vld [vmem:[#allocation9 + $0x38] sm:$0xff] }
 0xe1b   :  { %v4211_v27 = vpop.eup %4210 }
 0xe7f   :  { %v2482_v7 = vpop.permute.xlu1 %2481 }
 0xe80   :  { %v5678_v58 = vadd.f32 %v2482_v7, %v2478_v50  ;;  %v5800_v50 = vld [vmem:[#allocation9 + $0x30] sm:$0xff]  ;;  %v5804_v7 = vld [vmem:[#allocation9 + $0x28] sm:$0xff] }
 0xe82   :  { %4212 = vtanh.f32 %v5678_v58 }
 0xe8f   :  { %v4213_v48 = vpop.eup %4212 }
 0xe90   :  { %v2486_v16 = vmul.f32 %v4213_v48, %v4211_v27  ;;  %v5812_v27 = vld [vmem:[#allocation9 + $0x18] sm:$0xff]  ;;  %v5816_v48 = vld [vmem:[#allocation9 + $0x10] sm:$0xff] }
 0xe92   :  { %2490 = vrot.lane.b32.xlu0 %v2486_v16, %s4487_s13  ;;  %v5820_v16 = vld [vmem:[#allocation9 + $0x8] sm:$0xff] }
 0xf04   :  { %v2491_v55 = vpop.permute.xlu0 %2490 }
 0xf05   :  { %3908 = vmatmul.mubr.msk.f32.vlgmr.msra.gmra.mxu1 %vm852_vm1, %v2491_v55  ;;  %3909 = vmatmul.mubr.msk.f32.vlgmr.msra.gmra.mxu0 %vm852_vm1, %v2491_v55 }
 0xf06   :  { %2665 = vmatpush1.msra.mxu1 %v5266_v52  ;;  %2712 = vmatprep.mubr.f32.mxu1 %v6081_v56  ;;  %v4362_v52 = vld [vmem:[%s6052_s6 + $0x28] sm:$0xff] }
 0xf07   :  { %2666 = vmatprep.subr.mxu1 %v5273_v39  ;;  %2767 = vmatpush1.msra.mxu0 %v5499_v22  ;;  %v4363_v39 = vld [vmem:[%s6052_s6 + $0x20] sm:$0xff] }
 0xf08   :  { %2667 = vmatpush1.msra.mxu1 %v5280_v20  ;;  %2768 = vmatprep.subr.mxu0 %v5506_v43  ;;  %v4364_v20 = vld [vmem:[%s6052_s6 + $0x18] sm:$0xff] }
 0xf09   :  { %2668 = vmatprep.subr.mxu1 %v5287_v26  ;;  %2769 = vmatpush1.msra.mxu0 %v5513_v40  ;;  %v4365_v26 = vld [vmem:[%s6052_s6 + $0x10] sm:$0xff]  ;;  %v6110_v22 = vld [vmem:[#allocation26_spill] sm:$0xff] }
 0xf0a   :  { %2669 = vmatpush1.msra.mxu1 %v5294_v41  ;;  %2770 = vmatprep.subr.mxu0 %v5520_v61  ;;  %v4366_v41 = vld [vmem:[%s6052_s6 + $0x8] sm:$0xff] }
 0xf0b   :  { %2670 = vmatprep.subr.mxu1 %v5301_v30  ;;  %2771 = vmatpush1.msra.mxu0 %v5527_v19  ;;  %v4367_v30 = vld [vmem:[%s6052_s6] sm:$0xff] }
 0xf0c   :  { %2671 = vmatpush1.msra.mxu1 %v5308_v17  ;;  %2772 = vmatprep.subr.mxu0 %v5534_v25  ;;  %v4368_v17 = vld [vmem:[%s6053_s7 + $0x8] sm:$0xff] }
 0xf0d   :  { %2672 = vmatprep.subr.mxu1 %v5390_v44  ;;  %2773 = vmatpush1.msra.mxu0 %v5541_v54  ;;  %v5750_v44 = vpop.f32.mrf.mxu1  ;;  %v6111_v19 = vld [vmem:[#allocation27_spill] sm:$0xff] }
 0xf0e   :  { %2673 = vmatpush1.msra.mxu1 %v5397_v47  ;;  %2774 = vmatprep.subr.mxu0 %v5548_v59  ;;  %v6109_v47 = vld [vmem:[#allocation33_spill] sm:$0xff] }
 0xf0f   :  { %2674 = vmatprep.subr.mxu1 %v5404_v49  ;;  %2775 = vmatpush1.msra.mxu0 %v5555_v3  ;;  %v1285_v49 = vadd.f32 %v6109_v47, %v5470_v32 }
 0xf10   :  { %2675 = vmatpush1.msra.mxu1 %v5411_v11  ;;  %2776 = vmatprep.subr.mxu0 %v4362_v52  ;;  %v1362_v11 = vadd.f32 %v5245_v57, %v5470_v32 }
 0xf11   :  { %2676 = vmatprep.subr.mxu1 %v5418_v29  ;;  %2777 = vmatpush1.msra.mxu0 %v4363_v39  ;;  %v6112_v39 = vld [vmem:[#allocation31_spill] sm:$0xff] }
 0xf12   :  { %2677 = vmatpush1.msra.mxu1 %v5425_v34  ;;  %2778 = vmatprep.subr.mxu0 %v4364_v20  ;;  %v1106_v20 = vadd.f32 %v6112_v39, %v5470_v32 }
 0xf13   :  { %2678 = vmatprep.subr.mxu1 %v5432_v51  ;;  %2779 = vmatpush1.msra.mxu0 %v4365_v26 }
 0xf14   :  { %2679 = vmatpush1.msra.mxu1 %v5439_v37  ;;  %2780 = vmatprep.subr.mxu0 %v4366_v41 }
 0xf15   :  { %3910 = vmatmul.mubr.msk.f32.vlgmr.msra.gmra.mxu1 %vm852_vm1, %v2491_v55  ;;  %2843 = vmatprep.subr.mxu1 %v5572_v0  ;;  %v5824_v55 = vld [vmem:[#allocation9] sm:$0xff] }
 0xf16   :  { %2844 = vmatpush1.msra.mxu1 %v5578_v6  ;;  %2781 = vmatpush1.msra.mxu0 %v4367_v30  ;;  %v5765_v6 = vld [vmem:[#allocation9 + $0x78] sm:$0xff] }
 0xf17   :  { %2845 = vmatprep.subr.mxu1 %v5585_v10  ;;  %2814 = vmatprep.mubr.f32.mxu0 %v6081_v56 }
 0xf18   :  { %2846 = vmatpush1.msra.mxu1 %v5592_v15  ;;  %2891 = vmatprep.mubr.f32.mxu1 %v6081_v56 }
 0xf19   :  { %2847 = vmatprep.subr.mxu1 %v5599_v23  ;;  %2936 = vmatprep.subr.mxu0 %v5765_v6 }
 0xf1a   :  { %2848 = vmatpush1.msra.mxu1 %v5606_v38 }
 0xf1b   :  { %2849 = vmatprep.subr.mxu1 %v5612_v13 }
 0xf1c   :  { %2850 = vmatpush1.msra.mxu1 %v5618_v12 }
 0xf1d   :  { %2851 = vmatprep.subr.mxu1 %v5624_v4 }
 0xf1e   :  { %2852 = vmatpush1.msra.mxu1 %v5630_v36 }
 0xf1f   :  { %2853 = vmatprep.subr.mxu1 %v5636_v8 }
 0xf20   :  { %2854 = vmatpush1.msra.mxu1 %v5642_v63  ;;  %v5771_v63 = vld [vmem:[#allocation9 + $0x70] sm:$0xff] }
 0xf21   :  { %2855 = vmatprep.subr.mxu1 %v5648_v1 }
 0xf22   :  { %2856 = vmatpush1.msra.mxu1 %v5654_v2  ;;  %v5773_v2 = vld [vmem:[#allocation9 + $0x68] sm:$0xff] }
 0xf23   :  { %2857 = vmatprep.subr.mxu1 %v4368_v17  ;;  %v6113_v17 = vld [vmem:[#allocation29_spill] sm:$0xff] }
 0xf24   :  { %2858 = vmatpush1.msra.mxu1 %v4369_v14  ;;  %v1029_v14 = vadd.f32 %v6113_v17, %v5470_v32 }
 0xf25   :  { %3038 = vmatprep.subr.mxu1 %v5765_v6 }
 0xfc5   :  { %v2560_v29 = vpop.f32.mrf.mxu1  ;;  %v2637_v34 = vpop.f32.mrf.mxu0 }
 0xfc6   :  { %v5756_v51 = vadd.f32 %v2560_v29, %v1362_v11  ;;  %v5758_v37 = vadd.f32 %v2637_v34, %v1285_v49 }
 0xfc7   :  { %v5760_v42 = vpop.f32.mrf.mxu1  ;;  %v5855_v52 = vpop.f32.mrf.mxu0 }
 0xfd5   :  { %v2714_v35 = vpop.f32.mrf.mxu1 }
 0xfd6   :  { %v2719_v43 = vadd.f32 %v2714_v35, %v6110_v22  ;;  %v6114_v35 = vsub.s32 1, %v6099_v45 }
 0xfd7   :  { %v2716_v61 = vpop.f32.mrf.mxu1 }
 0xfd8   :  { %v3911_v40 = vmul.f32 -1.442695, %v2719_v43  ;;  %v2720_v25 = vadd.f32 %v2716_v61, %v6111_v19  ;;  %v5868_v22 = vrot.slane %v5465_v31, %v6114_v35 }
 0xfda   :  { %4214 = vpow2.f32 %v3911_v40  ;;  %v3912_v10 = vmul.f32 -1.442695, %v2720_v25  ;;  %v6115_v40 = vld [vmem:[#allocation30_spill] sm:$0xff] }
 0xfdb   :  { %4216 = vtanh.f32 %v2720_v25  ;;  %v1030_v61 = vadd.f32 %v6115_v40, %v5868_v22 }
 0xfe7   :  { %v4215_v54 = vpop.eup %4214 }
 0xfe8   :  { %v2724_v59 = vadd.f32 1.0, %v4215_v54  ;;  %v4217_v57 = vpop.eup %4216 }
 0xfea   :  { %4218 = vrcp.f32 %v2724_v59 }
 0xfeb   :  { %4220 = vpow2.f32 %v3912_v10 }
 0xff7   :  { %v4219_v3 = vpop.eup %4218 }
 0xff8   :  { %v2735_v0 = vmul.f32 %v4219_v3, %v4217_v57  ;;  %v4221_v15 = vpop.eup %4220  ;;  %v2734_v38 = vmul.f32 %v4219_v3, %v5678_v58  ;;  %v5808_v58 = vld [vmem:[#allocation9 + $0x20] sm:$0xff] }
 0xff9   :  { %v2731_v23 = vadd.f32 1.0, %v4221_v15 }
 0xffa   :  { %2737 = vrot.lane.b32.xlu1 %v2735_v0, %s4487_s13 }
 0xffb   :  { %4222 = vrcp.f32 %v2731_v23 }
0x1008   :  { %v4223_v4 = vpop.eup %4222 }
0x106c   :  { %v2738_v13 = vpop.permute.xlu1 %2737 }
0x106d   :  { %v2740_v12 = vadd.f32 %v2738_v13, %v2734_v38 }
0x106f   :  { %4224 = vtanh.f32 %v2740_v12 }
0x107c   :  { %v4225_v36 = vpop.eup %4224 }
0x107d   :  { %v2742_v8 = vmul.f32 %v4225_v36, %v4223_v4 }
0x107f   :  { %2746 = vrot.lane.b32.xlu0 %v2742_v8, %s4487_s13 }
0x10f1   :  { %v2747_v1 = vpop.permute.xlu0 %2746 }
0x10f2   :  { %3913 = vmatmul.mubr.msk.f32.vlgmr.msra.gmra.mxu0 %vm852_vm1, %v2747_v1  ;;  %3914 = vmatmul.mubr.msk.f32.vlgmr.msra.gmra.mxu1 %vm852_vm1, %v2747_v1 }
0x10f3   :  { %2937 = vmatpush1.msra.mxu0 %v5771_v63  ;;  %2984 = vmatprep.mubr.f32.mxu0 %v6081_v56 }
0x10f4   :  { %2938 = vmatprep.subr.mxu0 %v5773_v2  ;;  %3039 = vmatpush1.msra.mxu1 %v5771_v63 }
0x10f5   :  { %2939 = vmatpush1.msra.mxu0 %v5777_v60  ;;  %3040 = vmatprep.subr.mxu1 %v5773_v2 }
0x10f6   :  { %2940 = vmatprep.subr.mxu0 %v5780_v5  ;;  %3041 = vmatpush1.msra.mxu1 %v5777_v60 }
0x10f7   :  { %2941 = vmatpush1.msra.mxu0 %v5784_v46  ;;  %3042 = vmatprep.subr.mxu1 %v5780_v5 }
0x10f8   :  { %2942 = vmatprep.subr.mxu0 %v5788_v21  ;;  %3043 = vmatpush1.msra.mxu1 %v5784_v46 }
0x10f9   :  { %2943 = vmatpush1.msra.mxu0 %v5792_v18  ;;  %3044 = vmatprep.subr.mxu1 %v5788_v21 }
0x10fa   :  { %2944 = vmatprep.subr.mxu0 %v5796_v28  ;;  %3045 = vmatpush1.msra.mxu1 %v5792_v18 }
0x10fb   :  { %2945 = vmatpush1.msra.mxu0 %v5800_v50  ;;  %3046 = vmatprep.subr.mxu1 %v5796_v28 }
0x10fc   :  { %2946 = vmatprep.subr.mxu0 %v5804_v7  ;;  %3047 = vmatpush1.msra.mxu1 %v5800_v50 }
0x10fd   :  { %2947 = vmatpush1.msra.mxu0 %v5808_v58  ;;  %3048 = vmatprep.subr.mxu1 %v5804_v7 }
0x10fe   :  { %2948 = vmatprep.subr.mxu0 %v5812_v27  ;;  %3049 = vmatpush1.msra.mxu1 %v5808_v58 }
0x10ff   :  { %2949 = vmatpush1.msra.mxu0 %v5816_v48  ;;  %3050 = vmatprep.subr.mxu1 %v5812_v27 }
0x1100   :  { %2950 = vmatprep.subr.mxu0 %v5820_v16  ;;  %3051 = vmatpush1.msra.mxu1 %v5816_v48 }
0x1101   :  { %2951 = vmatpush1.msra.mxu0 %v5824_v55  ;;  %3052 = vmatprep.subr.mxu1 %v5820_v16 }
0x1102   :  { %2985 = vmatmul.mubr.f32.vlgmr.msra.gmra.mxu0 %v6081_v56  ;;  %3053 = vmatpush1.msra.mxu1 %v5824_v55 }
0x1103   :  { %3086 = vmatprep.mubr.f32.mxu1 %v6081_v56  ;;  %3140 = vmatprep.subr.mxu0 %v5765_v6 }
0x1104   :  { %3141 = vmatpush1.msra.mxu0 %v5771_v63  ;;  %3188 = vmatprep.mubr.f32.mxu0 %v6081_v56 }
0x1105   :  { %3142 = vmatprep.subr.mxu0 %v5773_v2  ;;  %3242 = vmatprep.subr.mxu1 %v5765_v6 }
0x1106   :  { %3143 = vmatpush1.msra.mxu0 %v5777_v60 }
0x1107   :  { %3144 = vmatprep.subr.mxu0 %v5780_v5 }
0x1108   :  { %3145 = vmatpush1.msra.mxu0 %v5784_v46 }
0x1109   :  { %3146 = vmatprep.subr.mxu0 %v5788_v21 }
0x110a   :  { %3147 = vmatpush1.msra.mxu0 %v5792_v18 }
0x110b   :  { %3148 = vmatprep.subr.mxu0 %v5796_v28 }
0x110c   :  { %3149 = vmatpush1.msra.mxu0 %v5800_v50 }
0x110d   :  { %3150 = vmatprep.subr.mxu0 %v5804_v7 }
0x110e   :  { %3151 = vmatpush1.msra.mxu0 %v5808_v58 }
0x110f   :  { %3152 = vmatprep.subr.mxu0 %v5812_v27 }
0x1110   :  { %3153 = vmatpush1.msra.mxu0 %v5816_v48 }
0x1111   :  { %3154 = vmatprep.subr.mxu0 %v5820_v16 }
0x1112   :  { %3155 = vmatpush1.msra.mxu0 %v5824_v55 }
0x1113   :  { %3344 = vmatprep.subr.mxu0 %v5765_v6 }
0x11b2   :  { %v2816_v26 = vpop.f32.mrf.mxu0  ;;  %v2893_v30 = vpop.f32.mrf.mxu1 }
0x11b3   :  { %v5859_v41 = vadd.f32 %v2816_v26, %v1106_v20  ;;  %v2898_v49 = vadd.f32 %v2893_v30, %v1029_v14  ;;  %v6116_v20 = vld [vmem:[#allocation34_spill] sm:$0xff] }
0x11b4   :  { %v5863_v47 = vpop.f32.mrf.mxu0  ;;  %v2895_v43 = vpop.f32.mrf.mxu1  ;;  %v1286_v26 = vadd.f32 %v6116_v20, %v5868_v22 }
0x11b5   :  { %v2899_v25 = vadd.f32 %v2895_v43, %v1030_v61 }
0x11b6   :  { %v2643_v17 = vadd.f32 %v5855_v52, %v1286_v26 }
0x11c2   :  { %v2986_v11 = vpop.f32.mrf.mxu0 }
0x11c3   :  { %v2991_v29 = vadd.f32 %v2986_v11, %v2898_v49 }
0x11c4   :  { %v2988_v19 = vpop.f32.mrf.mxu0 }
0x11c5   :  { %v3915_v34 = vmul.f32 -1.442695, %v2991_v29  ;;  %v2992_v54 = vadd.f32 %v2988_v19, %v2899_v25 }
0x11c7   :  { %4226 = vpow2.f32 %v3915_v34  ;;  %v3916_v45 = vmul.f32 -1.442695, %v2992_v54 }
0x11c8   :  { %4228 = vtanh.f32 %v2992_v54 }
0x11d4   :  { %v4227_v32 = vpop.eup %4226 }
0x11d5   :  { %v2996_v59 = vadd.f32 1.0, %v4227_v32  ;;  %v4229_v57 = vpop.eup %4228 }
0x11d7   :  { %4230 = vrcp.f32 %v2996_v59 }
0x11d8   :  { %4232 = vpow2.f32 %v3916_v45  ;;  %v1542_v45 = vadd.f32 %v5251_v62, %v5868_v22 }
0x11e4   :  { %v4231_v3 = vpop.eup %4230 }
0x11e5   :  { %v3007_v0 = vmul.f32 %v4231_v3, %v4229_v57  ;;  %v4233_v31 = vpop.eup %4232  ;;  %v3006_v15 = vmul.f32 0.0, %v4231_v3 }
0x11e6   :  { %v3003_v10 = vadd.f32 1.0, %v4233_v31 }
0x11e7   :  { %3009 = vrot.lane.b32.xlu1 %v3007_v0, %s4487_s13 }
0x11e8   :  { %4234 = vrcp.f32 %v3003_v10  ;;  %v2387_v10 = vadd.f32 %v5750_v44, %v1542_v45 }
0x11f5   :  { %v4235_v13 = vpop.eup %4234 }
0x1259   :  { %v3010_v23 = vpop.permute.xlu1 %3009 }
0x125a   :  { %v3012_v38 = vadd.f32 %v3010_v23, %v3006_v15 }
0x125c   :  { %4236 = vtanh.f32 %v3012_v38 }
0x1269   :  { %v4237_v12 = vpop.eup %4236 }
0x126a   :  { %v3014_v4 = vmul.f32 %v4237_v12, %v4235_v13 }
0x126c   :  { %3018 = vrot.lane.b32.xlu0 %v3014_v4, %s4487_s13 }
0x12de   :  { %v3019_v36 = vpop.permute.xlu0 %3018 }
0x12df   :  { %3917 = vmatmul.mubr.msk.f32.vlgmr.msra.gmra.mxu1 %vm852_vm1, %v3019_v36 }
0x12e0   :  { %3243 = vmatpush1.msra.mxu1 %v5771_v63  ;;  %3290 = vmatprep.mubr.f32.mxu1 %v6081_v56 }
0x12e1   :  { %3244 = vmatprep.subr.mxu1 %v5773_v2 }
0x12e2   :  { %3245 = vmatpush1.msra.mxu1 %v5777_v60 }
0x12e3   :  { %3246 = vmatprep.subr.mxu1 %v5780_v5 }
0x12e4   :  { %3247 = vmatpush1.msra.mxu1 %v5784_v46 }
0x12e5   :  { %3248 = vmatprep.subr.mxu1 %v5788_v21 }
0x12e6   :  { %3249 = vmatpush1.msra.mxu1 %v5792_v18 }
0x12e7   :  { %3250 = vmatprep.subr.mxu1 %v5796_v28 }
0x12e8   :  { %3251 = vmatpush1.msra.mxu1 %v5800_v50 }
0x12e9   :  { %3252 = vmatprep.subr.mxu1 %v5804_v7 }
0x12ea   :  { %3253 = vmatpush1.msra.mxu1 %v5808_v58 }
0x12eb   :  { %3254 = vmatprep.subr.mxu1 %v5812_v27 }
0x12ec   :  { %3255 = vmatpush1.msra.mxu1 %v5816_v48 }
0x12ed   :  { %3256 = vmatprep.subr.mxu1 %v5820_v16 }
0x12ee   :  { %3257 = vmatpush1.msra.mxu1 %v5824_v55 }
0x12ef   :  { %3446 = vmatprep.subr.mxu1 %v5765_v6 }
0x139f   :  { %v3088_v8 = vpop.f32.mrf.mxu1 }
0x13a0   :  { %v3093_v1 = vadd.f32 %v3088_v8, %v5758_v37 }
0x13a1   :  { %v3090_v30 = vpop.f32.mrf.mxu1 }
0x13a2   :  { %v3918_v39 = vmul.f32 -1.442695, %v3093_v1  ;;  %v3094_v14 = vadd.f32 %v3090_v30, %v2643_v17 }
0x13a4   :  { %4238 = vpow2.f32 %v3918_v39  ;;  %v3919_v43 = vmul.f32 -1.442695, %v3094_v14 }
0x13a5   :  { %4240 = vtanh.f32 %v3094_v14 }
0x13b1   :  { %v4239_v49 = vpop.eup %4238 }
0x13b2   :  { %v3098_v11 = vadd.f32 1.0, %v4239_v49  ;;  %v4241_v29 = vpop.eup %4240 }
0x13b4   :  { %4242 = vrcp.f32 %v3098_v11  ;;  %v6117_v11 = vld [vmem:[#allocation28_spill] sm:$0xff] }
0x13b5   :  { %4244 = vpow2.f32 %v3919_v43 }
0x13c1   :  { %v4243_v34 = vpop.eup %4242 }
0x13c2   :  { %v3109_v35 = vmul.f32 %v4243_v34, %v4241_v29  ;;  %v4245_v37 = vpop.eup %4244  ;;  %v3108_v61 = vmul.f32 %v4243_v34, %v3012_v38  ;;  %v1798_v29 = vadd.f32 %v6117_v11, %v5868_v22 }
0x13c3   :  { %v3105_v40 = vadd.f32 1.0, %v4245_v37 }
0x13c4   :  { %3111 = vrot.lane.b32.xlu1 %v3109_v35, %s4487_s13  ;;  %v6118_v35 = vld [vmem:[#allocation21_spill] sm:$0xff] }
0x13c5   :  { %4246 = vrcp.f32 %v3105_v40  ;;  %v2131_v43 = vadd.f32 %v6118_v35, %v1798_v29 }
0x13d2   :  { %v4247_v52 = vpop.eup %4246 }
0x1436   :  { %v3112_v19 = vpop.permute.xlu1 %3111 }
0x1437   :  { %v3114_v25 = vadd.f32 %v3112_v19, %v3108_v61 }
0x1439   :  { %4248 = vtanh.f32 %v3114_v25 }
0x1446   :  { %v4249_v54 = vpop.eup %4248 }
0x1447   :  { %v3116_v32 = vmul.f32 %v4249_v54, %v4247_v52 }
0x1449   :  { %3120 = vrot.lane.b32.xlu0 %v3116_v32, %s4487_s13 }
0x14bb   :  { %v3121_v59 = vpop.permute.xlu0 %3120 }
0x14bc   :  { %3920 = vmatmul.mubr.msk.f32.vlgmr.msra.gmra.mxu0 %vm852_vm1, %v3121_v59 }
0x14bd   :  { %3345 = vmatpush1.msra.mxu0 %v5771_v63  ;;  %3392 = vmatprep.mubr.f32.mxu0 %v6081_v56 }
0x14be   :  { %3346 = vmatprep.subr.mxu0 %v5773_v2 }
0x14bf   :  { %3347 = vmatpush1.msra.mxu0 %v5777_v60 }
0x14c0   :  { %3348 = vmatprep.subr.mxu0 %v5780_v5 }
0x14c1   :  { %3349 = vmatpush1.msra.mxu0 %v5784_v46 }
0x14c2   :  { %3350 = vmatprep.subr.mxu0 %v5788_v21 }
0x14c3   :  { %3351 = vmatpush1.msra.mxu0 %v5792_v18 }
0x14c4   :  { %3352 = vmatprep.subr.mxu0 %v5796_v28 }
0x14c5   :  { %3353 = vmatpush1.msra.mxu0 %v5800_v50 }
0x14c6   :  { %3354 = vmatprep.subr.mxu0 %v5804_v7 }
0x14c7   :  { %3355 = vmatpush1.msra.mxu0 %v5808_v58 }
0x14c8   :  { %3356 = vmatprep.subr.mxu0 %v5812_v27 }
0x14c9   :  { %3357 = vmatpush1.msra.mxu0 %v5816_v48 }
0x14ca   :  { %3358 = vmatprep.subr.mxu0 %v5820_v16 }
0x14cb   :  { %3359 = vmatpush1.msra.mxu0 %v5824_v55 }
0x14cc   :  { %3548 = vmatprep.subr.mxu0 %v5765_v6 }
0x157c   :  { %v3190_v57 = vpop.f32.mrf.mxu0 }
0x157d   :  { %v3195_v3 = vadd.f32 %v3190_v57, %v5670_v53 }
0x157e   :  { %v3192_v31 = vpop.f32.mrf.mxu0 }
0x157f   :  { %v3921_v0 = vmul.f32 -1.442695, %v3195_v3  ;;  %v3196_v15 = vadd.f32 %v3192_v31, %v2387_v10 }
0x1581   :  { %4250 = vpow2.f32 %v3921_v0  ;;  %v3922_v36 = vmul.f32 -1.442695, %v3196_v15 }
0x1582   :  { %4252 = vtanh.f32 %v3196_v15  ;;  %v6119_v15 = vld [vmem:[#allocation19_spill] sm:$0xff] }
0x158e   :  { %v4251_v23 = vpop.eup %4250 }
0x158f   :  { %v3200_v38 = vadd.f32 1.0, %v4251_v23  ;;  %v4253_v13 = vpop.eup %4252 }
0x1591   :  { %4254 = vrcp.f32 %v3200_v38 }
0x1592   :  { %4256 = vpow2.f32 %v3922_v36  ;;  %v6121_v36 = vld [vmem:[#allocation20_spill] sm:$0xff] }
0x159e   :  { %v4255_v12 = vpop.eup %4254 }
0x159f   :  { %v3211_v4 = vmul.f32 %v4255_v12, %v4253_v13  ;;  %v4257_v53 = vpop.eup %4256  ;;  %v3210_v1 = vmul.f32 %v4255_v12, %v3114_v25  ;;  %v6120_v13 = vld [vmem:[#allocation18_spill] sm:$0xff] }
0x15a0   :  { %v3207_v8 = vadd.f32 1.0, %v4257_v53  ;;  %v1875_v12 = vadd.f32 %v6120_v13, %v5868_v22 }
0x15a1   :  { %3213 = vrot.lane.b32.xlu1 %v3211_v4, %s4487_s13 }
0x15a2   :  { %4258 = vrcp.f32 %v3207_v8  ;;  %v2054_v53 = vadd.f32 %v6121_v36, %v1875_v12 }
0x15af   :  { %v4259_v44 = vpop.eup %4258 }
0x1613   :  { %v3214_v39 = vpop.permute.xlu1 %3213 }
0x1614   :  { %v3216_v62 = vadd.f32 %v3214_v39, %v3210_v1 }
0x1616   :  { %4260 = vtanh.f32 %v3216_v62 }
0x1623   :  { %v4261_v20 = vpop.eup %4260 }
0x1624   :  { %v3218_v26 = vmul.f32 %v4261_v20, %v4259_v44 }
0x1626   :  { %3222 = vrot.lane.b32.xlu0 %v3218_v26, %s4487_s13 }
0x1698   :  { %v3223_v30 = vpop.permute.xlu0 %3222 }
0x1699   :  { %3923 = vmatmul.mubr.msk.f32.vlgmr.msra.gmra.mxu1 %vm852_vm1, %v3223_v30 }
0x169a   :  { %3447 = vmatpush1.msra.mxu1 %v5771_v63  ;;  %3494 = vmatprep.mubr.f32.mxu1 %v6081_v56 }
0x169b   :  { %3448 = vmatprep.subr.mxu1 %v5773_v2 }
0x169c   :  { %3449 = vmatpush1.msra.mxu1 %v5777_v60 }
0x169d   :  { %3450 = vmatprep.subr.mxu1 %v5780_v5 }
0x169e   :  { %3451 = vmatpush1.msra.mxu1 %v5784_v46 }
0x169f   :  { %3452 = vmatprep.subr.mxu1 %v5788_v21 }
0x16a0   :  { %3453 = vmatpush1.msra.mxu1 %v5792_v18 }
0x16a1   :  { %3454 = vmatprep.subr.mxu1 %v5796_v28 }
0x16a2   :  { %3455 = vmatpush1.msra.mxu1 %v5800_v50 }
0x16a3   :  { %3456 = vmatprep.subr.mxu1 %v5804_v7 }
0x16a4   :  { %3457 = vmatpush1.msra.mxu1 %v5808_v58 }
0x16a5   :  { %3458 = vmatprep.subr.mxu1 %v5812_v27 }
0x16a6   :  { %3459 = vmatpush1.msra.mxu1 %v5816_v48 }
0x16a7   :  { %3460 = vmatprep.subr.mxu1 %v5820_v16 }
0x16a8   :  { %3461 = vmatpush1.msra.mxu1 %v5824_v55 }
0x16a9   :  { %3650 = vmatprep.subr.mxu1 %v5765_v6 }
0x1759   :  { %v3292_v17 = vpop.f32.mrf.mxu1 }
0x175a   :  { %v3297_v14 = vadd.f32 %v3292_v17, %v5479_v9 }
0x175b   :  { %v3294_v34 = vpop.f32.mrf.mxu1 }
0x175c   :  { %v3924_v49 = vmul.f32 -1.442695, %v3297_v14  ;;  %v3298_v37 = vadd.f32 %v3294_v34, %v2131_v43 }
0x175e   :  { %4262 = vpow2.f32 %v3924_v49  ;;  %v3925_v6 = vmul.f32 -1.442695, %v3298_v37 }
0x175f   :  { %4264 = vtanh.f32 %v3298_v37 }
0x176b   :  { %v4263_v40 = vpop.eup %4262 }
0x176c   :  { %v3302_v61 = vadd.f32 1.0, %v4263_v40  ;;  %v4265_v19 = vpop.eup %4264 }
0x176e   :  { %4266 = vrcp.f32 %v3302_v61 }
0x176f   :  { %4268 = vpow2.f32 %v3925_v6 }
0x177b   :  { %v4267_v25 = vpop.eup %4266 }
0x177c   :  { %v3313_v52 = vmul.f32 %v4267_v25, %v4265_v19  ;;  %v4269_v9 = vpop.eup %4268  ;;  %v3312_v32 = vmul.f32 %v4267_v25, %v3216_v62 }
0x177d   :  { %v3309_v54 = vadd.f32 1.0, %v4269_v9 }
0x177e   :  { %3315 = vrot.lane.b32.xlu1 %v3313_v52, %s4487_s13 }
0x177f   :  { %4270 = vrcp.f32 %v3309_v54 }
0x178c   :  { %v4271_v3 = vpop.eup %4270 }
0x17f0   :  { %v3316_v59 = vpop.permute.xlu1 %3315 }
0x17f1   :  { %v3318_v57 = vadd.f32 %v3316_v59, %v3312_v32  ;;  %v6123_v32 = vld [vmem:[#allocation16_spill] sm:$0xff] }
0x17f2   :  { %v1363_v59 = vadd.f32 %v6123_v32, %v5868_v22 }
0x17f3   :  { %4272 = vtanh.f32 %v3318_v57 }
0x1800   :  { %v4273_v0 = vpop.eup %4272 }
0x1801   :  { %v3320_v45 = vmul.f32 %v4273_v0, %v4271_v3  ;;  %v2566_v3 = vadd.f32 %v5760_v42, %v1363_v59 }
0x1803   :  { %3324 = vrot.lane.b32.xlu0 %v3320_v45, %s4487_s13 }
0x1875   :  { %v3325_v31 = vpop.permute.xlu0 %3324 }
0x1876   :  { %3926 = vmatmul.mubr.msk.f32.vlgmr.msra.gmra.mxu0 %vm852_vm1, %v3325_v31 }
0x1877   :  { %3549 = vmatpush1.msra.mxu0 %v5771_v63  ;;  %3596 = vmatprep.mubr.f32.mxu0 %v6081_v56 }
0x1878   :  { %3550 = vmatprep.subr.mxu0 %v5773_v2 }
0x1879   :  { %3551 = vmatpush1.msra.mxu0 %v5777_v60 }
0x187a   :  { %3552 = vmatprep.subr.mxu0 %v5780_v5 }
0x187b   :  { %3553 = vmatpush1.msra.mxu0 %v5784_v46 }
0x187c   :  { %3554 = vmatprep.subr.mxu0 %v5788_v21 }
0x187d   :  { %3555 = vmatpush1.msra.mxu0 %v5792_v18 }
0x187e   :  { %3556 = vmatprep.subr.mxu0 %v5796_v28 }
0x187f   :  { %3557 = vmatpush1.msra.mxu0 %v5800_v50 }
0x1880   :  { %3558 = vmatprep.subr.mxu0 %v5804_v7 }
0x1881   :  { %3559 = vmatpush1.msra.mxu0 %v5808_v58 }
0x1882   :  { %3560 = vmatprep.subr.mxu0 %v5812_v27 }
0x1883   :  { %3561 = vmatpush1.msra.mxu0 %v5816_v48 }
0x1884   :  { %3562 = vmatprep.subr.mxu0 %v5820_v16 }
0x1885   :  { %3563 = vmatpush1.msra.mxu0 %v5824_v55 }
0x1886   :  { %4085 = vmatprep.subr.mxu0 %v6081_v56 }
0x1936   :  { %v3394_v10 = vpop.f32.mrf.mxu0 }
0x1937   :  { %v3399_v23 = vadd.f32 %v3394_v10, %v6119_v15 }
0x1938   :  { %v3396_v4 = vpop.f32.mrf.mxu0 }
0x1939   :  { %v3927_v38 = vmul.f32 -1.442695, %v3399_v23  ;;  %v3400_v8 = vadd.f32 %v3396_v4, %v2054_v53 }
0x193b   :  { %4274 = vpow2.f32 %v3927_v38  ;;  %v3928_v26 = vmul.f32 -1.442695, %v3400_v8 }
0x193c   :  { %4276 = vtanh.f32 %v3400_v8 }
0x1948   :  { %v4275_v1 = vpop.eup %4274 }
0x1949   :  { %v3404_v39 = vadd.f32 1.0, %v4275_v1  ;;  %v4277_v62 = vpop.eup %4276 }
0x194b   :  { %4278 = vrcp.f32 %v3404_v39 }
0x194c   :  { %4280 = vpow2.f32 %v3928_v26 }
0x1958   :  { %v4279_v44 = vpop.eup %4278 }
0x1959   :  { %v3415_v20 = vmul.f32 %v4279_v44, %v4277_v62  ;;  %v4281_v30 = vpop.eup %4280  ;;  %v3414_v14 = vmul.f32 %v4279_v44, %v3318_v57 }
0x195a   :  { %v3411_v17 = vadd.f32 1.0, %v4281_v30 }
0x195b   :  { %3417 = vrot.lane.b32.xlu1 %v3415_v20, %s4487_s13  ;;  %v6124_v20 = vld [vmem:[#allocation32_spill] sm:$0xff] }
0x195c   :  { %4282 = vrcp.f32 %v3411_v17  ;;  %v1107_v26 = vadd.f32 %v6124_v20, %v5868_v22 }
0x195e   :  { %v2822_v17 = vadd.f32 %v5863_v47, %v1107_v26  ;;  %v3734_v47 = vld [vmem:[%s6056_s10 + $0x28] sm:$0xff] }
0x1969   :  { %v4283_v29 = vpop.eup %4282 }
0x19cd   :  { %v3418_v49 = vpop.permute.xlu1 %3417 }
0x19ce   :  { %v3420_v11 = vadd.f32 %v3418_v49, %v3414_v14 }
0x19d0   :  { %4284 = vtanh.f32 %v3420_v11 }
0x19dd   :  { %v4285_v34 = vpop.eup %4284 }
0x19de   :  { %v3422_v35 = vmul.f32 %v4285_v34, %v4283_v29 }
0x19e0   :  { %3426 = vrot.lane.b32.xlu0 %v3422_v35, %s4487_s13 }
0x1a52   :  { %v3427_v43 = vpop.permute.xlu0 %3426 }
0x1a53   :  { %3929 = vmatmul.mubr.msk.f32.vlgmr.msra.gmra.mxu1 %vm852_vm1, %v3427_v43  ;;  %v3733_v43 = vld [vmem:[%s6056_s10 + $0x20] sm:$0xff] }
0x1a54   :  { %3651 = vmatpush1.msra.mxu1 %v5771_v63  ;;  %3698 = vmatprep.mubr.f32.mxu1 %v6081_v56 }
0x1a55   :  { %3652 = vmatprep.subr.mxu1 %v5773_v2 }
0x1a56   :  { %3653 = vmatpush1.msra.mxu1 %v5777_v60 }
0x1a57   :  { %3654 = vmatprep.subr.mxu1 %v5780_v5  ;;  %v6122_v5 = vld [vmem:[#allocation17_spill] sm:$0xff] }
0x1a58   :  { %3655 = vmatpush1.msra.mxu1 %v5784_v46  ;;  %v1619_v46 = vadd.f32 %v6122_v5, %v5868_v22  ;;  %v3735_v22 = vld [vmem:[%s6056_s10 + $0x30] sm:$0xff]  ;;  %v3729_v5 = vld [vmem:[%s6056_s10] sm:$0xff] }
0x1a59   :  { %3656 = vmatprep.subr.mxu1 %v5788_v21 }
0x1a5a   :  { %3657 = vmatpush1.msra.mxu1 %v5792_v18  ;;  %v2310_v18 = vadd.f32 %v5672_v24, %v1619_v46 }
0x1a5b   :  { %3658 = vmatprep.subr.mxu1 %v5796_v28 }
0x1a5c   :  { %3659 = vmatpush1.msra.mxu1 %v5800_v50 }
0x1a5d   :  { %3660 = vmatprep.subr.mxu1 %v5804_v7 }
0x1a5e   :  { %3661 = vmatpush1.msra.mxu1 %v5808_v58 }
0x1a5f   :  { %3662 = vmatprep.subr.mxu1 %v5812_v27 }
0x1a60   :  { %3663 = vmatpush1.msra.mxu1 %v5816_v48 }
0x1a61   :  { %3664 = vmatprep.subr.mxu1 %v5820_v16 }
0x1a62   :  { %3665 = vmatpush1.msra.mxu1 %v5824_v55 }
0x1b13   :  { %v3496_v63 = vpop.f32.mrf.mxu1 }
0x1b14   :  { %v3501_v2 = vadd.f32 %v3496_v63, %v5668_v33  ;;  %v3732_v63 = vld [vmem:[%s6056_s10 + $0x18] sm:$0xff] }
0x1b15   :  { %v3498_v21 = vpop.f32.mrf.mxu1 }
0x1b16   :  { %v3930_v60 = vmul.f32 -1.442695, %v3501_v2  ;;  %v3502_v28 = vadd.f32 %v3498_v21, %v2310_v18  ;;  %v3731_v2 = vld [vmem:[%s6056_s10 + $0x10] sm:$0xff] }
0x1b18   :  { %4286 = vpow2.f32 %v3930_v60  ;;  %v3931_v16 = vmul.f32 -1.442695, %v3502_v28  ;;  %v3730_v60 = vld [vmem:[%s6056_s10 + $0x8] sm:$0xff] }
0x1b19   :  { %4288 = vtanh.f32 %v3502_v28 }
0x1b25   :  { %v4287_v50 = vpop.eup %4286 }
0x1b26   :  { %v3506_v7 = vadd.f32 1.0, %v4287_v50  ;;  %v4289_v58 = vpop.eup %4288 }
0x1b28   :  { %4290 = vrcp.f32 %v3506_v7 }
0x1b29   :  { %4292 = vpow2.f32 %v3931_v16 }
0x1b35   :  { %v4291_v27 = vpop.eup %4290 }
0x1b36   :  { %v3517_v48 = vmul.f32 %v4291_v27, %v4289_v58  ;;  %v4293_v33 = vpop.eup %4292  ;;  %v3516_v37 = vmul.f32 %v4291_v27, %v3420_v11 }
0x1b37   :  { %v3513_v55 = vadd.f32 1.0, %v4293_v33 }
0x1b38   :  { %3519 = vrot.lane.b32.xlu1 %v3517_v48, %s4487_s13 }
0x1b39   :  { %4294 = vrcp.f32 %v3513_v55 }
0x1b46   :  { %v4295_v24 = vpop.eup %4294 }
0x1baa   :  { %v3520_v40 = vpop.permute.xlu1 %3519 }
0x1bab   :  { %v3522_v61 = vadd.f32 %v3520_v40, %v3516_v37 }
0x1bad   :  { %4296 = vtanh.f32 %v3522_v61 }
0x1bba   :  { %v4297_v19 = vpop.eup %4296 }
0x1bbb   :  { %v3524_v25 = vmul.f32 %v4297_v19, %v4295_v24 }
0x1bbd   :  { %3528 = vrot.lane.b32.xlu0 %v3524_v25, %s4487_s13 }
0x1c2f   :  { %v3529_v52 = vpop.permute.xlu0 %3528 }
0x1c30   :  { %3932 = vmatmul.mubr.msk.f32.vlgmr.msra.gmra.mxu0 %vm852_vm1, %v3529_v52 }
0x1c31   :  { %4101 = vmatprep.mubr.msk.f32.mxu0 %vm4488_vm2, %v6081_v56 }
0x1cf0   :  { %v3598_v6 = vpop.f32.mrf.mxu0 }
0x1cf1   :  { %v3603_v9 = vadd.f32 %v3598_v6, %v5756_v51 }
0x1cf2   :  { %v3600_v57 = vpop.f32.mrf.mxu0 }
0x1cf3   :  { %v3933_v54 = vmul.f32 -1.442695, %v3603_v9  ;;  %v3604_v0 = vadd.f32 %v3600_v57, %v2566_v3 }
0x1cf5   :  { %4298 = vpow2.f32 %v3933_v54  ;;  %v3934_v38 = vmul.f32 -1.442695, %v3604_v0 }
0x1cf6   :  { %4300 = vtanh.f32 %v3604_v0 }
0x1d02   :  { %v4299_v45 = vpop.eup %4298 }
0x1d03   :  { %v3608_v31 = vadd.f32 1.0, %v4299_v45  ;;  %v4301_v10 = vpop.eup %4300 }
0x1d05   :  { %4302 = vrcp.f32 %v3608_v31 }
0x1d06   :  { %4304 = vpow2.f32 %v3934_v38 }
0x1d12   :  { %v4303_v15 = vpop.eup %4302 }
0x1d13   :  { %v3619_v23 = vmul.f32 %v4303_v15, %v4301_v10  ;;  %v4305_v51 = vpop.eup %4304  ;;  %v3618_v12 = vmul.f32 %v4303_v15, %v3522_v61 }
0x1d14   :  { %v3615_v13 = vadd.f32 1.0, %v4305_v51 }
0x1d15   :  { %3621 = vrot.lane.b32.xlu1 %v3619_v23, %s4487_s13 }
0x1d16   :  { %4306 = vrcp.f32 %v3615_v13 }
0x1d23   :  { %v4307_v42 = vpop.eup %4306 }
0x1d87   :  { %v3622_v4 = vpop.permute.xlu1 %3621 }
0x1d88   :  { %v3624_v36 = vadd.f32 %v3622_v4, %v3618_v12 }
0x1d8a   :  { %4308 = vtanh.f32 %v3624_v36 }
0x1d97   :  { %v4309_v53 = vpop.eup %4308 }
0x1d98   :  { %v3626_v8 = vmul.f32 %v4309_v53, %v4307_v42 }
0x1d9a   :  { %3630 = vrot.lane.b32.xlu0 %v3626_v8, %s4487_s13 }
0x1e0c   :  { %v3631_v1 = vpop.permute.xlu0 %3630 }
0x1e0d   :  { %3935 = vmatmul.mubr.msk.f32.vlgmr.msra.gmra.mxu1 %vm852_vm1, %v3631_v1 }
0x1ecd   :  { %v3700_v39 = vpop.f32.mrf.mxu1 }
0x1ece   :  { %v3705_v62 = vadd.f32 %v3700_v39, %v5859_v41  ;;  %v3736_v41 = vld [vmem:[%s6056_s10 + $0x38] sm:$0xff] }
0x1ecf   :  { %v3702_v30 = vpop.f32.mrf.mxu1  ;;  %4086 = vmatpush3.msra.mxu0 %v3736_v41 }
0x1ed0   :  { %v3936_v44 = vmul.f32 -1.442695, %v3705_v62  ;;  %v3706_v14 = vadd.f32 %v3702_v30, %v2822_v17  ;;  %4087 = vmatprep.subr.mxu0 %v6081_v56 }
0x1ed1   :  { %4088 = vmatpush3.msra.mxu0 %v3735_v22 }
0x1ed2   :  { %4310 = vpow2.f32 %v3936_v44  ;;  %4089 = vmatprep.subr.mxu0 %v6081_v56  ;;  %v3937_v46 = vmul.f32 -1.442695, %v3706_v14 }
0x1ed3   :  { %4312 = vtanh.f32 %v3706_v14  ;;  %4090 = vmatpush3.msra.mxu0 %v3734_v47 }
0x1ed4   :  { %4091 = vmatprep.subr.mxu0 %v6081_v56 }
0x1ed5   :  { %4092 = vmatpush3.msra.mxu0 %v3733_v43 }
0x1ed6   :  { %4093 = vmatprep.subr.mxu0 %v6081_v56 }
0x1ed7   :  { %4094 = vmatpush3.msra.mxu0 %v3732_v63 }
0x1ed8   :  { %4095 = vmatprep.subr.mxu0 %v6081_v56 }
0x1ed9   :  { %4096 = vmatpush3.msra.mxu0 %v3731_v2 }
0x1eda   :  { %4097 = vmatprep.subr.mxu0 %v6081_v56 }
0x1edb   :  { %4098 = vmatpush3.msra.mxu0 %v3730_v60 }
0x1edc   :  { %4099 = vmatprep.subr.mxu0 %v6081_v56  ;;  %v3938_v56 = vld [vmem:[%s6057_s11] ss:$0 sm:$0xff] }
0x1edd   :  { %4100 = vmatpush3.msra.mxu0 %v3729_v5 }
0x1edf   :  { %v4311_v49 = vpop.eup %4310 }
0x1ee0   :  { %v3710_v11 = vadd.f32 1.0, %v4311_v49  ;;  %v4313_v29 = vpop.eup %4312 }
0x1ee2   :  { %4314 = vrcp.f32 %v3710_v11 }
0x1ee3   :  { %4316 = vpow2.f32 %v3937_v46 }
0x1eef   :  { %v4315_v34 = vpop.eup %4314 }
0x1ef0   :  { %v3721_v35 = vmul.f32 %v4315_v34, %v4313_v29  ;;  %v4317_v21 = vpop.eup %4316  ;;  %v3720_v28 = vmul.f32 %v4315_v34, %v3624_v36 }
0x1ef1   :  { %v3717_v18 = vadd.f32 1.0, %v4317_v21 }
0x1ef2   :  { %3723 = vrot.lane.b32.xlu1 %v3721_v35, %s4487_s13 }
0x1ef3   :  { %4318 = vrcp.f32 %v3717_v18 }
0x1f00   :  { %v4319_v58 = vpop.eup %4318 }
0x1f64   :  { %v3724_v50 = vpop.permute.xlu1 %3723 }
0x1f65   :  { %v3726_v7 = vadd.f32 %v3724_v50, %v3720_v28 }
0x1f67   :  { %4320 = vtanh.f32 %v3726_v7 }
0x1f74   :  { %v4321_v27 = vpop.eup %4320 }
0x1f75   :  { %v3728_v48 = vmul.f32 %v4321_v27, %v4319_v58 }
0x1f77   :  { %3745 = vrot.lane.b32.xlu0 %v3728_v48, %s4487_s13 }
0x1fe9   :  { %v3746_v16 = vpop.permute.xlu0 %3745 }
0x1fea   :  { %4102 = vmatmul.mubr.msk.f32.vlgmr.msra.gmra.mxu0 %vm852_vm1, %v3746_v16 }
0x20aa   :  { %v3815_v33 = vpop.f32.mrf.mxu0 }
0x20ab   :  { %v3816_v55 = vadd.f32 %v3938_v56, %v3815_v33 }
0x20ac   :  { %v4103_v37 = vpop.f32.mrf.mxu0 }
0x20ad   :  { %3820 = vst.msk [vmem:[%s6058_s12] sm:$0xff] %vm3819_vm3, %v3816_v55 }
0x20ae   :  { %3825 = vsyncpa [#allocation5], 1 }
0x20af   :  { %3826 = vsyncpa [#allocation7], 1 }
0x20b0   :  { %3827 = vsyncpa [#allocation10], 1 }

</bundles_post_ra>
